<compile_context>
chip_gen: v5e
topology: v5e:2x2
jax: 0.10.0
libtpu: 0.0.40
codegen_flags: <defaults>
</compile_context>

<pallas_src>
import jax
import jax.numpy as jnp
from jax.experimental import pallas as pl
from jax.experimental.pallas import tpu as pltpu


def _ctg_kernel(x_ref, w_ref, a_ref, b_ref, o_ref):
    """Fused pointwise conv + graph aggregation for one (sample, T-tile).

    x_ref: (1, tT, V, C_in)    bf16 input tile (channel-last)
    w_ref: (C_in, K*C_out)     bf16 conv weights, k-major / c-minor columns
    a_ref: (K, V, W)           f32 adjacency
    b_ref: (W, C_out)          f32 bias folded through the graph aggregation
    o_ref: (1, tT, W, C_out)   f32 output tile
    """
    _, tT, V, C_in = x_ref.shape
    KC = w_ref.shape[1]
    K = a_ref.shape[0]
    W = a_ref.shape[2]
    C_out = KC // K

    # One wide MXU matmul over all K spatial kernels (f32 accumulation).
    x2d = x_ref[0].reshape(tT * V, C_in)                              # (tT*V, C_in)
    z = jnp.dot(x2d, w_ref[...], preferred_element_type=jnp.float32)  # (tT*V, K*C_out)
    z = z.reshape(tT, V, KC)                                          # (tT, V, K*C_out)

    # Graph aggregation: y[t, w, c] = sum_{k, v} z[t, v, k*C_out + c] * A[k, v, w]
    # K is a small static constant -> unrolled Python loop, local accumulator.
    acc = jnp.zeros((tT, W, C_out), dtype=jnp.float32)
    for k in range(K):
        zk = z[:, :, k * C_out:(k + 1) * C_out]                       # (tT, V, C_out)
        ak = a_ref[k]                                                 # (V, W)
        acc = acc + jnp.einsum('tvc,vw->twc', zk, ak,
                               preferred_element_type=jnp.float32)

    # Folded bias added once (instead of K broadcast+add passes over (T, V, C)).
    o_ref[0] = acc + b_ref[...][None, :, :]


def _largest_divisor_leq(n, cap):
    for d in range(min(n, cap), 0, -1):
        if n % d == 0:
            return d
    return 1


def conv_temporal_graphical(x_nchw, A, weight, bias, kernel_size,
                            compute_dtype=jnp.bfloat16):
    """x_nchw: (N, C_in, T, V) f32; A: (K, V, W) f32; weight: (K*C_out, C_in);
    bias: (K*C_out,). Returns (y, A) with y: (N, C_out, T, W) f32."""
    N, C_in, T, V = x_nchw.shape
    K, V2, W = A.shape
    assert K == kernel_size and V2 == V
    KC = weight.shape[0]
    C_out = KC // K

    # --- layout / parameter plumbing in plain JAX (outside the kernel) ---
    # channel-last x; cast matmul inputs to bf16 (halves HBM->VMEM bytes),
    # accumulation stays f32 inside the kernel.
    x = jnp.transpose(x_nchw, (0, 2, 3, 1)).astype(compute_dtype)      # (N, T, V, C_in)
    # conv weights as (C_in, K*C_out), column index = k*C_out + c (k-major)
    w_all = jnp.transpose(weight.reshape(K, C_out, C_in), (2, 0, 1))
    w_all = w_all.reshape(C_in, K * C_out).astype(compute_dtype)
    # bias folded through the linear graph aggregation:
    #   b_eff[w, c] = sum_k bias[k, c] * sum_v A[k, v, w]
    a_f32 = A.astype(jnp.float32)
    b_eff = jnp.einsum('kc,kw->wc', bias.reshape(K, C_out).astype(jnp.float32),
                       jnp.sum(a_f32, axis=1))                          # (W, C_out)

    # T tiling: keep per-tile x / z / out blocks small enough for v7x VMEM
    # while giving the megacore plenty of parallel grid iterations.
    tT = _largest_divisor_leq(T, 128)
    grid = (N, T // tT)

    out = pl.pallas_call(
        _ctg_kernel,
        out_shape=jax.ShapeDtypeStruct((N, T, W, C_out), jnp.float32),
        grid_spec=pltpu.PrefetchScalarGridSpec(
            num_scalar_prefetch=0,
            grid=grid,
            in_specs=[
                pl.BlockSpec((1, tT, V, C_in), lambda n, t: (n, t, 0, 0)),
                pl.BlockSpec((C_in, K * C_out), lambda n, t: (0, 0)),
                pl.BlockSpec((K, V, W), lambda n, t: (0, 0, 0)),
                pl.BlockSpec((W, C_out), lambda n, t: (0, 0)),
            ],
            out_specs=pl.BlockSpec((1, tT, W, C_out), lambda n, t: (n, t, 0, 0)),
        ),
        compiler_params=pltpu.CompilerParams(
            dimension_semantics=("parallel", "parallel"),
            vmem_limit_bytes=48 * 1024 * 1024,
        ),
    )(x, w_all, a_f32, b_eff)

    y = jnp.transpose(out, (0, 3, 1, 2))                               # (N, C_out, T, W)
    return y, A


def _reference(x_nchw, A, weight, bias, kernel_size):
    """Plain-JAX f32 reference mirroring the PyTorch forward."""
    N, C_in, T, V = x_nchw.shape
    K = kernel_size
    C_out = weight.shape[0] // K
    xc = jnp.einsum('nctv,oc->notv', x_nchw, weight) + bias[None, :, None, None]
    xc = xc.reshape(N, K, C_out, T, V)
    return jnp.einsum('nkctv,kvw->nctw', xc, A)


if __name__ == "__main__":
    # small deterministic shapes consistent with the module
    N, C_in, C_out, K, T, V = 2, 4, 8, 3, 8, 16
    W = V  # adjacency is (K, V, V)

    key = jax.random.PRNGKey(0)
    kx, ka, kw, kb = jax.random.split(key, 4)

    x = jax.random.normal(kx, (N, C_in, T, V), dtype=jnp.float32)
    A = jax.random.normal(ka, (K, V, W), dtype=jnp.float32)
    # Conv2d(C_in, C_out*K, kernel_size=(1,1), bias=True) parameters
    weight = jax.random.normal(kw, (K * C_out, C_in), dtype=jnp.float32) * 0.1
    bias = jax.random.normal(kb, (K * C_out,), dtype=jnp.float32) * 0.1

    y, A_out = conv_temporal_graphical(x, A, weight, bias, K)
    y = jax.block_until_ready(y)

    y_ref = _reference(x, A, weight, bias, K)
    assert y.shape == (N, C_out, T, W)
    # bf16 MXU inputs with f32 accumulation -> small numerical drift vs f32 ref
    assert jnp.allclose(y, y_ref, atol=3e-2, rtol=3e-2), "mismatch vs reference"

    print("KERNEL_OK")
</pallas_src>

<mosaic_0001>
module attributes {stable_mosaic.version = 11 : i64} {
  func.func @_ctg_kernel(%arg0: i32, %arg1: i32, %arg2: memref<1x8x16x4xbf16, #tpu.memory_space<vmem>>, %arg3: memref<4x24xbf16, #tpu.memory_space<vmem>>, %arg4: memref<3x16x16xf32, #tpu.memory_space<vmem>>, %arg5: memref<16x8xf32, #tpu.memory_space<vmem>>, %arg6: memref<1x8x16x8xf32, #tpu.memory_space<vmem>>) attributes {dimension_semantics = [#tpu.dimension_semantics<parallel>, #tpu.dimension_semantics<parallel>], iteration_bounds = array<i64: 2, 1>, scalar_prefetch = 0 : i64, scratch_operands = 0 : i64, tpu.core_type = #tpu.core_type<tc>, window_params = [{transform_indices = @transform_0, window_bounds = array<i64: 1, 8, 16, 4>}, {pipeline_mode = #tpu.pipeline_mode<synchronous>, transform_indices = @transform_1, window_bounds = array<i64: 4, 24>}, {pipeline_mode = #tpu.pipeline_mode<synchronous>, transform_indices = @transform_2, window_bounds = array<i64: 3, 16, 16>}, {pipeline_mode = #tpu.pipeline_mode<synchronous>, transform_indices = @transform_3, window_bounds = array<i64: 16, 8>}, {transform_indices = @transform_4, window_bounds = array<i64: 1, 8, 16, 8>}]} {
    %c0 = arith.constant 0 : index
    %c0_0 = arith.constant 0 : index
    %c0_1 = arith.constant 0 : index
    %c0_2 = arith.constant 0 : index
    %0 = vector.load %arg2[%c0, %c0_0, %c0_1, %c0_2] : memref<1x8x16x4xbf16, #tpu.memory_space<vmem>>, vector<1x8x16x4xbf16>
    %1 = vector.shape_cast %0 : vector<1x8x16x4xbf16> to vector<8x16x4xbf16>
    %2 = vector.shape_cast %1 : vector<8x16x4xbf16> to vector<128x4xbf16>
    %c0_3 = arith.constant 0 : index
    %c0_4 = arith.constant 0 : index
    %3 = vector.load %arg3[%c0_3, %c0_4] : memref<4x24xbf16, #tpu.memory_space<vmem>>, vector<4x24xbf16>
    %cst = arith.constant dense<0.000000e+00> : vector<128x24xf32>
    %4 = tpu.matmul %2, %3, %cst {dimension_numbers = #tpu.dot_dimension_numbers<[1], [0], [0], [1], [0, 0, 1, 1], [], []>} : vector<128x4xbf16>, vector<4x24xbf16>, vector<128x24xf32> -> vector<128x24xf32>
    %5 = vector.shape_cast %4 : vector<128x24xf32> to vector<8x16x24xf32>
    %cst_5 = arith.constant 0.000000e+00 : f32
    %6 = vector.broadcast %cst_5 : f32 to vector<8x16x8xf32>
    %7 = vector.extract_strided_slice %5 {offsets = [0, 0, 0], sizes = [8, 16, 8], strides = [1, 1, 1]} : vector<8x16x24xf32> to vector<8x16x8xf32>
    %c0_6 = arith.constant 0 : index
    %c0_7 = arith.constant 0 : index
    %c0_8 = arith.constant 0 : index
    %8 = vector.load %arg4[%c0_6, %c0_7, %c0_8] : memref<3x16x16xf32, #tpu.memory_space<vmem>>, vector<1x16x16xf32>
    %9 = vector.shape_cast %8 : vector<1x16x16xf32> to vector<16x16xf32>
    "tpu.trace_start"() <{level = 10 : i32, message = "tvc,vw->twc"}> : () -> ()
    %cst_9 = arith.constant dense<0.000000e+00> : vector<16x8x8xf32>
    %10 = tpu.matmul %9, %7, %cst_9 {dimension_numbers = #tpu.dot_dimension_numbers<[0], [1], [1], [0, 2], [0, 1, 1, 0, 1, 2], [], []>} : vector<16x16xf32>, vector<8x16x8xf32>, vector<16x8x8xf32> -> vector<16x8x8xf32>
    %11 = tpu.transpose %10, [1, 0, 2] : vector<16x8x8xf32> -> vector<8x16x8xf32>
    "tpu.trace_stop"() : () -> ()
    %12 = arith.addf %6, %11 : vector<8x16x8xf32>
    %13 = vector.extract_strided_slice %5 {offsets = [0, 0, 8], sizes = [8, 16, 8], strides = [1, 1, 1]} : vector<8x16x24xf32> to vector<8x16x8xf32>
    %c1 = arith.constant 1 : index
    %c0_10 = arith.constant 0 : index
    %c0_11 = arith.constant 0 : index
    %14 = vector.load %arg4[%c1, %c0_10, %c0_11] : memref<3x16x16xf32, #tpu.memory_space<vmem>>, vector<1x16x16xf32>
    %15 = vector.shape_cast %14 : vector<1x16x16xf32> to vector<16x16xf32>
    "tpu.trace_start"() <{level = 10 : i32, message = "tvc,vw->twc"}> : () -> ()
    %cst_12 = arith.constant dense<0.000000e+00> : vector<16x8x8xf32>
    %16 = tpu.matmul %15, %13, %cst_12 {dimension_numbers = #tpu.dot_dimension_numbers<[0], [1], [1], [0, 2], [0, 1, 1, 0, 1, 2], [], []>} : vector<16x16xf32>, vector<8x16x8xf32>, vector<16x8x8xf32> -> vector<16x8x8xf32>
    %17 = tpu.transpose %16, [1, 0, 2] : vector<16x8x8xf32> -> vector<8x16x8xf32>
    "tpu.trace_stop"() : () -> ()
    %18 = arith.addf %12, %17 : vector<8x16x8xf32>
    %19 = vector.extract_strided_slice %5 {offsets = [0, 0, 16], sizes = [8, 16, 8], strides = [1, 1, 1]} : vector<8x16x24xf32> to vector<8x16x8xf32>
    %c2 = arith.constant 2 : index
    %c0_13 = arith.constant 0 : index
    %c0_14 = arith.constant 0 : index
    %20 = vector.load %arg4[%c2, %c0_13, %c0_14] : memref<3x16x16xf32, #tpu.memory_space<vmem>>, vector<1x16x16xf32>
    %21 = vector.shape_cast %20 : vector<1x16x16xf32> to vector<16x16xf32>
    "tpu.trace_start"() <{level = 10 : i32, message = "tvc,vw->twc"}> : () -> ()
    %cst_15 = arith.constant dense<0.000000e+00> : vector<16x8x8xf32>
    %22 = tpu.matmul %21, %19, %cst_15 {dimension_numbers = #tpu.dot_dimension_numbers<[0], [1], [1], [0, 2], [0, 1, 1, 0, 1, 2], [], []>} : vector<16x16xf32>, vector<8x16x8xf32>, vector<16x8x8xf32> -> vector<16x8x8xf32>
    %23 = tpu.transpose %22, [1, 0, 2] : vector<16x8x8xf32> -> vector<8x16x8xf32>
    "tpu.trace_stop"() : () -> ()
    %24 = arith.addf %18, %23 : vector<8x16x8xf32>
    %c0_16 = arith.constant 0 : index
    %c0_17 = arith.constant 0 : index
    %25 = vector.load %arg5[%c0_16, %c0_17] : memref<16x8xf32, #tpu.memory_space<vmem>>, vector<16x8xf32>
    %26 = vector.shape_cast %25 : vector<16x8xf32> to vector<1x16x8xf32>
    %27 = vector.broadcast %26 : vector<1x16x8xf32> to vector<8x16x8xf32>
    %28 = arith.addf %24, %27 : vector<8x16x8xf32>
    %c0_18 = arith.constant 0 : index
    %c0_19 = arith.constant 0 : index
    %c0_20 = arith.constant 0 : index
    %c0_21 = arith.constant 0 : index
    %29 = vector.load %arg6[%c0_18, %c0_19, %c0_20, %c0_21] : memref<1x8x16x8xf32, #tpu.memory_space<vmem>>, vector<1x8x16x8xf32>
    %30 = vector.shape_cast %29 : vector<1x8x16x8xf32> to vector<8x16x8xf32>
    %31 = vector.shape_cast %28 : vector<8x16x8xf32> to vector<1x8x16x8xf32>
    tpu.vector_store %arg6[%c0_18, %c0_19, %c0_20, %c0_21], %31 {strides = array<i32>} : memref<1x8x16x8xf32, #tpu.memory_space<vmem>>, vector<1x8x16x8xf32>,
    return
  }
  func.func @transform_0(%arg0: i32, %arg1: i32) -> (i32, i32, i32, i32) {
    %c0_i32 = arith.constant 0 : i32
    %c0_i32_0 = arith.constant 0 : i32
    %c0_i32_1 = arith.constant 0 : i32
    return %arg0, %arg1, %c0_i32, %c0_i32_0 : i32, i32, i32, i32
  }
  func.func @transform_1(%arg0: i32, %arg1: i32) -> (i32, i32) {
    %c0_i32 = arith.constant 0 : i32
    %c0_i32_0 = arith.constant 0 : i32
    %c0_i32_1 = arith.constant 0 : i32
    return %c0_i32, %c0_i32_0 : i32, i32
  }
  func.func @transform_2(%arg0: i32, %arg1: i32) -> (i32, i32, i32) {
    %c0_i32 = arith.constant 0 : i32
    %c0_i32_0 = arith.constant 0 : i32
    %c0_i32_1 = arith.constant 0 : i32
    %c0_i32_2 = arith.constant 0 : i32
    return %c0_i32, %c0_i32_0, %c0_i32_1 : i32, i32, i32
  }
  func.func @transform_3(%arg0: i32, %arg1: i32) -> (i32, i32) {
    %c0_i32 = arith.constant 0 : i32
    %c0_i32_0 = arith.constant 0 : i32
    %c0_i32_1 = arith.constant 0 : i32
    return %c0_i32, %c0_i32_0 : i32, i32
  }
  func.func @transform_4(%arg0: i32, %arg1: i32) -> (i32, i32, i32, i32) {
    %c0_i32 = arith.constant 0 : i32
    %c0_i32_0 = arith.constant 0 : i32
    %c0_i32_1 = arith.constant 0 : i32
    return %arg0, %arg1, %c0_i32, %c0_i32_0 : i32, i32, i32, i32
  }
}

</mosaic_0001>

<bundles_post_ra>
// kernel: tpu_custom_call.1
= control target key start
LH: loop header
LB: loop body
LE: loop exit
PB: predicated region body
PF: predicated region fallthrough
CT: control target
= control target key end

     0   :  { %s4342_s15 = smov 0   ;;  %s4344_s16 = smov 0   ;;  %s6733_s0 = inlined_call_operand.vmem [shape: bf16[2,8,16,4], index: 0, kind: input, shape index: {}]   ;;  %s6734_s1 = inlined_call_operand.vmem [shape: bf16[4,24], index: 1, kind: input, shape index: {}]   ;;  %s6735_s2 = inlined_call_operand.vmem [shape: f32[3,16,16], index: 2, kind: input, shape index: {}]   ;;  %s6736_s3 = inlined_call_operand.vmem [shape: f32[16,8], index: 3, kind: input, shape index: {}]   ;;  %s6737_s4 = inlined_call_operand.vmem [shape: f32[2,8,16,8], index: 4, kind: output, shape index: {}]  }
   0x1   :  { %s4346_s17 = smov 0  }
   0x2 LB: > { %s26_s18 = sadd.s32 1, %s4294_s16  ;;  %p3980_p0 = scmp.ge.s32.totalorder %s4298_s17, 1  ;;  %s4298_s17 = sphi %s4346_s17, %s14_s17   ;;  %s4294_s16 = sphi %s4344_s16, %s6815_s16   ;;  %s4290_s15 = sphi %s4342_s15, %s6814_s15  }
   0x3   : > { %p28_p1 = scmp.ge.s32.totalorder %s26_s18, 2  ;;  %p184_p2 = scmp.lt.s32.totalorder %s4298_s17, 3 }
   0x5   : > { %s6817_s18 = smov (%p28_p1, %s26_s18), 0  ;;  %p185_p3 = pnand %p3980_p0, %p184_p2 }
   0x7   : > { %188 = sbr.rel (%p185_p3) target bundleno = 1064 (0x428), region = 36 }
   0xc   : > { %v259_v0 = vld [vmem:[%s6734_s1] sm:$0x3]  ;;  %vm325_vm0 = vcmask 1041408   ;;  %p221_p4 = scmp.lt.s32.totalorder %s4290_s15, 1  ;;  %vm300_vm1 = vcmask 31744   ;;  %v379_v7 = vld [vmem:[%s6735_s2 + $0x8] sm:$0xff] }
   0xd   : > { %v378_v1 = vld [vmem:[%s6735_s2] sm:$0xff]  ;;  %v327_v2 = vsel %vm325_vm0, %v259_v0, 0  ;;  %v4300_v8 = vmov 1983009808   ;;  %v4301_v10 = vmov 1934713408  }
   0xe   : > { %985 = vxpose.xlu2.b32.start [1/2] (short) (narrow) %v378_v1, 16  ;;  %336 = vmatpush.bf16.msra.mxu0 %v327_v2  ;;  %s6819_s15 = smov (!%p221_p4, %s4290_s15), 1  ;;  %v386_v9 = vunpack.c.l.s4 %v4300_v8  ;;  %v434_v11 = vunpack.c.l.s4 %v4301_v10  ;;  %v4302_v13 = vmov 0.0   ;;  %vm381_vm2 = vcmask 1047556   ;;  %s4303_s29 = smov 8  }
   0xf   : > { %4047 = vmatpush.bf16.msra.mxu1 %v327_v2  ;;  %4048 = vmatpush.bf16.msra.mxu2 %v327_v2  ;;  %s4037_s23 = sshll.u32 %s6819_s15, 6  ;;  %s4304_s30 = smov 24   ;;  %vm885_vm3 = vcmask 64512   ;;  %vm888_vm4 = vcmask 130048   ;;  %vm891_vm5 = vcmask 195584   ;;  %vm894_vm6 = vcmask 261120  }
  0x10   : > { %4049 = vmatpush.bf16.msra.mxu3 %v327_v2  ;;  %s4372_s26 = scalar_lea.vmem %s6733_s0, %s4037_s23  ;;  %v4385_v12 = vunpack.c.0.s8 %v386_v9  ;;  %v4388_v15 = vunpack.c.0.s8 %v434_v11  ;;  %s4305_s5 = smov 32   ;;  %vm897_vm7 = vcmask 326656   ;;  %vm900_vm8 = vcmask 392192  }
  0x11   : > { %v4039_v3 = vld [vmem:[%s4372_s26] sm:$0xff]  ;;  %v4042_v4 = vld [vmem:[%s4372_s26 + $0x18] sm:$0xff]  ;;  %v4044_v5 = vld [vmem:[%s4372_s26 + $0x28] sm:$0xff]  ;;  %s4306_s6 = smov 48   ;;  %s4307_s7 = smov 56   ;;  %vm903_vm9 = vcmask 457728  }
  0x12   : > { %v4045_v6 = vld [vmem:[%s4372_s26 + $0x30] sm:$0xff]  ;;  %4017 = vmatmul.msk.bf16.vlgmr.msra.gmra.mxu0 %vm300_vm1, %v4039_v3  ;;  %4020 = vmatmul.msk.bf16.vlgmr.msra.gmra.mxu1 %vm300_vm1, %v4042_v4  ;;  %v911_v14 = vperm.slane %v4302_v13, %v4385_v12  ;;  %v4040_v21 = vld [vmem:[%s4372_s26 + $0x8] sm:$0xff]  ;;  %v4043_v22 = vld [vmem:[%s4372_s26 + $0x20] sm:$0xff]  ;;  %s4308_s8 = smov 16   ;;  %s4309_s9 = smov 40  }
  0x13   : > { %4022 = vmatmul.msk.bf16.vlgmr.msra.gmra.mxu2 %vm300_vm1, %v4044_v5  ;;  %4023 = vmatmul.msk.bf16.vlgmr.msra.gmra.mxu3 %vm300_vm1, %v4045_v6  ;;  %v4046_v25 = vld [vmem:[%s4372_s26 + $0x38] sm:$0xff]  ;;  %v4041_v30 = vld [vmem:[%s4372_s26 + $0x10] sm:$0xff]  ;;  %s4310_s10 = smov 112   ;;  %s4311_s11 = smov 120  }
  0x14   : > { %v916_v16 = vrot.slane %v911_v14, 4  ;;  %s4312_s24 = smov 80   ;;  %s4313_s25 = smov 72  }
  0x15   : > { %s4314_s26 = smov 104   ;;  %s4315_s27 = smov 96  }
  0x16   : > { %986 = vxpose.xlu2.b32.end [2/2] (short) (narrow) %v379_v7, 16  ;;  %v917_v17 = vsel %vm381_vm2, %v916_v16, %v911_v14  ;;  %v918_v18 = vsel %vm381_vm2, %v911_v14, %v916_v16  ;;  %s4316_s28 = smov 88  }
  0x17   : > { %v922_v19 = vperm.slane %v917_v17, %v4388_v15  ;;  %v926_v20 = vperm.slane %v918_v18, %v4388_v15 }
  0x19   : > { %v938_v23 = vrot.slane %v922_v19, 4  ;;  %v941_v24 = vrot.slane %v926_v20, 4 }
  0x1b   : > { %v940_v26 = vsel %vm381_vm2, %v922_v19, %v938_v23  ;;  %v943_v27 = vsel %vm381_vm2, %v926_v20, %v941_v24  ;;  %v4405_v28 = vsel %vm381_vm2, %v938_v23, %v922_v19  ;;  %v942_v29 = vsel %vm381_vm2, %v941_v24, %v926_v20 }
  0x1c   : > { %951 = vrot.lane.b32.xlu1 %v940_v26, %s4303_s29  ;;  %959 = vrot.lane.b32.xlu0 %v943_v27, %s4304_s30 }
  0x22   : > { %4018 = vmatmul.msk.bf16.gmra.mxu0 %vm300_vm1, %v4040_v21  ;;  %4021 = vmatmul.msk.bf16.gmra.mxu1 %vm300_vm1, %v4043_v22 }
  0x23   : > { %4024 = vmatmul.msk.bf16.gmra.mxu3 %vm300_vm1, %v4046_v25 }
  0x24   : > { %963 = vrot.lane.b32.xlu1 %v4405_v28, %s4305_s5  ;;  %971 = vrot.lane.b32.xlu0 %v942_v29, %s4306_s6 }
  0x2c   : > { %975 = vrot.lane.b32.xlu1 %v943_v27, %s4307_s7 }
  0x32   : > { %4019 = vmatmul.msk.bf16.gmra.mxu0 %vm300_vm1, %v4041_v30 }
  0x7f   : > { %955 = vrot.lane.b32.xlu2 %v942_v29, %s4308_s8 }
  0x87   : > { %967 = vrot.lane.b32.xlu2 %v940_v26, %s4309_s9 }
  0x8f   : > { %v4416_v31 = vpop.f32.mrf.mxu0  ;;  %v353_v32 = vpop.f32.mrf.mxu1 }
  0x90   : > { %v393_v39 = vrot.slane %v353_v32, 4  ;;  %v383_v58 = vrot.slane %v4416_v31, 4 }
  0x96   : > { %v368_v33 = vpop.f32.mrf.mxu3  ;;  %v4422_v38 = vpop.f32.mrf.mxu2 }
  0x97   : > { %v4418_v34 = vpop.f32.mrf.mxu0  ;;  %v355_v35 = vpop.f32.mrf.mxu1  ;;  %v4091_v36 = vpack.i.bf16 %v368_v33, %v353_v32  ;;  %v405_v41 = vrot.slane %v368_v33, 4  ;;  %v419_v54 = vrot.slane %v4422_v38, 4 }
  0x98   : > { %v4096_v37 = vpack.i.bf16 %v4418_v34, %v4416_v31  ;;  %v4101_v40 = vpack.i.bf16 %v355_v35, %v353_v32  ;;  %v495_v59 = vrot.slane %v4418_v34, 4  ;;  %v505_v60 = vrot.slane %v355_v35, 4 }
  0x99   : > { %4092 = vrot.lane.b32.xlu0 %v4091_v36, %s4310_s10 }
  0x9a   : > { %4097 = vrot.lane.b32.xlu1 %v4096_v37, %s4311_s11 }
  0x9e   : > { %v370_v42 = vpop.f32.mrf.mxu3  ;;  %v4445_v55 = vpop.f32.mrf.mxu2 }
  0x9f   : > { %v4426_v43 = vpop.f32.mrf.mxu0  ;;  %v4428_v44 = vpop.f32.mrf.mxu1  ;;  %v4111_v45 = vpack.i.bf16 %v370_v42, %v368_v33  ;;  %v531_v61 = vrot.slane %v4445_v55, 4  ;;  %v517_v62 = vrot.slane %v370_v42, 4  ;;  %v4106_v63 = vpack.i.bf16 %v4445_v55, %v4422_v38 }
  0xa0   : > { %v394_v46 = vsel %vm381_vm2, %v393_v39, %v4426_v43  ;;  %v395_v47 = vrot.slane %v4426_v43, 4  ;;  %v406_v48 = vsel %vm381_vm2, %v405_v41, %v4428_v44  ;;  %v407_v49 = vrot.slane %v4428_v44, 4 }
  0xa1   : > { %4102 = vrot.lane.b32.xlu0 %v4101_v40, %s4311_s11  ;;  %v4439_v51 = vperm.slane %v394_v46, %v4385_v12  ;;  %v412_v53 = vperm.slane %v406_v48, %v4385_v12  ;;  %v4116_v3 = vpack.i.bf16 %v370_v42, %v355_v35  ;;  %v4121_v4 = vpack.i.bf16 %v4416_v31, %v4445_v55 }
  0xa2   : > { %v396_v50 = vsel %vm381_vm2, %v353_v32, %v395_v47  ;;  %v408_v52 = vsel %vm381_vm2, %v368_v33, %v407_v49  ;;  %4112 = vrot.lane.b32.xlu1 %v4111_v45, %s4311_s11 }
  0xa3   : > { %v4448_v56 = vperm.slane %v396_v50, %v4385_v12  ;;  %v416_v57 = vperm.slane %v408_v52, %v4385_v12  ;;  %v429_v0 = vrot.slane %v4439_v51, 4  ;;  %v455_v1 = vrot.slane %v412_v53, 4 }
  0xa5   : > { %v441_v5 = vrot.slane %v4448_v56, 4  ;;  %v467_v6 = vrot.slane %v416_v57, 4 }
  0xa6   : > { %v4457_v2 = vpop.f32.mrf.mxu3 }
  0xa7   : > { %v417_v7 = vrot.slane %v4457_v2, 4  ;;  %v420_v8 = vsel %vm381_vm2, %v4457_v2, %v419_v54  ;;  %v4465_v9 = vpop.f32.mrf.mxu0  ;;  %v4467_v10 = vpop.f32.mrf.mxu1  ;;  %v4126_v29 = vpack.i.bf16 %v4457_v2, %v4422_v38 }
  0xa8   : > { %v428_v11 = vperm.slane %v420_v8, %v4385_v12  ;;  %v506_v13 = vsel %vm381_vm2, %v505_v60, %v4465_v9  ;;  %v507_v14 = vrot.slane %v4465_v9, 4  ;;  %v518_v16 = vsel %vm381_vm2, %v517_v62, %v4467_v10 }
  0xa9   : > { %v418_v17 = vsel %vm381_vm2, %v417_v7, %v4422_v38  ;;  %v4478_v18 = vperm.slane %v506_v13, %v4385_v12  ;;  %v519_v19 = vrot.slane %v4467_v10, 4  ;;  %v524_v20 = vperm.slane %v518_v16, %v4385_v12  ;;  %4107 = vrot.lane.b32.xlu0 %v4106_v63, %s4311_s11 }
  0xaa   : > { %v424_v21 = vperm.slane %v418_v17, %v4385_v12  ;;  %v465_v22 = vrot.slane %v428_v11, 4  ;;  %v468_v23 = vsel %vm381_vm2, %v428_v11, %v467_v6  ;;  %v508_v24 = vsel %vm381_vm2, %v355_v35, %v507_v14  ;;  %4117 = vrot.lane.b32.xlu1 %v4116_v3, %s4310_s10 }
  0xab   : > { %v4488_v25 = vperm.slane %v468_v23, %v4388_v15  ;;  %v4491_v26 = vperm.slane %v508_v24, %v4385_v12  ;;  %v520_v27 = vsel %vm381_vm2, %v370_v42, %v519_v19  ;;  %v541_v40 = vrot.slane %v4478_v18, 4 }
  0xac   : > { %v453_v30 = vrot.slane %v424_v21, 4  ;;  %v456_v32 = vsel %vm381_vm2, %v424_v21, %v455_v1  ;;  %v466_v33 = vsel %vm381_vm2, %v465_v22, %v416_v57  ;;  %v528_v35 = vperm.slane %v520_v27, %v4385_v12 }
  0xad   : > { %v4500_v36 = vperm.slane %v456_v32, %v4388_v15  ;;  %v4503_v37 = vperm.slane %v466_v33, %v4388_v15  ;;  %v489_v39 = vrot.slane %v4488_v25, 4  ;;  %v553_v38 = vrot.slane %v4491_v26, 4 }
  0xae   : > { %v454_v41 = vsel %vm381_vm2, %v453_v30, %v412_v53  ;;  %v567_v42 = vrot.slane %v524_v20, 4  ;;  %v579_v45 = vrot.slane %v528_v35, 4  ;;  %v4509_v46 = vpop.f32.mrf.mxu3  ;;  %v4131_v52 = vpack.i.bf16 %v4465_v9, %v4426_v43 }
  0xaf   : > { %v4512_v47 = vperm.slane %v454_v41, %v4388_v15  ;;  %v481_v48 = vrot.slane %v4500_v36, 4  ;;  %v529_v49 = vrot.slane %v4509_v46, 4  ;;  %v4516_v50 = vpop.f32.mrf.mxu0  ;;  %v485_v53 = vrot.slane %v4503_v37, 4 }
  0xb0   : > { %v532_v54 = vsel %vm381_vm2, %v4509_v46, %v531_v61  ;;  %v380_v57 = vrot.slane %v4516_v50, 4  ;;  %v384_v60 = vsel %vm381_vm2, %v4516_v50, %v383_v58  ;;  %v4136_v3 = vpack.i.bf16 %v4467_v10, %v4428_v44 }
  0xb1   : > { %v530_v62 = vsel %vm381_vm2, %v529_v49, %v4445_v55  ;;  %v540_v63 = vperm.slane %v532_v54, %v4385_v12  ;;  %v392_v1 = vperm.slane %v384_v60, %v4385_v12  ;;  %4127 = vrot.lane.b32.xlu0 %v4126_v29, %s4310_s10  ;;  %v477_v6 = vrot.slane %v4512_v47, 4 }
  0xb2   : > { %v536_v61 = vperm.slane %v530_v62, %v4385_v12  ;;  %v382_v7 = vsel %vm381_vm2, %v380_v57, %v4416_v31  ;;  %4122 = vrot.lane.b32.xlu1 %v4121_v4, %s4310_s10  ;;  %v4141_v55 = vpack.i.bf16 %v4428_v44, %v4465_v9  ;;  %v4146_v27 = vpack.i.bf16 %v4457_v2, %v4509_v46 }
  0xb3   : > { %v577_v58 = vrot.slane %v540_v63, 4  ;;  %v580_v8 = vsel %vm381_vm2, %v540_v63, %v579_v45  ;;  %v388_v11 = vperm.slane %v382_v7, %v4385_v12  ;;  %v442_v13 = vsel %vm381_vm2, %v441_v5, %v392_v1 }
  0xb4   : > { %v565_v14 = vrot.slane %v536_v61, 4  ;;  %v568_v16 = vsel %vm381_vm2, %v536_v61, %v567_v42  ;;  %v4545_v17 = vperm.slane %v580_v8, %v4388_v15  ;;  %v443_v19 = vrot.slane %v392_v1, 4 }
  0xb5   : > { %v4548_v31 = vperm.slane %v568_v16, %v4388_v15  ;;  %v578_v4 = vsel %vm381_vm2, %v577_v58, %v528_v35  ;;  %v430_v21 = vsel %vm381_vm2, %v429_v0, %v388_v11  ;;  %v431_v22 = vrot.slane %v388_v11, 4 }
  0xb6   : > { %v566_v23 = vsel %vm381_vm2, %v565_v14, %v524_v20  ;;  %v4556_v5 = vperm.slane %v578_v4, %v4388_v15  ;;  %v436_v24 = vperm.slane %v430_v21, %v4388_v15  ;;  %v601_v30 = vrot.slane %v4545_v17, 4 }
  0xb7   : > { %v4562_v29 = vperm.slane %v566_v23, %v4388_v15  ;;  %v432_v32 = vsel %vm381_vm2, %v4439_v51, %v431_v22  ;;  %v444_v0 = vsel %vm381_vm2, %v4448_v56, %v443_v19  ;;  %v4569_v20 = vpop.f32.mrf.mxu0  ;;  %v593_v33 = vrot.slane %v4548_v31, 4 }
  0xb8   : > { %v440_v35 = vperm.slane %v432_v32, %v4388_v15  ;;  %v448_v41 = vperm.slane %v442_v13, %v4388_v15  ;;  %v452_v2 = vperm.slane %v444_v0, %v4388_v15  ;;  %v597_v45 = vrot.slane %v4556_v5, 4 }
  0xb9   : > { %v589_v42 = vrot.slane %v4562_v29, 4  ;;  %v4578_v49 = vsel %vm381_vm2, %v477_v6, %v436_v24  ;;  %v479_v51 = vrot.slane %v436_v24, 4  ;;  %4132 = vrot.lane.b32.xlu0 %v4131_v52, %s4311_s11  ;;  %v4166_v60 = vpack.i.bf16 %v4467_v10, %v4569_v20 }
  0xba   : > { %v486_v56 = vsel %vm381_vm2, %v485_v53, %v448_v41  ;;  %v487_v54 = vrot.slane %v448_v41, 4  ;;  %v490_v57 = vsel %vm381_vm2, %v489_v39, %v452_v2  ;;  %4137 = vrot.lane.b32.xlu1 %v4136_v3, %s4311_s11  ;;  %v483_v62 = vrot.slane %v440_v35, 4 }
  0xbb   : > { %v491_v63 = vrot.slane %v452_v2, 4  ;;  %v607_v1 = vrot.slane %v4578_v49, 4  ;;  %v629_v61 = vrot.slane %v490_v57, 4  ;;  %v631_v52 = vrot.slane %v486_v56, 4 }
  0xbc   : > { %v4589_v6 = vsel %vm381_vm2, %v4503_v37, %v487_v54  ;;  %v493_v53 = vrot.slane %v4569_v20, 4  ;;  %v496_v39 = vsel %vm381_vm2, %v4569_v20, %v495_v59  ;;  %v4161_v58 = vpack.i.bf16 %v4569_v20, %v4516_v50 }
  0xbd   : > { %v4597_v7 = vsel %vm381_vm2, %v629_v61, %v486_v56  ;;  %v643_v3 = vrot.slane %v4589_v6, 4  ;;  %v504_v8 = vperm.slane %v496_v39, %v4385_v12  ;;  %v4156_v11 = vpack.i.bf16 %v4516_v50, %v4418_v34 }
  0xbe   : > { %v494_v37 = vsel %vm381_vm2, %v493_v53, %v4418_v34  ;;  %v4151_v13 = vpack.i.bf16 %v4426_v43, %v4509_v46  ;;  %v4612_v59 = vsel %vm381_vm2, %v481_v48, %v440_v35  ;;  %v4620_v4 = vsel %vm381_vm2, %v4512_v47, %v479_v51 }
  0xbf   : > { %v500_v14 = vperm.slane %v494_v37, %v4385_v12  ;;  %v554_v16 = vsel %vm381_vm2, %v553_v38, %v504_v8  ;;  %v555_v19 = vrot.slane %v504_v8, 4  ;;  %v4625_v43 = vsel %vm381_vm2, %v4500_v36, %v483_v62 }
  0xc0   : > { %v560_v34 = vperm.slane %v554_v16, %v4388_v15  ;;  %v4629_v46 = vsel %vm381_vm2, %v4488_v25, %v491_v63  ;;  %v608_v48 = vsel %vm381_vm2, %v4612_v59, %v607_v1  ;;  %v605_v36 = vrot.slane %v4612_v59, 4 }
  0xc1   : > { %v542_v38 = vsel %vm381_vm2, %v541_v40, %v500_v14  ;;  %v543_v21 = vrot.slane %v500_v14, 4  ;;  %v556_v47 = vsel %vm381_vm2, %v4491_v26, %v555_v19  ;;  %4142 = vrot.lane.b32.xlu0 %v4141_v55, %s4310_s10  ;;  %v616_v32 = vperm.slane %v608_v48, %v4385_v12 }
  0xc2   : > { %v548_v25 = vperm.slane %v542_v38, %v4388_v15  ;;  %v564_v22 = vperm.slane %v556_v47, %v4388_v15  ;;  %v598_v23 = vsel %vm381_vm2, %v597_v45, %v560_v34  ;;  %v599_v24 = vrot.slane %v560_v34, 4  ;;  %4147 = vrot.lane.b32.xlu1 %v4146_v27, %s4311_s11 }
  0xc3   : > { %v544_v40 = vsel %vm381_vm2, %v4478_v18, %v543_v21  ;;  %v743_v26 = vrot.slane %v598_v23, 4  ;;  %v619_v44 = vrot.slane %v4620_v4, 4  ;;  %v617_v2 = vrot.slane %v4625_v43, 4 }
  0xc4   : > { %v552_v9 = vperm.slane %v544_v40, %v4388_v15  ;;  %v4653_v55 = vsel %vm381_vm2, %v589_v42, %v548_v25  ;;  %v591_v0 = vrot.slane %v548_v25, 4  ;;  %v4657_v35 = vsel %vm381_vm2, %v4556_v5, %v599_v24 }
  0xc5   : > { %v602_v27 = vsel %vm381_vm2, %v601_v30, %v564_v22  ;;  %v603_v41 = vrot.slane %v564_v22, 4  ;;  %v719_v18 = vrot.slane %v4653_v55, 4  ;;  %v755_v42 = vrot.slane %v4657_v35, 4 }
  0xc6   : > { %v4664_v45 = vsel %vm381_vm2, %v4562_v29, %v591_v0  ;;  %v595_v51 = vrot.slane %v552_v9, 4  ;;  %v741_v56 = vrot.slane %v602_v27, 4  ;;  %v4674_v5 = vsel %vm381_vm2, %v593_v33, %v552_v9  ;;  %v4679_v29 = vpop.trf.xlu2 }
  0xc7   : > { %v4669_v54 = vsel %vm381_vm2, %v4545_v17, %v603_v41  ;;  %v620_v30 = vsel %vm381_vm2, %v4625_v43, %v619_v44  ;;  %v632_v62 = vsel %vm381_vm2, %v490_v57, %v631_v52  ;;  %6745 = vst [vmem:[#allocation2_spill] sm:$0xff] %v4679_v29  ;;  %v744_v1 = vsel %vm381_vm2, %v602_v27, %v743_v26 }
  0xc8   : > { %v742_v63 = vsel %vm381_vm2, %v741_v56, %v598_v23  ;;  %v753_v61 = vrot.slane %v4669_v54, 4  ;;  %v628_v17 = vperm.slane %v620_v30, %v4385_v12  ;;  %v4691_v33 = vsel %vm381_vm2, %v4548_v31, %v595_v51 }
  0xc9   : > { %v4686_v53 = vperm.slane %v742_v63, %v4385_v12  ;;  %4157 = vrot.lane.b32.xlu0 %v4156_v11, %s4310_s10  ;;  %v640_v57 = vperm.slane %v632_v62, %v4385_v12  ;;  %v644_v52 = vsel %vm381_vm2, %v4629_v46, %v643_v3  ;;  %v641_v39 = vrot.slane %v4629_v46, 4 }
  0xca   : > { %4152 = vrot.lane.b32.xlu1 %v4151_v13, %s4310_s10  ;;  %v652_v8 = vperm.slane %v644_v52, %v4385_v12  ;;  %v667_v37 = vrot.slane %v616_v32, 4  ;;  %v720_v59 = vsel %vm381_vm2, %v4674_v5, %v719_v18  ;;  %v717_v14 = vrot.slane %v4674_v5, 4 }
  0xcb   : > { %v691_v11 = vrot.slane %v640_v57, 4  ;;  %v728_v31 = vperm.slane %v720_v59, %v4385_v12  ;;  %v731_v16 = vrot.slane %v4664_v45, 4  ;;  %v752_v3 = vperm.slane %v744_v1, %v4385_v12 }
  0xcc   : > { %v668_v19 = vsel %vm381_vm2, %v628_v17, %v667_v37  ;;  %v756_v13 = vsel %vm381_vm2, %v4669_v54, %v755_v42  ;;  %v665_v34 = vrot.slane %v628_v17, 4  ;;  %v689_v40 = vrot.slane %v652_v8, 4 }
  0xcd   : > { %v4709_v46 = vperm.slane %v668_v19, %v4388_v15  ;;  %v692_v48 = vsel %vm381_vm2, %v652_v8, %v691_v11  ;;  %v732_v38 = vsel %vm381_vm2, %v4691_v33, %v731_v16  ;;  %v764_v21 = vperm.slane %v756_v13, %v4385_v12 }
  0xce   : > { %v4716_v47 = vperm.slane %v692_v48, %v4388_v15  ;;  %v740_v25 = vperm.slane %v732_v38, %v4385_v12  ;;  %v779_v22 = vrot.slane %v728_v31, 4  ;;  %v803_v23 = vrot.slane %v752_v3, 4 }
  0xcf   : > { %v666_v24 = vsel %vm381_vm2, %v665_v34, %v616_v32  ;;  %v801_v26 = vrot.slane %v764_v21, 4  ;;  %v606_v44 = vsel %vm381_vm2, %v605_v36, %v4578_v49  ;;  %v690_v49 = vsel %vm381_vm2, %v689_v40, %v640_v57  ;;  %v4737_v32 = vpop.trf.xlu2 }
  0xd0   : > { %v713_v9 = vrot.slane %v4716_v47, 4  ;;  %v780_v0 = vsel %vm381_vm2, %v740_v25, %v779_v22  ;;  %v804_v27 = vsel %vm381_vm2, %v764_v21, %v803_v23  ;;  %v672_v41 = vperm.slane %v666_v24, %v4388_v15  ;;  %6746 = vst [vmem:[#allocation3_spill] sm:$0xff] %v4737_v32  ;;  %v960_v23 = vpop.permute.xlu0 %959 }
  0xd1   : > { %v4727_v18 = vperm.slane %v780_v0, %v4388_v15  ;;  %v4730_v51 = vperm.slane %v804_v27, %v4388_v15  ;;  %4167 = vrot.lane.b32.xlu0 %v4166_v60, %s4310_s10  ;;  %v777_v36 = vrot.slane %v740_v25, 4  ;;  %v729_v42 = vrot.slane %v4691_v33, 4 }
  0xd2   : > { %v714_v56 = vsel %vm381_vm2, %v713_v9, %v4709_v46  ;;  %4162 = vrot.lane.b32.xlu1 %v4161_v58, %s4311_s11  ;;  %v696_v5 = vperm.slane %v690_v49, %v4388_v15  ;;  %v802_v10 = vsel %vm381_vm2, %v801_v26, %v752_v3  ;;  %v711_v30 = vrot.slane %v672_v41, 4  ;;  %v952_v58 = vpop.permute.xlu1 %951 }
  0xd3   : > { %v825_v60 = vrot.slane %v4730_v51, 4  ;;  %v778_v62 = vsel %vm381_vm2, %v777_v36, %v728_v31  ;;  %v612_v63 = vperm.slane %v606_v44, %v4385_v12  ;;  %v808_v17 = vperm.slane %v802_v10, %v4388_v15 }
  0xd4   : > { %v784_v1 = vperm.slane %v778_v62, %v4388_v15  ;;  %v618_v50 = vsel %vm381_vm2, %v617_v2, %v4620_v4  ;;  %v636_v20 = vperm.slane %v4597_v7, %v4385_v12  ;;  %v642_v52 = vsel %vm381_vm2, %v641_v39, %v4589_v6 }
  0xd5   : > { %v826_v33 = vsel %vm381_vm2, %v825_v60, %v4727_v18  ;;  %v624_v57 = vperm.slane %v618_v50, %v4385_v12  ;;  %v655_v8 = vrot.slane %v612_v63, 4  ;;  %v648_v11 = vperm.slane %v642_v52, %v4385_v12 }
  0xd6   : > { %v4171_v37 = vpack.i.bf16 %v826_v33, %v714_v56  ;;  %v823_v59 = vrot.slane %v784_v1, 4  ;;  %v679_v43 = vrot.slane %v636_v20, 4  ;;  %v718_v7 = vsel %vm381_vm2, %v717_v14, %v4653_v55 }
  0xd7   : > { %v656_v4 = vsel %vm381_vm2, %v624_v57, %v655_v8  ;;  %v730_v2 = vsel %vm381_vm2, %v729_v42, %v4664_v45  ;;  %v754_v31 = vsel %vm381_vm2, %v753_v61, %v4657_v35  ;;  %v724_v39 = vperm.slane %v718_v7, %v4385_v12 }
  0xd8   : > { %4172 = vrot.lane.b32.xlu2 %v4171_v37, %s4306_s6  ;;  %v680_v6 = vsel %vm381_vm2, %v648_v11, %v679_v43  ;;  %v664_v16 = vperm.slane %v656_v4, %v4388_v15  ;;  %v736_v55 = vperm.slane %v730_v2, %v4385_v12  ;;  %v760_v14 = vperm.slane %v754_v31, %v4385_v12 }
  0xd9   : > { %v688_v19 = vperm.slane %v680_v6, %v4388_v15  ;;  %v767_v45 = vrot.slane %v724_v39, 4  ;;  %v791_v3 = vrot.slane %v4686_v53, 4  ;;  %v709_v54 = vrot.slane %v696_v5, 4  ;;  %v956_v48 = vpop.permute.xlu2 %955 }
  0xda   : > { %v821_v13 = vrot.slane %v808_v17, 4  ;;  %v712_v35 = vsel %vm381_vm2, %v696_v5, %v711_v30  ;;  %v824_v61 = vsel %vm381_vm2, %v808_v17, %v823_v59  ;;  %v707_v44 = vrot.slane %v664_v16, 4  ;;  %v964_v9 = vpop.permute.xlu1 %963 }
  0xdb   : > { %v705_v34 = vrot.slane %v688_v19, 4  ;;  %v768_v38 = vsel %vm381_vm2, %v736_v55, %v767_v45  ;;  %v792_v21 = vsel %vm381_vm2, %v760_v14, %v791_v3  ;;  %v710_v25 = vsel %vm381_vm2, %v709_v54, %v672_v41 }
  0xdc   : > { %v822_v22 = vsel %vm381_vm2, %v821_v13, %v784_v1  ;;  %v776_v24 = vperm.slane %v768_v38, %v4388_v15  ;;  %v800_v40 = vperm.slane %v792_v21, %v4388_v15  ;;  %v4196_v0 = vpack.i.bf16 %v824_v61, %v712_v35 }
  0xdd   : > { %v4181_v26 = vpack.i.bf16 %v822_v22, %v710_v25  ;;  %v653_v27 = vrot.slane %v624_v57, 4  ;;  %v827_v36 = vrot.slane %v4727_v18, 4  ;;  %v677_v42 = vrot.slane %v648_v11, 4 }
  0xde   : > { %v817_v49 = vrot.slane %v800_v40, 4  ;;  %v819_v56 = vrot.slane %v776_v24, 4  ;;  %v765_v5 = vrot.slane %v736_v55, 4  ;;  %v789_v10 = vrot.slane %v760_v14, 4 }
  0xdf   : > { %4182 = vrot.lane.b32.xlu1 %v4181_v26, %s4305_s5  ;;  %v654_v41 = vsel %vm381_vm2, %v653_v27, %v612_v63  ;;  %v706_v60 = vsel %vm381_vm2, %v705_v34, %v664_v16  ;;  %v708_v62 = vsel %vm381_vm2, %v688_v19, %v707_v44  ;;  %v678_v1 = vsel %vm381_vm2, %v677_v42, %v636_v20 }
  0xe0   : > { %4197 = vrot.lane.b32.xlu2 %v4196_v0, %s4309_s9  ;;  %v818_v30 = vsel %vm381_vm2, %v817_v49, %v776_v24  ;;  %v820_v18 = vsel %vm381_vm2, %v800_v40, %v819_v56  ;;  %v684_v50 = vperm.slane %v678_v1, %v4388_v15  ;;  %v766_v33 = vsel %vm381_vm2, %v765_v5, %v724_v39 }
  0xe1   : > { %v4176_v17 = vpack.i.bf16 %v818_v30, %v706_v60  ;;  %v660_v63 = vperm.slane %v654_v41, %v4388_v15  ;;  %v772_v57 = vperm.slane %v766_v33, %v4388_v15  ;;  %v790_v52 = vsel %vm381_vm2, %v789_v10, %v4686_v53  ;;  %v968_v4 = vpop.permute.xlu2 %967 }
  0xe2   : > { %v978_v8 = vsel %vm885_vm3, %v4405_v28, %v952_v58  ;;  %v701_v20 = vrot.slane %v684_v50, 4  ;;  %v796_v37 = vperm.slane %v790_v52, %v4388_v15  ;;  %v715_v59 = vrot.slane %v4709_v46, 4  ;;  %v972_v28 = vpop.permute.xlu0 %971  ;;  %v976_v46 = vpop.permute.xlu1 %975 }
  0xe3   : > { %4177 = vrot.lane.b32.xlu0 %v4176_v17, %s4308_s8  ;;  %v4191_v11 = vpack.i.bf16 %v820_v18, %v708_v62  ;;  %v979_v43 = vsel %vm888_vm4, %v978_v8, %v956_v48  ;;  %v828_v58 = vsel %vm381_vm2, %v4730_v51, %v827_v36  ;;  %v815_v14 = vrot.slane %v772_v57, 4 }
  0xe4   : > { %v813_v7 = vrot.slane %v796_v37, 4  ;;  %v980_v53 = vsel %vm891_vm5, %v979_v43, %v960_v23  ;;  %v4817_v31 = vsel %vm381_vm2, %v701_v20, %v660_v63  ;;  %v716_v16 = vsel %vm381_vm2, %v4716_v47, %v715_v59 }
  0xe5   : > { %v981_v2 = vsel %vm894_vm6, %v980_v53, %v964_v9  ;;  %v4186_v51 = vpack.i.bf16 %v828_v58, %v716_v16  ;;  %v703_v45 = vrot.slane %v660_v63, 4  ;;  %v816_v3 = vsel %vm381_vm2, %v796_v37, %v815_v14 }
  0xe6   : > { %v982_v6 = vsel %vm897_vm7, %v981_v2, %v968_v4  ;;  %v4821_v39 = vsel %vm381_vm2, %v813_v7, %v772_v57 }
  0xe7   : > { %4192 = vrot.lane.b32.xlu1 %v4191_v11, %s4304_s30  ;;  %v983_v19 = vsel %vm900_vm8, %v982_v6, %v972_v28  ;;  %v704_v54 = vsel %vm381_vm2, %v684_v50, %v703_v45 }
  0xe8   : > { %v4827_v55 = vsel %vm903_vm9, %v983_v19, %v976_v46  ;;  %v4201_v13 = vpack.i.bf16 %v816_v3, %v704_v54 }
  0xe9   : > { %6747 = vst [vmem:[#allocation4_spill] sm:$0xff] %v4827_v55 }
  0xeb   : > { %4187 = vrot.lane.b32.xlu0 %v4186_v51, %s4307_s7 }
  0xf3   : > { %4202 = vrot.lane.b32.xlu0 %v4201_v13, %s4303_s29 }
 0x10b   : > { %v4833_v35 = vpop.permute.xlu0 %4092 }
 0x10c   : > { %v4835_v47 = vpop.permute.xlu1 %4097  ;;  %v4095_v21 = vunpack.i.h.bf16 %v4833_v35  ;;  %v4094_v22 = vunpack.i.l.bf16 %v4833_v35 }
 0x10d   : > { %v6739_v23 = vunpack.i.h.bf16 %v4835_v47  ;;  %v6738_v9 = vunpack.i.l.bf16 %v4835_v47 }
 0x10e   : > { %v4850_v44 = vrot.slane %v4095_v21, 4  ;;  %v4861_v30 = vrot.slane %v4094_v22, 4 }
 0x10f   : > { %v4868_v18 = vrot.slane %v6739_v23, 4  ;;  %v4872_v50 = vrot.slane %v6738_v9, 4 }
 0x113   : > { %v4103_v61 = vpop.permute.xlu0 %4102 }
 0x114   : > { %v4837_v34 = vpop.permute.xlu1 %4112  ;;  %v4105_v0 = vunpack.i.h.bf16 %v4103_v61  ;;  %v4104_v27 = vunpack.i.l.bf16 %v4103_v61 }
 0x115   : > { %v4115_v49 = vunpack.i.h.bf16 %v4837_v34  ;;  %v4114_v36 = vunpack.i.l.bf16 %v4837_v34 }
 0x116   : > { %v1745_v33 = vrot.slane %v4105_v0, 4  ;;  %v1633_v57 = vrot.slane %v4104_v27, 4 }
 0x117   : > { %v1757_v52 = vrot.slane %v4115_v49, 4  ;;  %v1645_v8 = vrot.slane %v4114_v36, 4 }
 0x11b   : > { %v4839_v48 = vpop.permute.xlu0 %4107 }
 0x11c   : > { %v4841_v38 = vpop.permute.xlu1 %4117  ;;  %v4110_v41 = vunpack.i.h.bf16 %v4839_v48  ;;  %v4109_v5 = vunpack.i.l.bf16 %v4839_v48 }
 0x11d   : > { %v4120_v10 = vunpack.i.h.bf16 %v4841_v38  ;;  %v4119_v60 = vunpack.i.l.bf16 %v4841_v38 }
 0x11e   : > { %v4880_v37 = vrot.slane %v4110_v41, 4  ;;  %v1659_v59 = vrot.slane %v4109_v5, 4 }
 0x11f   : > { %v4886_v11 = vrot.slane %v4120_v10, 4  ;;  %v2883_v43 = vrot.slane %v4119_v60, 4 }
 0x123   : > { %v4128_v25 = vpop.permute.xlu0 %4127 }
 0x124   : > { %v4130_v24 = vunpack.i.h.bf16 %v4128_v25  ;;  %v4129_v40 = vunpack.i.l.bf16 %v4128_v25  ;;  %v4846_v26 = vpop.permute.xlu1 %4122 }
 0x125   : > { %v4125_v1 = vunpack.i.h.bf16 %v4846_v26  ;;  %v4124_v17 = vunpack.i.l.bf16 %v4846_v26 }
 0x126   : > { %v2795_v56 = vrot.slane %v4130_v24, 4  ;;  %v2797_v42 = vrot.slane %v4129_v40, 4 }
 0x127   : > { %v4892_v7 = vrot.slane %v4125_v1, 4  ;;  %v4896_v53 = vrot.slane %v4124_v17, 4 }
 0x128   : > { %v2796_v62 = vsel %vm381_vm2, %v2795_v56, %v4129_v40  ;;  %v2798_v20 = vsel %vm381_vm2, %v4130_v24, %v2797_v42 }
 0x129   : > { %v4875_v63 = vperm.slane %v2796_v62, %v4385_v12  ;;  %v4899_v46 = vperm.slane %v2798_v20, %v4385_v12 }
 0x12b   : > { %v4133_v4 = vpop.permute.xlu0 %4132  ;;  %v2831_v6 = vrot.slane %v4875_v63, 4  ;;  %v2843_v42 = vrot.slane %v4899_v46, 4 }
 0x12c   : > { %v4135_v28 = vunpack.i.h.bf16 %v4133_v4  ;;  %v4134_v58 = vunpack.i.l.bf16 %v4133_v4  ;;  %v4138_v2 = vpop.permute.xlu1 %4137 }
 0x12d   : > { %v4140_v16 = vunpack.i.h.bf16 %v4138_v2  ;;  %v4139_v19 = vunpack.i.l.bf16 %v4138_v2 }
 0x12e   : > { %v1746_v51 = vsel %vm381_vm2, %v1745_v33, %v4135_v28  ;;  %v1747_v14 = vrot.slane %v4135_v28, 4  ;;  %v1634_v45 = vsel %vm381_vm2, %v1633_v57, %v4134_v58  ;;  %v1635_v3 = vrot.slane %v4134_v58, 4 }
 0x12f   : > { %v4905_v54 = vperm.slane %v1746_v51, %v4385_v12  ;;  %v4908_v13 = vperm.slane %v1634_v45, %v4385_v12  ;;  %v1759_v61 = vrot.slane %v4140_v16, 4  ;;  %v1646_v34 = vsel %vm381_vm2, %v1645_v8, %v4139_v19 }
 0x130   : > { %v1748_v25 = vsel %vm381_vm2, %v4105_v0, %v1747_v14  ;;  %v1636_v24 = vsel %vm381_vm2, %v4104_v27, %v1635_v3  ;;  %v1647_v40 = vrot.slane %v4139_v19, 4  ;;  %v4914_v56 = vperm.slane %v1646_v34, %v4385_v12 }
 0x131   : > { %v4918_v62 = vperm.slane %v1748_v25, %v4385_v12  ;;  %v4922_v57 = vperm.slane %v1636_v24, %v4385_v12  ;;  %v1758_v8 = vsel %vm381_vm2, %v1757_v52, %v4140_v16  ;;  %v1760_v4 = vsel %vm381_vm2, %v4115_v49, %v1759_v61 }
 0x132   : > { %v4924_v20 = vpop.permute.xlu2 %4172  ;;  %v1648_v27 = vsel %vm381_vm2, %v4114_v36, %v1647_v40  ;;  %v1695_v19 = vrot.slane %v4914_v56, 4  ;;  %v4936_v45 = vperm.slane %v1758_v8, %v4385_v12  ;;  %v4939_v36 = vperm.slane %v1760_v4, %v4385_v12 }
 0x133   : > { %v4143_v51 = vpop.permute.xlu0 %4142  ;;  %v1656_v14 = vperm.slane %v1648_v27, %v4385_v12 }
 0x134   : > { %v4145_v52 = vunpack.i.h.bf16 %v4143_v51  ;;  %v4148_v16 = vpop.permute.xlu1 %4147  ;;  %v4144_v3 = vunpack.i.l.bf16 %v4143_v51  ;;  %v1807_v24 = vrot.slane %v4936_v45, 4  ;;  %v1819_v40 = vrot.slane %v4939_v36, 4 }
 0x135   : > { %v4150_v61 = vunpack.i.h.bf16 %v4148_v16  ;;  %v4149_v34 = vunpack.i.l.bf16 %v4148_v16  ;;  %v1707_v25 = vrot.slane %v1656_v14, 4 }
 0x136   : > { %v2784_v27 = vsel %vm381_vm2, %v4850_v44, %v4145_v52  ;;  %v2785_v8 = vrot.slane %v4145_v52, 4  ;;  %v2884_v4 = vsel %vm381_vm2, %v2883_v43, %v4144_v3  ;;  %v2885_v28 = vrot.slane %v4144_v3, 4 }
 0x137   : > { %v2790_v58 = vperm.slane %v2784_v27, %v4385_v12  ;;  %v4949_v0 = vperm.slane %v2884_v4, %v4385_v12  ;;  %v1657_v51 = vrot.slane %v4150_v61, 4  ;;  %v1660_v16 = vsel %vm381_vm2, %v4150_v61, %v1659_v59 }
 0x138   : > { %v1769_v49 = vrot.slane %v4149_v34, 4  ;;  %v2786_v9 = vsel %vm381_vm2, %v4095_v21, %v2785_v8  ;;  %v2886_v52 = vsel %vm381_vm2, %v4119_v60, %v2885_v28 }
 0x139   : > { %v2832_v2 = vsel %vm381_vm2, %v2831_v6, %v2790_v58  ;;  %v2833_v44 = vrot.slane %v2790_v58, 4  ;;  %v2794_v3 = vperm.slane %v2786_v9, %v4385_v12  ;;  %v4966_v59 = vperm.slane %v2886_v52, %v4385_v12 }
 0x13a   : > { %v4959_v43 = vpop.permute.xlu2 %4197  ;;  %v4963_v27 = vperm.slane %v2832_v2, %v4388_v15  ;;  %v2919_v61 = vrot.slane %v4949_v0, 4  ;;  %v1658_v60 = vsel %vm381_vm2, %v1657_v51, %v4109_v5 }
 0x13b   : > { %v2834_v58 = vsel %vm381_vm2, %v4875_v63, %v2833_v44  ;;  %v2844_v28 = vsel %vm381_vm2, %v2843_v42, %v2794_v3  ;;  %v2845_v2 = vrot.slane %v2794_v3, 4  ;;  %v1664_v6 = vperm.slane %v1658_v60, %v4385_v12  ;;  %v4987_v44 = vpop.permute.xlu0 %4157 }
 0x13c   : > { %v4977_v9 = vperm.slane %v2834_v58, %v4388_v15  ;;  %v2855_v8 = vrot.slane %v4963_v27, 4  ;;  %v4982_v4 = vperm.slane %v2844_v28, %v4388_v15  ;;  %v1668_v63 = vperm.slane %v1660_v16, %v4385_v12 }
 0x13d   : > { %v2846_v5 = vsel %vm381_vm2, %v4899_v46, %v2845_v2  ;;  %v1770_v42 = vsel %vm381_vm2, %v1769_v49, %v4110_v41  ;;  %v1772_v3 = vsel %vm381_vm2, %v4149_v34, %v4880_v37  ;;  %v1693_v16 = vrot.slane %v1664_v6, 4 }
 0x13e   : > { %v2859_v51 = vrot.slane %v4977_v9, 4  ;;  %v4998_v58 = vperm.slane %v2846_v5, %v4388_v15  ;;  %v2863_v60 = vrot.slane %v4982_v4, 4  ;;  %v1705_v28 = vrot.slane %v1668_v63, 4 }
 0x13f   : > { %v1696_v21 = vsel %vm381_vm2, %v1664_v6, %v1695_v19  ;;  %v1708_v46 = vsel %vm381_vm2, %v1668_v63, %v1707_v25  ;;  %v1776_v2 = vperm.slane %v1770_v42, %v4385_v12  ;;  %v1780_v48 = vperm.slane %v1772_v3, %v4385_v12  ;;  %v4153_v3 = vpop.permute.xlu1 %4152 }
 0x140   : > { %v2867_v41 = vrot.slane %v4998_v58, 4  ;;  %v1694_v37 = vsel %vm381_vm2, %v1693_v16, %v4914_v56  ;;  %v5009_v49 = vperm.slane %v1696_v21, %v4388_v15  ;;  %v1706_v34 = vsel %vm381_vm2, %v1705_v28, %v1656_v14 }
 0x141   : > { %v5013_v5 = vperm.slane %v1694_v37, %v4388_v15  ;;  %v5016_v19 = vperm.slane %v1706_v34, %v4388_v15  ;;  %v5019_v25 = vperm.slane %v1708_v46, %v4388_v15  ;;  %v1805_v6 = vrot.slane %v1776_v2, 4 }
 0x142   : > { %v1808_v42 = vsel %vm381_vm2, %v1776_v2, %v1807_v24  ;;  %v1817_v56 = vrot.slane %v1780_v48, 4  ;;  %v1820_v21 = vsel %vm381_vm2, %v1780_v48, %v1819_v40  ;;  %v4160_v48 = vunpack.i.h.bf16 %v4987_v44 }
 0x143   : > { %v1806_v37 = vsel %vm381_vm2, %v1805_v6, %v4936_v45  ;;  %v5033_v34 = vperm.slane %v1808_v42, %v4388_v15  ;;  %v5038_v40 = vperm.slane %v1820_v21, %v4388_v15  ;;  %v4159_v63 = vunpack.i.l.bf16 %v4987_v44  ;;  %v4168_v16 = vpop.permute.xlu0 %4167 }
 0x144   : > { %v5030_v46 = vperm.slane %v1806_v37, %v4388_v15  ;;  %v1818_v24 = vsel %vm381_vm2, %v1817_v56, %v4939_v36  ;;  %v4155_v45 = vunpack.i.h.bf16 %v4153_v3  ;;  %v4154_v28 = vunpack.i.l.bf16 %v4153_v3 }
 0x145   : > { %v5041_v2 = vperm.slane %v1818_v24, %v4388_v15  ;;  %v2759_v56 = vrot.slane %v4160_v48, 4  ;;  %v2762_v21 = vsel %vm381_vm2, %v4160_v48, %v4892_v7  ;;  %v2873_v24 = vrot.slane %v4159_v63, 4 }
 0x146   : > { %v2770_v14 = vperm.slane %v2762_v21, %v4385_v12  ;;  %v2772_v6 = vsel %vm381_vm2, %v4861_v30, %v4155_v45  ;;  %v2773_v33 = vrot.slane %v4155_v45, 4  ;;  %v2907_v37 = vrot.slane %v4154_v28, 4 }
 0x147   : > { %v2760_v3 = vsel %vm381_vm2, %v2759_v56, %v4125_v1  ;;  %v2778_v42 = vperm.slane %v2772_v6, %v4385_v12  ;;  %v2910_v36 = vsel %vm381_vm2, %v4154_v28, %v4896_v53  ;;  %v4170_v7 = vunpack.i.h.bf16 %v4168_v16 }
 0x148   : > { %v2766_v48 = vperm.slane %v2760_v3, %v4385_v12  ;;  %v2821_v23 = vrot.slane %v2770_v14, 4  ;;  %v2774_v21 = vsel %vm381_vm2, %v4094_v22, %v2773_v33  ;;  %v2908_v30 = vsel %vm381_vm2, %v2907_v37, %v4124_v17 }
 0x149   : > { %v2782_v45 = vperm.slane %v2774_v21, %v4385_v12  ;;  %v2807_v1 = vrot.slane %v2778_v42, 4  ;;  %v2914_v6 = vperm.slane %v2908_v30, %v4385_v12  ;;  %v2918_v56 = vperm.slane %v2910_v36, %v4385_v12 }
 0x14a   : > { %v2809_v53 = vrot.slane %v2766_v48, 4  ;;  %v2896_v28 = vsel %vm381_vm2, %v4886_v11, %v4170_v7  ;;  %v2897_v3 = vrot.slane %v4170_v7, 4  ;;  %v4169_v52 = vunpack.i.l.bf16 %v4168_v16 }
 0x14b   : > { %v2819_v35 = vrot.slane %v2782_v45, 4  ;;  %v2808_v22 = vsel %vm381_vm2, %v2807_v1, %v2766_v48  ;;  %v2822_v26 = vsel %vm381_vm2, %v2782_v45, %v2821_v23  ;;  %v2943_v33 = vrot.slane %v2914_v6, 4 }
 0x14c   : > { %v2810_v17 = vsel %vm381_vm2, %v2778_v42, %v2809_v53  ;;  %v2814_v37 = vperm.slane %v2808_v22, %v4388_v15  ;;  %v5079_v21 = vperm.slane %v2822_v26, %v4388_v15  ;;  %v2955_v36 = vrot.slane %v2918_v56, 4 }
 0x14d   : > { %v5082_v30 = vperm.slane %v2810_v17, %v4388_v15  ;;  %v2820_v11 = vsel %vm381_vm2, %v2819_v35, %v2770_v14  ;;  %v2898_v16 = vsel %vm381_vm2, %v4120_v10, %v2897_v3  ;;  %v2902_v23 = vperm.slane %v2896_v28, %v4385_v12 }
 0x14e   : > { %v2826_v7 = vperm.slane %v2820_v11, %v4388_v15  ;;  %v5093_v42 = vsel %vm381_vm2, %v2855_v8, %v2814_v37  ;;  %v2857_v48 = vrot.slane %v2814_v37, 4  ;;  %v5099_v45 = vsel %vm381_vm2, %v2867_v41, %v5079_v21 }
 0x14f   : > { %v5105_v38 = vsel %vm381_vm2, %v2859_v51, %v5082_v30  ;;  %v5120_v51 = vpop.permute.xlu1 %4162  ;;  %v2906_v22 = vperm.slane %v2898_v16, %v4385_v12  ;;  %v2944_v26 = vsel %vm381_vm2, %v2943_v33, %v2902_v23  ;;  %v2945_v17 = vrot.slane %v2902_v23, 4 }
 0x150   : > { %v5112_v1 = vsel %vm381_vm2, %v4963_v27, %v2857_v48  ;;  %v5117_v41 = vsel %vm381_vm2, %v2863_v60, %v2826_v7  ;;  %v2865_v53 = vrot.slane %v2826_v7, 4  ;;  %v2950_v60 = vperm.slane %v2944_v26, %v4388_v15 }
 0x151   : > { %v2871_v37 = vrot.slane %v4169_v52, 4  ;;  %v2956_v11 = vsel %vm381_vm2, %v2955_v36, %v2906_v22  ;;  %v2957_v7 = vrot.slane %v2906_v22, 4  ;;  %v2874_v48 = vsel %vm381_vm2, %v4169_v52, %v2873_v24 }
 0x152   : > { %v5128_v27 = vsel %vm381_vm2, %v4982_v4, %v2865_v53  ;;  %v4165_v3 = vunpack.i.h.bf16 %v5120_v51  ;;  %v2946_v28 = vsel %vm381_vm2, %v2914_v6, %v2945_v17  ;;  %v2962_v16 = vperm.slane %v2956_v11, %v4388_v15 }
 0x153   : > { %v2967_v33 = vrot.slane %v2950_v60, 4  ;;  %v2872_v4 = vsel %vm381_vm2, %v2871_v37, %v4159_v63  ;;  %v5140_v23 = vperm.slane %v2946_v28, %v4388_v15  ;;  %v2958_v53 = vsel %vm381_vm2, %v2918_v56, %v2957_v7 }
 0x154   : > { %v2878_v36 = vperm.slane %v2872_v4, %v4385_v12  ;;  %v2882_v52 = vperm.slane %v2874_v48, %v4385_v12  ;;  %v5146_v24 = vperm.slane %v2958_v53, %v4388_v15  ;;  %v2975_v6 = vrot.slane %v2962_v16, 4 }
 0x155   : > { %v1733_v22 = vrot.slane %v4165_v3, 4  ;;  %v1736_v26 = vsel %vm381_vm2, %v4165_v3, %v4868_v18  ;;  %v5150_v44 = vpop.permute.xlu0 %4177  ;;  %v6748_v17 = vrot.slane %v4966_v59, 4  ;;  %v6749_v4 = vunpack.i.h.bf16 %v4835_v47 }
 0x156   : > { %v2920_v56 = vsel %vm381_vm2, %v2919_v61, %v2878_v36  ;;  %v2921_v28 = vrot.slane %v2878_v36, 4  ;;  %v2979_v11 = vrot.slane %v5146_v24, 4  ;;  %v2933_v48 = vrot.slane %v2882_v52, 4 }
 0x157   : > { %v2932_v37 = vsel %vm381_vm2, %v6748_v17, %v2882_v52  ;;  %v2926_v7 = vperm.slane %v2920_v56, %v4388_v15  ;;  %v1734_v53 = vsel %vm381_vm2, %v1733_v22, %v6749_v4  ;;  %v1744_v61 = vperm.slane %v1736_v26, %v4385_v12 }
 0x158   : > { %v2938_v18 = vperm.slane %v2932_v37, %v4388_v15  ;;  %v2922_v3 = vsel %vm381_vm2, %v4949_v0, %v2921_v28  ;;  %v4164_v36 = vunpack.i.l.bf16 %v5120_v51  ;;  %v2934_v56 = vsel %vm381_vm2, %v4966_v59, %v2933_v48  ;;  %v5204_v59 = vpop.permute.xlu1 %4182 }
 0x159   : > { %v5170_v17 = vperm.slane %v2922_v3, %v4388_v15  ;;  %v5175_v52 = vsel %vm381_vm2, %v2967_v33, %v2926_v7  ;;  %v2969_v37 = vrot.slane %v2926_v7, 4  ;;  %v5178_v0 = vperm.slane %v2934_v56, %v4388_v15 }
 0x15a   : > { %v5181_v28 = vsel %vm381_vm2, %v2975_v6, %v2938_v18  ;;  %v2977_v22 = vrot.slane %v2938_v18, 4  ;;  %v1740_v33 = vperm.slane %v1734_v53, %v4385_v12  ;;  %v6750_v56 = vrot.slane %v4905_v54, 4 }
 0x15b   : > { %v5185_v51 = vsel %vm381_vm2, %v2950_v60, %v2969_v37  ;;  %v5195_v48 = vsel %vm381_vm2, %v2979_v11, %v5178_v0  ;;  %v6751_v11 = vrot.slane %v4918_v62, 4  ;;  %v1795_v26 = vrot.slane %v1744_v61, 4 }
 0x15c   : > { %v5191_v7 = vsel %vm381_vm2, %v2962_v16, %v2977_v22  ;;  %v1782_v37 = vsel %vm381_vm2, %v6750_v56, %v1740_v33  ;;  %v1783_v53 = vrot.slane %v1740_v33, 4  ;;  %v1621_v35 = vrot.slane %v4164_v36, 4 }
 0x15d   : > { %v1788_v16 = vperm.slane %v1782_v37, %v4388_v15  ;;  %v1794_v22 = vsel %vm381_vm2, %v6751_v11, %v1744_v61  ;;  %v1624_v18 = vsel %vm381_vm2, %v4164_v36, %v4872_v50  ;;  %v5216_v56 = vpop.permute.xlu0 %4187  ;;  %v1796_v11 = vsel %vm381_vm2, %v4918_v62, %v1795_v26 }
 0x15e   : > { %v1784_v60 = vsel %vm381_vm2, %v4905_v54, %v1783_v53  ;;  %v1800_v4 = vperm.slane %v1794_v22, %v4388_v15  ;;  %v6752_v61 = vrot.slane %v5030_v46, 4  ;;  %v1804_v53 = vperm.slane %v1796_v11, %v4388_v15 }
 0x15f   : > { %v5219_v37 = vperm.slane %v1784_v60, %v4388_v15  ;;  %v1831_v54 = vrot.slane %v1788_v16, 4  ;;  %v6753_v50 = vrot.slane %v5041_v2, 4  ;;  %v6758_v10 = vrot.slane %v4922_v57, 4 }
 0x160   : > { %v5226_v8 = vsel %vm381_vm2, %v6752_v61, %v1788_v16  ;;  %v1839_v22 = vrot.slane %v1800_v4, 4  ;;  %v6754_v16 = vunpack.i.l.bf16 %v4835_v47  ;;  %v1843_v3 = vrot.slane %v1804_v53, 4  ;;  %v5276_v14 = vpop.permute.xlu1 %4192 }
 0x161   : > { %v5232_v36 = vsel %vm381_vm2, %v6753_v50, %v1800_v4  ;;  %v5237_v6 = vsel %vm381_vm2, %v5030_v46, %v1831_v54  ;;  %v1835_v62 = vrot.slane %v5219_v37, 4  ;;  %v6755_v4 = vrot.slane %v5038_v40, 4 }
 0x162   : > { %v1622_v11 = vsel %vm381_vm2, %v1621_v35, %v6754_v16  ;;  %v5246_v61 = vsel %vm381_vm2, %v5041_v2, %v1839_v22  ;;  %v1632_v47 = vperm.slane %v1624_v18, %v4385_v12  ;;  %v4179_v35 = vunpack.i.l.bf16 %v5150_v44 }
 0x163   : > { %v5251_v50 = vsel %vm381_vm2, %v6755_v4, %v1804_v53  ;;  %v1628_v46 = vperm.slane %v1622_v11, %v4385_v12  ;;  %v6756_v16 = vrot.slane %v4908_v13, 4  ;;  %v6759_v60 = vrot.slane %v5013_v5, 4 }
 0x164   : > { %v1981_v54 = vrot.slane %v5251_v50, 4  ;;  %v1682_v18 = vsel %vm381_vm2, %v6758_v10, %v1632_v47  ;;  %v1683_v63 = vrot.slane %v1632_v47, 4 }
 0x165   : > { %v1670_v2 = vsel %vm381_vm2, %v6756_v16, %v1628_v46  ;;  %v1671_v22 = vrot.slane %v1628_v46, 4  ;;  %v1688_v46 = vperm.slane %v1682_v18, %v4388_v15  ;;  %v4203_v33 = vpop.permute.xlu0 %4202 }
 0x166   : > { %v5265_v53 = vsel %vm381_vm2, %v1981_v54, %v5232_v36  ;;  %v1676_v11 = vperm.slane %v1670_v2, %v4388_v15  ;;  %v1684_v2 = vsel %vm381_vm2, %v4922_v57, %v1683_v63 }
 0x167   : > { %6757 = vst [vmem:[#allocation5_spill] sm:$0xff] %v5265_v53  ;;  %v1672_v26 = vsel %vm381_vm2, %v4908_v13, %v1671_v22  ;;  %v1692_v13 = vperm.slane %v1684_v2, %v4388_v15  ;;  %v6760_v22 = vrot.slane %v5016_v19, 4  ;;  %v1727_v4 = vrot.slane %v1688_v46, 4 }
 0x168   : > { %v1680_v54 = vperm.slane %v1672_v26, %v4388_v15  ;;  %v5284_v10 = vsel %vm381_vm2, %v6759_v60, %v1676_v11  ;;  %v1719_v47 = vrot.slane %v1676_v11, 4  ;;  %v6761_v2 = vrot.slane %v5019_v25, 4 }
 0x169   : > { %v1726_v18 = vsel %vm381_vm2, %v6760_v22, %v1688_v46  ;;  %v1847_v16 = vrot.slane %v5284_v10, 4  ;;  %v5298_v11 = vsel %vm381_vm2, %v5016_v19, %v1727_v4  ;;  %v1731_v46 = vrot.slane %v1692_v13, 4 }
 0x16a   : > { %v5293_v26 = vsel %vm381_vm2, %v5013_v5, %v1719_v47  ;;  %v1723_v57 = vrot.slane %v1680_v54, 4  ;;  %v1871_v63 = vrot.slane %v1726_v18, 4  ;;  %v1730_v22 = vsel %vm381_vm2, %v6761_v2, %v1692_v13 }
 0x16b   : > { %v1869_v32 = vrot.slane %v1730_v22, 4  ;;  %v1883_v29 = vrot.slane %v5298_v11, 4  ;;  %v4205_v5 = vunpack.i.h.bf16 %v4203_v33  ;;  %v4204_v47 = vunpack.i.l.bf16 %v4203_v33 }
 0x16c   : > { %v6762_v53 = vrot.slane %v5009_v49, 4  ;;  %v5312_v19 = vsel %vm381_vm2, %v5009_v49, %v1723_v57  ;;  %v5316_v4 = vsel %vm381_vm2, %v5019_v25, %v1731_v46  ;;  %v6763_v13 = vrot.slane %v5033_v34, 4 }
 0x16d   : > { %v5325_v33 = vsel %vm381_vm2, %v1869_v32, %v1726_v18  ;;  %v887_v49 = vsel %vm885_vm3, %v4821_v39, %v4205_v5  ;;  %v6764_v57 = vunpack.i.h.bf16 %v5150_v44  ;;  %v5345_v32 = vsel %vm381_vm2, %v5038_v40, %v1843_v3 }
 0x16e   : > { %v5308_v60 = vsel %vm381_vm2, %v6762_v53, %v1680_v54  ;;  %v5322_v2 = vsel %vm381_vm2, %v6763_v13, %v5219_v37  ;;  %v886_v53 = vsel %vm885_vm3, %v4817_v31, %v4204_v47  ;;  %v5333_v54 = vsel %vm381_vm2, %v5033_v34, %v1835_v62 }
 0x16f   : > { %v5336_v25 = vsel %vm888_vm4, %v886_v53, %v4179_v35  ;;  %v5341_v37 = vsel %vm888_vm4, %v887_v49, %v6764_v57  ;;  %v1848_v39 = vsel %vm381_vm2, %v5308_v60, %v1847_v16  ;;  %v1859_v62 = vrot.slane %v5293_v26, 4 }
 0x170   : > { %v1872_v35 = vsel %vm381_vm2, %v1730_v22, %v1871_v63  ;;  %v5354_v44 = vperm.slane %v1848_v39, %v4385_v12  ;;  %v1884_v3 = vsel %vm381_vm2, %v5316_v4, %v1883_v29  ;;  %v6766_v63 = vrot.slane %v5226_v8, 4 }
 0x171   : > { %v5357_v18 = vperm.slane %v1872_v35, %v4385_v12  ;;  %v1860_v16 = vsel %vm381_vm2, %v5312_v19, %v1859_v62  ;;  %v5365_v46 = vperm.slane %v1884_v3, %v4385_v12  ;;  %v1971_v57 = vrot.slane %v5237_v6, 4 }
 0x172   : > { %v1960_v22 = vsel %vm381_vm2, %v5322_v2, %v6766_v63  ;;  %v5373_v47 = vperm.slane %v1860_v16, %v4385_v12  ;;  %v1907_v13 = vrot.slane %v5354_v44, 4  ;;  %v6768_v39 = vrot.slane %v5232_v36, 4 }
 0x173   : > { %6765 = vst [vmem:[#allocation6_spill] sm:$0xff] %v5357_v18  ;;  %v1931_v29 = vrot.slane %v5357_v18, 4  ;;  %v5378_v53 = vperm.slane %v1960_v22, %v4385_v12  ;;  %v6770_v22 = vrot.slane %v5246_v61, 4  ;;  %v6771_v49 = vrot.slane %v5082_v30, 4 }
 0x174   : > { %v1984_v62 = vsel %vm381_vm2, %v5251_v50, %v6768_v39  ;;  %v1908_v3 = vsel %vm381_vm2, %v5373_v47, %v1907_v13  ;;  %v1972_v39 = vsel %vm381_vm2, %v5333_v54, %v1971_v57  ;;  %v6772_v57 = vrot.slane %v5079_v21, 4 }
 0x175   : > { %6767 = vst [vmem:[#allocation7_spill] sm:$0xff] %v5378_v53  ;;  %v1932_v16 = vsel %vm381_vm2, %v5365_v46, %v1931_v29  ;;  %v5392_v63 = vperm.slane %v1984_v62, %v4385_v12  ;;  %v1996_v55 = vsel %vm381_vm2, %v5345_v32, %v6770_v22  ;;  %v1916_v36 = vperm.slane %v1908_v3, %v4388_v15 }
 0x176   : > { %v1940_v50 = vperm.slane %v1932_v16, %v4388_v15  ;;  %v5403_v13 = vperm.slane %v1996_v55, %v4385_v12  ;;  %v5406_v29 = vperm.slane %v1972_v39, %v4385_v12  ;;  %v2019_v62 = vrot.slane %v5378_v53, 4 }
 0x177   : > { %6769 = vst [vmem:[#allocation8_spill] sm:$0xff] %v5392_v63  ;;  %v2043_v35 = vrot.slane %v5392_v63, 4  ;;  %v5414_v3 = vsel %vm381_vm2, %v4977_v9, %v6771_v49  ;;  %v1955_v22 = vrot.slane %v1916_v36, 4  ;;  %v5420_v55 = vsel %vm381_vm2, %v4998_v58, %v6772_v57 }
 0x178   : > { %v1953_v16 = vrot.slane %v1940_v50, 4  ;;  %v6773_v39 = vrot.slane %v5140_v23, 4  ;;  %v2020_v30 = vsel %vm381_vm2, %v5406_v29, %v2019_v62  ;;  %v6774_v49 = vrot.slane %v5170_v17, 4 }
 0x179   : > { %v2044_v9 = vsel %vm381_vm2, %v5403_v13, %v2043_v35  ;;  %v6775_v58 = vrot.slane %v5178_v0, 4  ;;  %v2028_v40 = vperm.slane %v2020_v30, %v4388_v15  ;;  %v1956_v35 = vsel %vm381_vm2, %v1940_v50, %v1955_v22 }
 0x17a   : > { %v5426_v5 = vsel %vm381_vm2, %v6773_v39, %v5170_v17  ;;  %v5436_v21 = vsel %vm381_vm2, %v5140_v23, %v6774_v49  ;;  %v1954_v39 = vsel %vm381_vm2, %v1953_v16, %v1916_v36  ;;  %v2052_v62 = vperm.slane %v2044_v9, %v4388_v15 }
 0x17b   : > { %v5442_v57 = vsel %vm381_vm2, %v5146_v24, %v6775_v58  ;;  %v6776_v17 = vrot.slane %v5093_v42, 4  ;;  %v2997_v0 = vrot.slane %v5112_v1, 4  ;;  %v6777_v24 = vrot.slane %v5117_v41, 4 }
 0x17c   : > { %v2065_v16 = vrot.slane %v2052_v62, 4  ;;  %v2067_v30 = vrot.slane %v2028_v40, 4  ;;  %v3021_v58 = vrot.slane %v5128_v27, 4  ;;  %v6778_v49 = vrot.slane %v5175_v52, 4 }
 0x17d   : > { %v2986_v23 = vsel %vm381_vm2, %v5105_v38, %v6776_v17  ;;  %v3010_v36 = vsel %vm381_vm2, %v5099_v45, %v6777_v24  ;;  %v2998_v22 = vsel %vm381_vm2, %v5414_v3, %v2997_v0 }
 0x17e   : > { %v5459_v9 = vperm.slane %v2986_v23, %v4385_v12  ;;  %v5462_v50 = vperm.slane %v3010_v36, %v4385_v12  ;;  %v3098_v24 = vsel %vm381_vm2, %v5426_v5, %v6778_v49  ;;  %v2066_v34 = vsel %vm381_vm2, %v2065_v16, %v2028_v40 }
 0x17f   : > { %v2068_v23 = vsel %vm381_vm2, %v2052_v62, %v2067_v30  ;;  %v5475_v31 = vperm.slane %v2998_v22, %v4385_v12  ;;  %v4206_v63 = vpack.i.bf16 %v1954_v39, %v2066_v34  ;;  %v3022_v53 = vsel %vm381_vm2, %v5420_v55, %v3021_v58 }
 0x180   : > { %v3045_v36 = vrot.slane %v5459_v9, 4  ;;  %v4236_v0 = vpack.i.bf16 %v1956_v35, %v2068_v23  ;;  %v3069_v17 = vrot.slane %v5462_v50, 4  ;;  %v5482_v18 = vperm.slane %v3022_v53, %v4385_v12 }
 0x181   : > { %v5487_v62 = vperm.slane %v3098_v24, %v4385_v12  ;;  %4207 = vrot.lane.b32.xlu0 %v4206_v63, %s4306_s6  ;;  %v6779_v39 = vrot.slane %v5185_v51, 4  ;;  %v6780_v35 = vrot.slane %v5181_v28, 4  ;;  %v6782_v24 = vrot.slane %v5191_v7, 4 }
 0x182   : > { %v3046_v40 = vsel %vm381_vm2, %v5475_v31, %v3045_v36  ;;  %4237 = vrot.lane.b32.xlu2 %v4236_v0, %s4307_s7  ;;  %v3070_v63 = vsel %vm381_vm2, %v5482_v18, %v3069_v17  ;;  %v6783_v17 = vunpack.i.h.bf16 %v5276_v14 }
 0x183   : > { %v5493_v34 = vperm.slane %v3046_v40, %v4388_v15  ;;  %v3110_v53 = vsel %vm381_vm2, %v5436_v21, %v6779_v39  ;;  %v3122_v16 = vsel %vm381_vm2, %v5195_v48, %v6780_v35  ;;  %v3134_v23 = vsel %vm381_vm2, %v5442_v57, %v6782_v24 }
 0x184   : > { %v5507_v22 = vperm.slane %v3110_v53, %v4385_v12  ;;  %v5510_v58 = vperm.slane %v3122_v16, %v4385_v12  ;;  %v5517_v36 = vperm.slane %v3070_v63, %v4388_v15  ;;  %v5520_v0 = vperm.slane %v3134_v23, %v4385_v12 }
 0x185   : > { %v3157_v40 = vrot.slane %v5487_v62, 4  ;;  %v893_v39 = vsel %vm891_vm5, %v5341_v37, %v6783_v17  ;;  %v6784_v35 = vunpack.i.h.bf16 %v5204_v59  ;;  %v6785_v63 = vrot.slane %v5308_v60, 4 }
 0x186   : > { %6781 = vst [vmem:[#allocation9_spill] sm:$0xff] %v5510_v58  ;;  %v3181_v53 = vrot.slane %v5510_v58, 4  ;;  %v6786_v23 = vrot.slane %v5312_v19, 4  ;;  %v3091_v30 = vrot.slane %v5517_v36, 4  ;;  %v6787_v17 = vunpack.i.h.bf16 %v4959_v43 }
 0x187   : > { %v896_v16 = vsel %vm894_vm6, %v893_v39, %v6784_v35  ;;  %v1846_v24 = vsel %vm381_vm2, %v6785_v63, %v5284_v10  ;;  %v3158_v37 = vsel %vm381_vm2, %v5507_v22, %v3157_v40  ;;  %v6789_v63 = vunpack.i.h.bf16 %v5216_v56 }
 0x188   : > { %v1858_v49 = vsel %vm381_vm2, %v6786_v23, %v5293_v26  ;;  %v899_v58 = vsel %vm897_vm7, %v896_v16, %v6787_v17  ;;  %v5546_v39 = vperm.slane %v1846_v24, %v4385_v12  ;;  %v5549_v60 = vperm.slane %v3158_v37, %v4388_v15 }
 0x189   : > { %v3182_v10 = vsel %vm381_vm2, %v5520_v0, %v3181_v53  ;;  %v6788_v26 = vunpack.i.h.bf16 %v4924_v20  ;;  %v5557_v35 = vperm.slane %v1858_v49, %v4385_v12  ;;  %v3092_v40 = vsel %vm381_vm2, %v3091_v30, %v5493_v34 }
 0x18a   : > { %v5562_v16 = vperm.slane %v3182_v10, %v4388_v15  ;;  %v5569_v53 = vperm.slane %v5325_v33, %v4385_v12  ;;  %v1895_v23 = vrot.slane %v5546_v39, 4  ;;  %v6791_v30 = vrot.slane %v5322_v2, 4 }
 0x18b   : > { %v902_v19 = vsel %vm900_vm8, %v899_v58, %v6788_v26  ;;  %v6790_v58 = vrot.slane %v5316_v4, 4  ;;  %v6792_v17 = vrot.slane %v5333_v54, 4  ;;  %v6793_v54 = vld [vmem:[#allocation5_spill] sm:$0xff] }
 0x18c   : > { %v905_v24 = vsel %vm903_vm9, %v902_v19, %v6789_v63  ;;  %v1958_v37 = vsel %vm381_vm2, %v6791_v30, %v5226_v8  ;;  %v3203_v33 = vrot.slane %v5562_v16, 4  ;;  %v1919_v4 = vrot.slane %v5569_v53, 4 }
 0x18d   : > { %1037 = vmatpush.msrb.mxu1 %v905_v24  ;;  %v1882_v49 = vsel %vm381_vm2, %v6790_v58, %v5298_v11  ;;  %v1970_v10 = vsel %vm381_vm2, %v6792_v17, %v5237_v6  ;;  %v5590_v11 = vperm.slane %v1958_v37, %v4385_v12  ;;  %v1896_v2 = vsel %vm381_vm2, %v5557_v35, %v1895_v23 }
 0x18e   : > { %v5586_v26 = vperm.slane %v1882_v49, %v4385_v12  ;;  %v5595_v8 = vperm.slane %v1970_v10, %v4385_v12  ;;  %v5599_v19 = vperm.slane %v6793_v54, %v4385_v12  ;;  %v6794_v6 = vrot.slane %v5345_v32, 4 }
 0x18f   : > { %v3204_v24 = vsel %vm381_vm2, %v3203_v33, %v5549_v60  ;;  %v5608_v58 = vperm.slane %v1896_v2, %v4388_v15  ;;  %v2007_v32 = vrot.slane %v5590_v11, 4  ;;  %v6795_v17 = vunpack.i.l.bf16 %v5276_v14 }
 0x190   : > { %v1994_v63 = vsel %vm381_vm2, %v6794_v6, %v5246_v61  ;;  %v1920_v49 = vsel %vm381_vm2, %v5586_v26, %v1919_v4  ;;  %v4211_v30 = vpack.i.bf16 %v3092_v40, %v3204_v24  ;;  %v2031_v61 = vrot.slane %v5599_v19, 4 }
 0x191   : > { %v5613_v23 = vperm.slane %v1994_v63, %v4385_v12  ;;  %v5616_v37 = vperm.slane %v1920_v49, %v4388_v15  ;;  %v892_v10 = vsel %vm891_vm5, %v5336_v25, %v6795_v17  ;;  %v6796_v33 = vrot.slane %v5105_v38, 4 }
 0x192   : > { %v6797_v40 = vrot.slane %v5414_v3, 4  ;;  %v6798_v54 = vrot.slane %v5099_v45, 4  ;;  %4212 = vrot.lane.b32.xlu1 %v4211_v30, %s4306_s6  ;;  %v2008_v25 = vsel %vm381_vm2, %v5595_v8, %v2007_v32  ;;  %v6799_v38 = vunpack.i.l.bf16 %v5204_v59 }
 0x193   : > { %v2984_v4 = vsel %vm381_vm2, %v6796_v33, %v5093_v42  ;;  %v1945_v14 = vrot.slane %v5616_v37, 4  ;;  %v2032_v42 = vsel %vm381_vm2, %v5613_v23, %v2031_v61  ;;  %v6801_v59 = vunpack.i.l.bf16 %v4924_v20 }
 0x194   : > { %v2996_v2 = vsel %vm381_vm2, %v6797_v40, %v5112_v1  ;;  %v3008_v6 = vsel %vm381_vm2, %v6798_v54, %v5117_v41  ;;  %v895_v3 = vsel %vm894_vm6, %v892_v10, %v6799_v38  ;;  %v5646_v1 = vperm.slane %v2008_v25, %v4388_v15 }
 0x195   : > { %v5649_v45 = vperm.slane %v2032_v42, %v4388_v15  ;;  %v6800_v41 = vunpack.i.l.bf16 %v4959_v43  ;;  %v5655_v24 = vperm.slane %v2984_v4, %v4385_v12  ;;  %v1946_v49 = vsel %vm381_vm2, %v1945_v14, %v5608_v58 }
 0x196   : > { %v5663_v32 = vperm.slane %v2996_v2, %v4385_v12  ;;  %v5666_v61 = vperm.slane %v3008_v6, %v4385_v12  ;;  %v6802_v17 = vunpack.i.l.bf16 %v5216_v56  ;;  %v6803_v33 = vrot.slane %v5420_v55, 4 }
 0x197   : > { %v898_v63 = vsel %vm897_vm7, %v895_v3, %v6800_v41  ;;  %v2057_v43 = vrot.slane %v5649_v45, 4  ;;  %v3033_v20 = vrot.slane %v5655_v24, 4  ;;  %v6804_v54 = vrot.slane %v5426_v5, 4  ;;  %v6806_v5 = vld [vmem:[#allocation2_spill] sm:$0xff] }
 0x198   : > { %v901_v30 = vsel %vm900_vm8, %v898_v63, %v6801_v59  ;;  %v3020_v4 = vsel %vm381_vm2, %v6803_v33, %v5128_v27  ;;  %v3057_v2 = vrot.slane %v5666_v61, 4  ;;  %v6805_v6 = vrot.slane %v5436_v21, 4 }
 0x199   : > { %v904_v10 = vsel %vm903_vm9, %v901_v30, %v6802_v17  ;;  %v5678_v40 = vperm.slane %v3020_v4, %v4385_v12  ;;  %v3096_v56 = vsel %vm381_vm2, %v6804_v54, %v5175_v52  ;;  %v2058_v27 = vsel %vm381_vm2, %v2057_v43, %v5646_v1  ;;  %v6810_v54 = vld [vmem:[#allocation8_spill] sm:$0xff] }
 0x19a   : > { %1038 = vmatpush.msrb.mxu1 %v904_v10  ;;  %v3108_v55 = vsel %vm381_vm2, %v6805_v6, %v5185_v51  ;;  %v3034_v14 = vsel %vm381_vm2, %v5663_v32, %v3033_v20  ;;  %v5694_v25 = vperm.slane %v3096_v56, %v4385_v12  ;;  %v4216_v52 = vpack.i.bf16 %v1946_v49, %v2058_v27 }
 0x19b   : > { %v5697_v42 = vperm.slane %v3108_v55, %v4385_v12  ;;  %4025 = vmatmul.msk.f32.vlgmr.msrb.gmra.mxu1 %vm888_vm4, %v6806_v5  ;;  %v3058_v21 = vsel %vm381_vm2, %v5678_v40, %v3057_v2  ;;  %v6807_v51 = vrot.slane %v5195_v48, 4  ;;  %v3042_v3 = vperm.slane %v3034_v14, %v4388_v15 }
 0x19c   : > { %v3131_v63 = vrot.slane %v5442_v57, 4  ;;  %v3145_v59 = vrot.slane %v5694_v25, 4  ;;  %4217 = vrot.lane.b32.xlu0 %v4216_v52, %s4308_s8  ;;  %v3066_v49 = vperm.slane %v3058_v21, %v4388_v15  ;;  %v1905_v30 = vrot.slane %v5373_v47, 4  ;;  %v6811_v21 = vld [vmem:[#allocation3_spill] sm:$0xff] }
 0x19d   : > { %v3120_v38 = vsel %vm381_vm2, %v6807_v51, %v5181_v28  ;;  %v1929_v43 = vrot.slane %v5365_v46, 4  ;;  %v2017_v48 = vrot.slane %v5406_v29, 4  ;;  %v2041_v10 = vrot.slane %v5403_v13, 4  ;;  %v6808_v29 = vld [vmem:[#allocation6_spill] sm:$0xff] }
 0x19e   : > { %v5709_v41 = vperm.slane %v3120_v38, %v4385_v12  ;;  %v3132_v28 = vsel %vm381_vm2, %v3131_v63, %v5191_v7  ;;  %v3146_v17 = vsel %vm381_vm2, %v5697_v42, %v3145_v59  ;;  %v1906_v46 = vsel %vm381_vm2, %v1905_v30, %v5354_v44  ;;  %v6809_v7 = vld [vmem:[#allocation7_spill] sm:$0xff] }
 0x19f   : > { %v5725_v33 = vperm.slane %v3132_v28, %v4385_v12  ;;  %v3154_v4 = vperm.slane %v3146_v17, %v4388_v15  ;;  %v3085_v47 = vrot.slane %v3042_v3, 4  ;;  %v1930_v20 = vsel %vm381_vm2, %v1929_v43, %v6808_v29 }
 0x1a0   : > { %v3169_v57 = vrot.slane %v5709_v41, 4  ;;  %v2018_v2 = vsel %vm381_vm2, %v2017_v48, %v6809_v7  ;;  %v2042_v56 = vsel %vm381_vm2, %v2041_v10, %v6810_v54  ;;  %v5739_v55 = vperm.slane %v1906_v46, %v4388_v15 }
 0x1a1   : > { %v3197_v6 = vrot.slane %v3154_v4, 4  ;;  %v5742_v27 = vperm.slane %v1930_v20, %v4388_v15  ;;  %v5746_v14 = vperm.slane %v2018_v2, %v4388_v15  ;;  %v5749_v5 = vperm.slane %v2042_v56, %v4388_v15  ;;  %v6812_v56 = vld [vmem:[#allocation9_spill] sm:$0xff] }
 0x1a2   : > { %v3170_v13 = vsel %vm381_vm2, %v5725_v33, %v3169_v57  ;;  %v3083_v52 = vrot.slane %v3066_v49, 4  ;;  %v3043_v38 = vrot.slane %v5475_v31, 4  ;;  %v3067_v63 = vrot.slane %v5482_v18, 4 }
 0x1a3   : > { %v3178_v44 = vperm.slane %v3170_v13, %v4388_v15  ;;  %4026 = vmatmul.msk.f32.gmra.mxu1 %vm888_vm4, %v6811_v21  ;;  %v1949_v51 = vrot.slane %v5742_v27, 4  ;;  %v3086_v59 = vsel %vm381_vm2, %v3066_v49, %v3085_v47  ;;  %v2061_v43 = vrot.slane %v5749_v5, 4 }
 0x1a4   : > { %v3093_v57 = vrot.slane %v5493_v34, 4  ;;  %v3205_v10 = vrot.slane %v5549_v60, 4  ;;  %v3084_v18 = vsel %vm381_vm2, %v3083_v52, %v3042_v3  ;;  %v3044_v46 = vsel %vm381_vm2, %v3043_v38, %v5459_v9 }
 0x1a5   : > { %v3198_v30 = vsel %vm381_vm2, %v3178_v44, %v3197_v6  ;;  %v3195_v48 = vrot.slane %v3178_v44, 4  ;;  %v1950_v17 = vsel %vm381_vm2, %v1949_v51, %v5739_v55  ;;  %v2062_v31 = vsel %vm381_vm2, %v2061_v43, %v5746_v14 }
 0x1a6   : > { %v4251_v28 = vpack.i.bf16 %v3086_v59, %v3198_v30  ;;  %v4221_v47 = vpack.i.bf16 %v1950_v17, %v2062_v31  ;;  %v3050_v20 = vperm.slane %v3044_v46, %v4388_v15  ;;  %v3068_v34 = vsel %vm381_vm2, %v3067_v63, %v5462_v50 }
 0x1a7   : > { %v3196_v49 = vsel %vm381_vm2, %v3195_v48, %v3154_v4  ;;  %v3074_v60 = vperm.slane %v3068_v34, %v4388_v15  ;;  %v3155_v7 = vrot.slane %v5507_v22, 4  ;;  %v3179_v3 = vrot.slane %v5520_v0, 4 }
 0x1a8   : > { %4252 = vrot.lane.b32.xlu2 %v4251_v28, %s4304_s30  ;;  %v4226_v29 = vpack.i.bf16 %v3084_v18, %v3196_v49  ;;  %4222 = vrot.lane.b32.xlu1 %v4221_v47, %s4305_s5  ;;  %v3206_v9 = vsel %vm381_vm2, %v5562_v16, %v3205_v10  ;;  %v3031_v4 = vrot.slane %v5663_v32, 4  ;;  %v3055_v2 = vrot.slane %v5678_v40, 4 }
 0x1a9   : > { %v3087_v54 = vrot.slane %v3074_v60, 4  ;;  %v3156_v50 = vsel %vm381_vm2, %v3155_v7, %v5487_v62  ;;  %v3180_v22 = vsel %vm381_vm2, %v3179_v3, %v6812_v56  ;;  %v3089_v13 = vrot.slane %v3050_v20, 4 }
 0x1aa   : > { %4227 = vrot.lane.b32.xlu0 %v4226_v29, %s4308_s8  ;;  %v3094_v0 = vsel %vm381_vm2, %v5517_v36, %v3093_v57  ;;  %v3162_v6 = vperm.slane %v3156_v50, %v4388_v15  ;;  %v3186_v44 = vperm.slane %v3180_v22, %v4388_v15  ;;  %v3032_v32 = vsel %vm381_vm2, %v3031_v4, %v5655_v24 }
 0x1ab   : > { %v4256_v16 = vpack.i.bf16 %v3094_v0, %v3206_v9  ;;  %v3056_v40 = vsel %vm381_vm2, %v3055_v2, %v5666_v61  ;;  %v1947_v21 = vrot.slane %v5608_v58, 4  ;;  %v3088_v38 = vsel %vm381_vm2, %v3087_v54, %v3050_v20 }
 0x1ac   : > { %v3199_v52 = vrot.slane %v3186_v44, 4  ;;  %v3201_v62 = vrot.slane %v3162_v6, 4  ;;  %v3062_v51 = vperm.slane %v3056_v40, %v4388_v15  ;;  %v3090_v36 = vsel %vm381_vm2, %v3074_v60, %v3089_v13 }
 0x1ad   : > { %v3143_v63 = vrot.slane %v5697_v42, 4  ;;  %v3167_v59 = vrot.slane %v5725_v33, 4  ;;  %v3038_v30 = vperm.slane %v3032_v32, %v4388_v15  ;;  %v2059_v42 = vrot.slane %v5646_v1, 4 }
 0x1ae   : > { %v3200_v24 = vsel %vm381_vm2, %v3199_v52, %v3162_v6  ;;  %v3202_v61 = vsel %vm381_vm2, %v3186_v44, %v3201_v62  ;;  %v3079_v43 = vrot.slane %v3062_v51, 4  ;;  %v1948_v10 = vsel %vm381_vm2, %v5616_v37, %v1947_v21  ;;  %v4027_v44 = vld [vmem:[%s6735_s2 + $0x10] sm:$0xff] }
 0x1af   : > { %v4231_v58 = vpack.i.bf16 %v3088_v38, %v3200_v24  ;;  %v4261_v48 = vpack.i.bf16 %v3090_v36, %v3202_v61  ;;  %v3144_v28 = vsel %vm381_vm2, %v3143_v63, %v5694_v25  ;;  %v3168_v17 = vsel %vm381_vm2, %v3167_v59, %v5709_v41  ;;  %v6813_v21 = vld [vmem:[#allocation4_spill] sm:$0xff] }
 0x1b0   : > { %4257 = vrot.lane.b32.xlu2 %v4256_v16, %s4307_s7  ;;  %v3150_v33 = vperm.slane %v3144_v28, %v4388_v15  ;;  %v3174_v57 = vperm.slane %v3168_v17, %v4388_v15  ;;  %v1893_v31 = vrot.slane %v5557_v35, 4  ;;  %v1917_v25 = vrot.slane %v5586_v26, 4  ;;  %v4032_v16 = vld [vmem:[%s6735_s2 + $0x28] sm:$0xff] }
 0x1b1   : > { %4232 = vrot.lane.b32.xlu1 %v4231_v58, %s4305_s5  ;;  %v2005_v18 = vrot.slane %v5595_v8, 4  ;;  %v3081_v41 = vrot.slane %v3038_v30, 4  ;;  %v2029_v46 = vrot.slane %v5613_v23, 4  ;;  %v3080_v35 = vsel %vm381_vm2, %v3079_v43, %v3038_v30 }
 0x1b2   : > { %4262 = vrot.lane.b32.xlu0 %v4261_v48, %s4309_s9  ;;  %v3191_v49 = vrot.slane %v3174_v57, 4  ;;  %v3193_v1 = vrot.slane %v3150_v33, 4  ;;  %v1894_v47 = vsel %vm381_vm2, %v1893_v31, %v5546_v39  ;;  %v1918_v29 = vsel %vm381_vm2, %v1917_v25, %v5569_v53 }
 0x1b3   : > { %v2006_v37 = vsel %vm381_vm2, %v2005_v18, %v5590_v11  ;;  %v2060_v26 = vsel %vm381_vm2, %v5649_v45, %v2059_v42  ;;  %v1900_v20 = vperm.slane %v1894_v47, %v4388_v15  ;;  %v1924_v23 = vperm.slane %v1918_v29, %v4388_v15 }
 0x1b4   : > { %v3194_v8 = vsel %vm381_vm2, %v3174_v57, %v3193_v1  ;;  %v2030_v39 = vsel %vm381_vm2, %v2029_v46, %v5599_v19  ;;  %v3192_v34 = vsel %vm381_vm2, %v3191_v49, %v3150_v33  ;;  %v3082_v53 = vsel %vm381_vm2, %v3062_v51, %v3081_v41 }
 0x1b5   : > { %v1941_v60 = vrot.slane %v1924_v23, 4  ;;  %v2012_v11 = vperm.slane %v2006_v37, %v4388_v15  ;;  %v2036_v7 = vperm.slane %v2030_v39, %v4388_v15  ;;  %v4241_v3 = vpack.i.bf16 %v1948_v10, %v2060_v26 }
 0x1b6   : > { %v4271_v45 = vpack.i.bf16 %v3082_v53, %v3194_v8  ;;  %v1951_v9 = vrot.slane %v5739_v55, 4  ;;  %v2063_v4 = vrot.slane %v5746_v14, 4  ;;  %v1943_v22 = vrot.slane %v1900_v20, 4 }
 0x1b7   : > { %v2053_v2 = vrot.slane %v2036_v7, 4  ;;  %v5840_v54 = vsel %vm381_vm2, %v1941_v60, %v1900_v20  ;;  %v2055_v14 = vrot.slane %v2012_v11, 4 }
 0x1b8   : > { %v1952_v50 = vsel %vm381_vm2, %v5742_v27, %v1951_v9  ;;  %v2064_v56 = vsel %vm381_vm2, %v5749_v5, %v2063_v4  ;;  %v1944_v13 = vsel %vm381_vm2, %v1924_v23, %v1943_v22  ;;  %v4028_v27 = vld [vmem:[%s6735_s2 + $0x18] sm:$0xff]  ;;  %v4031_v5 = vld [vmem:[%s6735_s2 + $0x20] sm:$0xff] }
 0x1b9   : > { %4242 = vrot.lane.b32.xlu1 %v4241_v3, %s4304_s30  ;;  %v5845_v19 = vsel %vm381_vm2, %v2053_v2, %v2012_v11  ;;  %v4246_v55 = vpack.i.bf16 %v1952_v50, %v2064_v56  ;;  %v2056_v0 = vsel %vm381_vm2, %v2036_v7, %v2055_v14 }
 0x1ba   : > { %4272 = vrot.lane.b32.xlu0 %v4271_v45, %s4303_s29  ;;  %v4266_v6 = vpack.i.bf16 %v2056_v0, %v1944_v13 }
 0x1c1   : > { %4247 = vrot.lane.b32.xlu1 %v4246_v55, %s4309_s9 }
 0x1c9   : > { %4267 = vrot.lane.b32.xlu1 %v4266_v6, %s4303_s29  ;;  %s4038_s29 = sshll.u32 %s6819_s15, 7 }
 0x1ca   : > { %s6479_s7 = scalar_lea.vmem %s6737_s4, %s4038_s29 }
 0x1dc   : > { %2139 = vxpose.xlu0.b32.start [1/2] (short) (narrow) %v4027_v44, 16  ;;  %v5874_v63 = vpop.permute.xlu2 %4237 }
 0x1e4   : > { %2140 = vxpose.xlu0.b32.end [2/2] (short) (narrow) %v4028_v27, 16 }
 0x1f3   : > { %v5867_v32 = vpop.permute.xlu0 %4207 }
 0x1fe   : > { %3277 = vxpose.xlu1.b32.start [1/2] (short) (narrow) %v4031_v5, 16 }
 0x202   : > { %v4253_v61 = vpop.permute.xlu2 %4252 }
 0x203   : > { %v4255_v42 = vunpack.i.h.bf16 %v4253_v61  ;;  %v4254_v33 = vunpack.i.l.bf16 %v4253_v61 }
 0x204   : > { %v4213_v40 = vpop.permute.xlu1 %4212 }
 0x205   : > { %v4215_v37 = vunpack.i.h.bf16 %v4213_v40  ;;  %v4214_v26 = vunpack.i.l.bf16 %v4213_v40 }
 0x206   : > { %3278 = vxpose.xlu1.b32.end [2/2] (short) (narrow) %v4032_v16, 16 }
 0x20a   : > { %v4258_v31 = vpop.permute.xlu2 %4257 }
 0x20b   : > { %v4259_v20 = vunpack.i.l.bf16 %v4258_v31  ;;  %v4260_v11 = vunpack.i.h.bf16 %v4258_v31 }
 0x20e   : > { %v4218_v52 = vpop.permute.xlu0 %4217 }
 0x20f   : > { %v4220_v2 = vunpack.i.h.bf16 %v4218_v52  ;;  %v4219_v50 = vunpack.i.l.bf16 %v4218_v52  ;;  %v4210_v52 = vunpack.i.h.bf16 %v5867_v32 }
 0x218   : > { %v1040_v62 = vpop.f32.mrf.mxu1 }
 0x219   : > { %v5870_v51 = vadd.f32 %v1040_v62, %v6813_v21  ;;  %v4209_v62 = vunpack.i.l.bf16 %v5867_v32 }
 0x21a   : > { %v4223_v38 = vpop.permute.xlu1 %4222 }
 0x21b   : > { %1078 = vrot.lane.b32.xlu2 %v5870_v51, %s4312_s24  ;;  %v4225_v13 = vunpack.i.h.bf16 %v4223_v38  ;;  %v4224_v0 = vunpack.i.l.bf16 %v4223_v38  ;;  %v4239_v38 = vunpack.i.l.bf16 %v5874_v63 }
 0x21c   : > { %v4228_v36 = vpop.permute.xlu0 %4227 }
 0x21d   : > { %v4230_v28 = vunpack.i.h.bf16 %v4228_v36  ;;  %v4229_v17 = vunpack.i.l.bf16 %v4228_v36 }
 0x223   : > { %v4233_v59 = vpop.permute.xlu1 %4232 }
 0x224   : > { %v4263_v24 = vpop.permute.xlu0 %4262  ;;  %v4235_v25 = vunpack.i.h.bf16 %v4233_v59  ;;  %v4234_v18 = vunpack.i.l.bf16 %v4233_v59 }
 0x225   : > { %v4265_v1 = vunpack.i.h.bf16 %v4263_v24  ;;  %v4264_v46 = vunpack.i.l.bf16 %v4263_v24 }
 0x22b   : > { %v4243_v30 = vpop.permute.xlu1 %4242 }
 0x22c   : > { %v4273_v43 = vpop.permute.xlu0 %4272  ;;  %v4245_v56 = vunpack.i.h.bf16 %v4243_v30  ;;  %v4244_v55 = vunpack.i.l.bf16 %v4243_v30  ;;  %v4240_v30 = vunpack.i.h.bf16 %v5874_v63  ;;  %v1043_v63 = vpop.f32.mrf.mxu1 }
 0x22d   : > { %v4275_v58 = vunpack.i.h.bf16 %v4273_v43  ;;  %v4274_v48 = vunpack.i.l.bf16 %v4273_v43 }
 0x22f   : > { %v3263_v57 = vsel %vm885_vm3, %v3080_v35, %v4275_v58  ;;  %v3264_v10 = vsel %vm885_vm3, %v3192_v34, %v4274_v48  ;;  %v1044_v58 = vadd.f32 %v1043_v63, %v6813_v21 }
 0x230   : > { %v3265_v41 = vsel %vm888_vm4, %v3263_v57, %v4230_v28  ;;  %v3266_v49 = vsel %vm888_vm4, %v3264_v10, %v4229_v17 }
 0x231   : > { %v3268_v47 = vsel %vm891_vm5, %v3266_v49, %v4254_v33  ;;  %v3267_v29 = vsel %vm891_vm5, %v3265_v41, %v4255_v42 }
 0x232   : > { %v3270_v8 = vsel %vm894_vm6, %v3268_v47, %v4234_v18  ;;  %v3269_v35 = vsel %vm894_vm6, %v3267_v29, %v4235_v25 }
 0x233   : > { %v3272_v23 = vsel %vm897_vm7, %v3270_v8, %v4264_v46  ;;  %v3271_v39 = vsel %vm897_vm7, %v3269_v35, %v4265_v1  ;;  %v4248_v34 = vpop.permute.xlu1 %4247 }
 0x234   : > { %v3274_v53 = vsel %vm900_vm8, %v3272_v23, %v4214_v26  ;;  %v3273_v60 = vsel %vm900_vm8, %v3271_v39, %v4215_v37  ;;  %v4250_v27 = vunpack.i.h.bf16 %v4248_v34  ;;  %v4249_v5 = vunpack.i.l.bf16 %v4248_v34 }
 0x235   : > { %v3276_v7 = vsel %vm903_vm9, %v3274_v53, %v4259_v20  ;;  %v3275_v3 = vsel %vm903_vm9, %v3273_v60, %v4260_v11  ;;  %v1204_v37 = vrot.slane %v1044_v58, 4 }
 0x236   : > { %3329 = vmatpush.msrb.mxu3 %v3276_v7 }
 0x238   : > { %3330 = vmatpush.msrb.mxu3 %v3275_v3 }
 0x23b   : > { %v4268_v45 = vpop.permute.xlu1 %4267 }
 0x23c   : > { %v4270_v9 = vunpack.i.h.bf16 %v4268_v45  ;;  %v4269_v4 = vunpack.i.l.bf16 %v4268_v45 }
 0x23e   : > { %v2126_v22 = vsel %vm885_vm3, %v5845_v19, %v4270_v9  ;;  %v2125_v14 = vsel %vm885_vm3, %v5840_v54, %v4269_v4 }
 0x23f   : > { %v2127_v6 = vsel %vm888_vm4, %v2125_v14, %v4220_v2  ;;  %v2128_v44 = vsel %vm888_vm4, %v2126_v22, %v4219_v50 }
 0x240   : > { %v2130_v16 = vsel %vm891_vm5, %v2128_v44, %v4244_v55  ;;  %v2129_v40 = vsel %vm891_vm5, %v2127_v6, %v4245_v56 }
 0x241   : > { %v2132_v19 = vsel %vm894_vm6, %v2130_v16, %v4224_v0  ;;  %v2131_v54 = vsel %vm894_vm6, %v2129_v40, %v4225_v13 }
 0x242   : > { %v2134_v36 = vsel %vm897_vm7, %v2132_v19, %v4249_v5  ;;  %v2133_v59 = vsel %vm897_vm7, %v2131_v54, %v4250_v27 }
 0x243   : > { %v2136_v24 = vsel %vm900_vm8, %v2134_v36, %v4209_v62  ;;  %v2135_v61 = vsel %vm900_vm8, %v2133_v59, %v4210_v52 }
 0x244   : > { %v2138_v43 = vsel %vm903_vm9, %v2136_v24, %v4239_v38  ;;  %v2137_v32 = vsel %vm903_vm9, %v2135_v61, %v4240_v30 }
 0x245   : > { %2191 = vmatpush.msrb.mxu2 %v2138_v43 }
 0x247   : > { %2192 = vmatpush.msrb.mxu2 %v2137_v32 }
 0x252   : > { %1048 = vrot.lane.b32.xlu0 %v5870_v51, %s4311_s11 }
 0x25a   : > { %1054 = vrot.lane.b32.xlu0 %v5870_v51, %s4310_s10 }
 0x260   : > { %1084 = vrot.lane.b32.xlu1 %v5870_v51, %s4313_s25 }
 0x262   : > { %1060 = vrot.lane.b32.xlu0 %v5870_v51, %s4314_s26 }
 0x268   : > { %1050 = vrot.lane.b32.xlu1 %v1044_v58, %s4311_s11 }
 0x26a   : > { %1066 = vrot.lane.b32.xlu0 %v5870_v51, %s4315_s27 }
 0x270   : > { %1056 = vrot.lane.b32.xlu1 %v1044_v58, %s4310_s10 }
 0x272   : > { %1072 = vrot.lane.b32.xlu0 %v5870_v51, %s4316_s28 }
 0x278   : > { %1062 = vrot.lane.b32.xlu1 %v1044_v58, %s4314_s26 }
 0x27a   : > { %1080 = vrot.lane.b32.xlu0 %v1044_v58, %s4312_s24 }
 0x280   : > { %v2155_v48 = vpop.trf.xlu0  ;;  %1068 = vrot.lane.b32.xlu1 %v1044_v58, %s4315_s27 }
 0x281   : > { %4029 = vmatmul.msk.f32.vlgmr.msrb.gmra.mxu2 %vm888_vm4, %v2155_v48 }
 0x282   : > { %1086 = vrot.lane.b32.xlu0 %v1044_v58, %s4313_s25 }
 0x288   : > { %v2156_v28 = vpop.trf.xlu0  ;;  %1074 = vrot.lane.b32.xlu1 %v1044_v58, %s4316_s28 }
 0x289   : > { %4030 = vmatmul.msk.f32.gmra.mxu2 %vm888_vm4, %v2156_v28 }
 0x2a2   : > { %v3293_v17 = vpop.trf.xlu1 }
 0x2a3   : > { %4033 = vmatmul.msk.f32.vlgmr.msrb.gmra.mxu3 %vm888_vm4, %v3293_v17 }
 0x2aa   : > { %v3294_v42 = vpop.trf.xlu1 }
 0x2ab   : > { %4034 = vmatmul.msk.f32.gmra.mxu3 %vm888_vm4, %v3294_v42 }
 0x2c4   : > { %v5934_v33 = vpop.permute.xlu0 %1048 }
 0x2cc   : > { %v5936_v57 = vpop.permute.xlu0 %1054 }
 0x2d2   : > { %v5938_v10 = vpop.permute.xlu1 %1084 }
 0x2d4   : > { %v5940_v31 = vpop.permute.xlu0 %1060 }
 0x2da   : > { %v1051_v25 = vpop.permute.xlu1 %1050 }
 0x2db   : > { %v1216_v49 = vrot.slane %v1051_v25, 4 }
 0x2dc   : > { %v5942_v18 = vpop.permute.xlu0 %1066 }
 0x2e2   : > { %v1057_v41 = vpop.permute.xlu1 %1056 }
 0x2e3   : > { %v1202_v29 = vrot.slane %v1057_v41, 4  ;;  %v1205_v8 = vsel %vm381_vm2, %v1057_v41, %v1204_v37 }
 0x2e4   : > { %v5944_v1 = vpop.permute.xlu0 %1072  ;;  %v1213_v23 = vperm.slane %v1205_v8, %v4385_v12 }
 0x2e5   : > { %v1203_v35 = vsel %vm381_vm2, %v1202_v29, %v1044_v58 }
 0x2e6   : > { %v1209_v34 = vperm.slane %v1203_v35, %v4385_v12  ;;  %v1264_v53 = vrot.slane %v1213_v23, 4 }
 0x2e8   : > { %v1252_v3 = vrot.slane %v1209_v34, 4 }
 0x2ea   : > { %v1063_v46 = vpop.permute.xlu1 %1062 }
 0x2eb   : > { %v1217_v47 = vsel %vm381_vm2, %v1063_v46, %v1216_v49  ;;  %v1214_v39 = vrot.slane %v1063_v46, 4 }
 0x2ec   : > { %v1081_v26 = vpop.permute.xlu0 %1080  ;;  %v1225_v11 = vperm.slane %v1217_v47, %v4385_v12 }
 0x2ed   : > { %v1215_v60 = vsel %vm381_vm2, %v1214_v39, %v1051_v25  ;;  %v1226_v7 = vrot.slane %v1081_v26, 4 }
 0x2ee   : > { %v1221_v45 = vperm.slane %v1215_v60, %v4385_v12  ;;  %v1262_v9 = vrot.slane %v1225_v11, 4  ;;  %v1265_v4 = vsel %vm381_vm2, %v1225_v11, %v1264_v53 }
 0x2ef   : > { %v1273_v24 = vperm.slane %v1265_v4, %v4388_v15 }
 0x2f0   : > { %v1250_v56 = vrot.slane %v1221_v45, 4  ;;  %v1253_v55 = vsel %vm381_vm2, %v1221_v45, %v1252_v3  ;;  %v1263_v22 = vsel %vm381_vm2, %v1262_v9, %v1213_v23 }
 0x2f1   : > { %v1261_v5 = vperm.slane %v1253_v55, %v4388_v15  ;;  %v1269_v59 = vperm.slane %v1263_v22, %v4388_v15  ;;  %v1312_v37 = vrot.slane %v1273_v24, 4 }
 0x2f2   : > { %v1069_v20 = vpop.permute.xlu1 %1068  ;;  %v1251_v6 = vsel %vm381_vm2, %v1250_v56, %v1209_v34 }
 0x2f3   : > { %v1227_v2 = vsel %vm381_vm2, %v1226_v7, %v1069_v20  ;;  %v1228_v14 = vrot.slane %v1069_v20, 4  ;;  %v1257_v19 = vperm.slane %v1251_v6, %v4388_v15  ;;  %v1304_v58 = vrot.slane %v1261_v5, 4 }
 0x2f4   : > { %v1087_v50 = vpop.permute.xlu0 %1086  ;;  %v1233_v13 = vperm.slane %v1227_v2, %v4385_v12  ;;  %v1308_v29 = vrot.slane %v1269_v59, 4 }
 0x2f5   : > { %v1238_v44 = vrot.slane %v1087_v50, 4  ;;  %v1229_v27 = vsel %vm381_vm2, %v1081_v26, %v1228_v14  ;;  %v1300_v28 = vrot.slane %v1257_v19, 4 }
 0x2f6   : > { %v1237_v16 = vperm.slane %v1229_v27, %v4385_v12  ;;  %v1276_v54 = vrot.slane %v1233_v13, 4 }
 0x2f8   : > { %v1288_v30 = vrot.slane %v1237_v16, 4 }
 0x2fa   : > { %v1075_v0 = vpop.permute.xlu1 %1074 }
 0x2fb   : > { %v1239_v40 = vsel %vm381_vm2, %v1238_v44, %v1075_v0  ;;  %v1240_v52 = vrot.slane %v1075_v0, 4 }
 0x2fc   : > { %v1245_v38 = vperm.slane %v1239_v40, %v4385_v12 }
 0x2fd   : > { %v1241_v61 = vsel %vm381_vm2, %v1087_v50, %v1240_v52 }
 0x2fe   : > { %v1249_v43 = vperm.slane %v1241_v61, %v4385_v12  ;;  %v1274_v32 = vrot.slane %v1245_v38, 4  ;;  %v1277_v63 = vsel %vm381_vm2, %v1245_v38, %v1276_v54 }
 0x2ff   : > { %v1285_v48 = vperm.slane %v1277_v63, %v4388_v15 }
 0x300   : > { %v1275_v17 = vsel %vm381_vm2, %v1274_v32, %v1233_v13  ;;  %v1286_v42 = vrot.slane %v1249_v43, 4  ;;  %v1289_v25 = vsel %vm381_vm2, %v1249_v43, %v1288_v30 }
 0x301   : > { %v1281_v41 = vperm.slane %v1275_v17, %v4388_v15  ;;  %v1297_v49 = vperm.slane %v1289_v25, %v4388_v15  ;;  %v1302_v46 = vrot.slane %v1285_v48, 4  ;;  %v1305_v47 = vsel %vm381_vm2, %v1285_v48, %v1304_v58 }
 0x302   : > { %v1287_v26 = vsel %vm381_vm2, %v1286_v42, %v1237_v16  ;;  %v1438_v8 = vrot.slane %v1305_v47, 4 }
 0x303   : > { %v1293_v35 = vperm.slane %v1287_v26, %v4388_v15  ;;  %v1298_v20 = vrot.slane %v1281_v41, 4  ;;  %v1301_v23 = vsel %vm381_vm2, %v1281_v41, %v1300_v28  ;;  %v1303_v39 = vsel %vm381_vm2, %v1302_v46, %v1261_v5 }
 0x304   : > { %v2194_v62 = vpop.f32.mrf.mxu2  ;;  %v1310_v34 = vrot.slane %v1297_v49, 4  ;;  %v1313_v53 = vsel %vm381_vm2, %v1297_v49, %v1312_v37  ;;  %v1426_v60 = vrot.slane %v1303_v39, 4  ;;  %v1439_v11 = vsel %vm381_vm2, %v1438_v8, %v1301_v23 }
 0x305   : > { %v5967_v36 = vadd.f32 %v2194_v62, %v6813_v21  ;;  %v1299_v7 = vsel %vm381_vm2, %v1298_v20, %v1257_v19  ;;  %v1306_v3 = vrot.slane %v1293_v35, 4  ;;  %v1309_v45 = vsel %vm381_vm2, %v1293_v35, %v1308_v29 }
 0x306   : > { %v1440_v9 = vrot.slane %v1301_v23, 4  ;;  %v1311_v4 = vsel %vm381_vm2, %v1310_v34, %v1273_v24  ;;  %v1427_v2 = vsel %vm381_vm2, %v1426_v60, %v1299_v7  ;;  %v1428_v50 = vrot.slane %v1299_v7, 4 }
 0x307   : > { %2226 = vrot.lane.b32.xlu1 %v5967_v36, %s4316_s28  ;;  %2202 = vrot.lane.b32.xlu2 %v5967_v36, %s4311_s11  ;;  %v1445_v56 = vperm.slane %v1439_v11, %v4385_v12  ;;  %v1307_v55 = vsel %vm381_vm2, %v1306_v3, %v1269_v59  ;;  %v1433_v22 = vperm.slane %v1427_v2, %v4385_v12  ;;  %v1450_v13 = vrot.slane %v1311_v4, 4 }
 0x308   : > { %v1441_v14 = vsel %vm381_vm2, %v1305_v47, %v1440_v9  ;;  %v1429_v0 = vsel %vm381_vm2, %v1303_v39, %v1428_v50  ;;  %v1452_v44 = vrot.slane %v1307_v55, 4  ;;  %v1462_v27 = vrot.slane %v1313_v53, 4 }
 0x309   : > { %v1449_v6 = vperm.slane %v1441_v14, %v4385_v12  ;;  %v1437_v5 = vperm.slane %v1429_v0, %v4385_v12  ;;  %v1451_v16 = vsel %vm381_vm2, %v1450_v13, %v1307_v55  ;;  %v1464_v40 = vrot.slane %v1309_v45, 4 }
 0x30a   : > { %v1474_v52 = vrot.slane %v1445_v56, 4  ;;  %v1453_v62 = vsel %vm381_vm2, %v1311_v4, %v1452_v44  ;;  %v1457_v19 = vperm.slane %v1451_v16, %v4385_v12  ;;  %v1463_v54 = vsel %vm381_vm2, %v1462_v27, %v1309_v45 }
 0x30b   : > { %v1476_v38 = vrot.slane %v1433_v22, 4  ;;  %v1461_v59 = vperm.slane %v1453_v62, %v4385_v12  ;;  %v1465_v24 = vsel %vm381_vm2, %v1313_v53, %v1464_v40  ;;  %v1469_v61 = vperm.slane %v1463_v54, %v4385_v12 }
 0x30c   : > { %v1475_v30 = vsel %vm381_vm2, %v1474_v52, %v1433_v22  ;;  %v1473_v43 = vperm.slane %v1465_v24, %v4385_v12  ;;  %v1486_v58 = vrot.slane %v1449_v6, 4  ;;  %v1488_v28 = vrot.slane %v1437_v5, 4  ;;  %v2197_v27 = vpop.f32.mrf.mxu2 }
 0x30d   : > { %v1477_v32 = vsel %vm381_vm2, %v1445_v56, %v1476_v38  ;;  %v1481_v63 = vperm.slane %v1475_v30, %v4388_v15  ;;  %v1498_v17 = vrot.slane %v1469_v61, 4  ;;  %v1500_v42 = vrot.slane %v1457_v19, 4 }
 0x30e   : > { %v1485_v48 = vperm.slane %v1477_v32, %v4388_v15  ;;  %v1487_v25 = vsel %vm381_vm2, %v1486_v58, %v1437_v5  ;;  %v1510_v41 = vrot.slane %v1473_v43, 4  ;;  %v1512_v49 = vrot.slane %v1461_v59, 4 }
 0x30f   : > { %2208 = vrot.lane.b32.xlu2 %v5967_v36, %s4310_s10  ;;  %v1524_v46 = vrot.slane %v1481_v63, 4  ;;  %v1489_v47 = vsel %vm381_vm2, %v1449_v6, %v1488_v28  ;;  %v1493_v29 = vperm.slane %v1487_v25, %v4388_v15  ;;  %v1499_v37 = vsel %vm381_vm2, %v1498_v17, %v1457_v19 }
 0x310   : > { %v1501_v26 = vsel %vm381_vm2, %v1469_v61, %v1500_v42  ;;  %v1497_v8 = vperm.slane %v1489_v47, %v4388_v15  ;;  %v1505_v35 = vperm.slane %v1499_v37, %v4388_v15  ;;  %v1511_v23 = vsel %vm381_vm2, %v1510_v41, %v1461_v59 }
 0x311   : > { %v1509_v20 = vperm.slane %v1501_v26, %v4388_v15  ;;  %v1513_v39 = vsel %vm381_vm2, %v1473_v43, %v1512_v49  ;;  %v1517_v34 = vperm.slane %v1511_v23, %v4388_v15  ;;  %v1528_v53 = vrot.slane %v1485_v48, 4 }
 0x312   : > { %v1532_v60 = vrot.slane %v1493_v29, 4  ;;  %v1521_v11 = vperm.slane %v1513_v39, %v4388_v15  ;;  %v1522_v7 = vrot.slane %v1505_v35, 4  ;;  %v1536_v45 = vrot.slane %v1497_v8, 4 }
 0x313   : > { %v1526_v3 = vrot.slane %v1509_v20, 4  ;;  %v1530_v9 = vrot.slane %v1517_v34, 4  ;;  %v6030_v4 = vsel %vm381_vm2, %v1505_v35, %v1524_v46  ;;  %v6033_v2 = vsel %vm381_vm2, %v1509_v20, %v1528_v53 }
 0x314   : > { %v6036_v50 = vsel %vm381_vm2, %v1522_v7, %v1481_v63  ;;  %v1534_v55 = vrot.slane %v1521_v11, 4  ;;  %v6042_v22 = vsel %vm381_vm2, %v1517_v34, %v1532_v60  ;;  %v6048_v13 = vsel %vm381_vm2, %v1521_v11, %v1536_v45 }
 0x315   : > { %v6039_v56 = vsel %vm381_vm2, %v1526_v3, %v1485_v48  ;;  %v6045_v14 = vsel %vm381_vm2, %v1530_v9, %v1493_v29  ;;  %v6067_v16 = vadd.f32 %v2197_v27, %v6813_v21  ;;  %v1116_v52 = vrot.slane %v5942_v18, 4 }
 0x316   : > { %v6051_v0 = vsel %vm381_vm2, %v1534_v55, %v1497_v8  ;;  %v1090_v62 = vrot.slane %v5936_v57, 4  ;;  %v1092_v19 = vrot.slane %v5870_v51, 4  ;;  %v1102_v54 = vrot.slane %v5940_v31, 4 }
 0x317   : > { %2214 = vrot.lane.b32.xlu2 %v5967_v36, %s4314_s26  ;;  %v1128_v38 = vrot.slane %v5944_v1, 4  ;;  %v1104_v24 = vrot.slane %v5934_v33, 4  ;;  %v1126_v61 = vrot.slane %v5938_v10, 4 }
 0x318   : > { %v1093_v30 = vsel %vm381_vm2, %v5936_v57, %v1092_v19  ;;  %v1091_v48 = vsel %vm381_vm2, %v1090_v62, %v5870_v51  ;;  %v1103_v28 = vsel %vm381_vm2, %v1102_v54, %v5934_v33  ;;  %v2246_v54 = vrot.slane %v5967_v36, 4 }
 0x319   : > { %v1105_v43 = vsel %vm381_vm2, %v5940_v31, %v1104_v24  ;;  %v1127_v58 = vsel %vm381_vm2, %v1126_v61, %v5944_v1  ;;  %v1129_v57 = vsel %vm381_vm2, %v5938_v10, %v1128_v38  ;;  %v1101_v17 = vperm.slane %v1093_v30, %v4385_v12 }
 0x31a   : > { %v1113_v31 = vperm.slane %v1105_v43, %v4385_v12  ;;  %v1133_v25 = vperm.slane %v1127_v58, %v4385_v12  ;;  %v1097_v1 = vperm.slane %v1091_v48, %v4385_v12  ;;  %v1109_v51 = vperm.slane %v1103_v28, %v4385_v12 }
 0x31b   : > { %v1137_v41 = vperm.slane %v1129_v57, %v4385_v12  ;;  %v1152_v33 = vrot.slane %v1101_v17, 4 }
 0x31c   : > { %v1150_v10 = vrot.slane %v1113_v31, 4  ;;  %v1162_v47 = vrot.slane %v1133_v25, 4  ;;  %v1140_v37 = vrot.slane %v1097_v1, 4  ;;  %v1138_v26 = vrot.slane %v1109_v51, 4 }
 0x31d   : > { %v1153_v8 = vsel %vm381_vm2, %v1113_v31, %v1152_v33  ;;  %v1174_v35 = vrot.slane %v1137_v41, 4 }
 0x31e   : > { %v1141_v39 = vsel %vm381_vm2, %v1109_v51, %v1140_v37  ;;  %v1151_v34 = vsel %vm381_vm2, %v1150_v10, %v1101_v17  ;;  %v1161_v53 = vperm.slane %v1153_v8, %v4388_v15  ;;  %v1139_v11 = vsel %vm381_vm2, %v1138_v26, %v1097_v1 }
 0x31f   : > { %2220 = vrot.lane.b32.xlu2 %v5967_v36, %s4315_s27  ;;  %v1149_v9 = vperm.slane %v1141_v39, %v4388_v15  ;;  %v1157_v27 = vperm.slane %v1151_v34, %v4388_v15 }
 0x321   : > { %v1192_v38 = vrot.slane %v1149_v9, 4  ;;  %v1196_v43 = vrot.slane %v1157_v27, 4 }
 0x326   : > { %v3332_v6 = vpop.f32.mrf.mxu3 }
 0x327   : > { %2232 = vrot.lane.b32.xlu2 %v5967_v36, %s4312_s24  ;;  %v6058_v44 = vadd.f32 %v3332_v6, %v6813_v21  ;;  %v1145_v6 = vperm.slane %v1139_v11, %v4388_v15 }
 0x329   : > { %3358 = vrot.lane.b32.xlu1 %v6058_v44, %s4315_s27  ;;  %3364 = vrot.lane.b32.xlu0 %v6058_v44, %s4316_s28  ;;  %v1188_v30 = vrot.slane %v1145_v6, 4 }
 0x32e   : > { %v3335_v5 = vpop.f32.mrf.mxu3 }
 0x32f   : > { %2238 = vrot.lane.b32.xlu2 %v5967_v36, %s4313_s25  ;;  %v6070_v40 = vadd.f32 %v3335_v5, %v6813_v21  ;;  %v1079_v21 = vpop.permute.xlu2 %1078 }
 0x330   : > { %v1114_v59 = vrot.slane %v1079_v21, 4  ;;  %v1117_v63 = vsel %vm381_vm2, %v1079_v21, %v1116_v52  ;;  %v1200_v52 = vrot.slane %v1161_v53, 4 }
 0x331   : > { %3366 = vrot.lane.b32.xlu1 %v6070_v40, %s4316_s28  ;;  %2216 = vrot.lane.b32.xlu0 %v6067_v16, %s4314_s26  ;;  %v1125_v42 = vperm.slane %v1117_v63, %v4385_v12 }
 0x332   : > { %v1115_v32 = vsel %vm381_vm2, %v1114_v59, %v5942_v18 }
 0x333   : > { %v1121_v18 = vperm.slane %v1115_v32, %v4385_v12  ;;  %v1176_v46 = vrot.slane %v1125_v42, 4  ;;  %v1175_v3 = vsel %vm381_vm2, %v1174_v35, %v1125_v42 }
 0x334   : > { %v1181_v5 = vperm.slane %v1175_v3, %v4388_v15 }
 0x335   : > { %v1164_v49 = vrot.slane %v1121_v18, 4  ;;  %v1177_v23 = vsel %vm381_vm2, %v1137_v41, %v1176_v46  ;;  %v1163_v60 = vsel %vm381_vm2, %v1162_v47, %v1121_v18 }
 0x336   : > { %v1185_v45 = vperm.slane %v1177_v23, %v4388_v15  ;;  %v1169_v55 = vperm.slane %v1163_v60, %v4388_v15  ;;  %v1194_v63 = vrot.slane %v1181_v5, 4  ;;  %v1197_v57 = vsel %vm381_vm2, %v1181_v5, %v1196_v43 }
 0x337   : > { %3340 = vrot.lane.b32.xlu2 %v6058_v44, %s4311_s11  ;;  %v1165_v20 = vsel %vm381_vm2, %v1133_v25, %v1164_v49  ;;  %v1352_v49 = vrot.slane %v1197_v57, 4 }
 0x338   : > { %v1173_v7 = vperm.slane %v1165_v20, %v4388_v15  ;;  %v1198_v19 = vrot.slane %v1185_v45, 4  ;;  %v1186_v59 = vrot.slane %v1169_v55, 4  ;;  %v1201_v24 = vsel %vm381_vm2, %v1185_v45, %v1200_v52 }
 0x339   : > { %3376 = vrot.lane.b32.xlu1 %v6058_v44, %s4313_s25  ;;  %3372 = vrot.lane.b32.xlu0 %v6070_v40, %s4312_s24  ;;  %v1189_v28 = vsel %vm381_vm2, %v1169_v55, %v1188_v30  ;;  %v1350_v17 = vrot.slane %v1201_v24, 4  ;;  %v1195_v1 = vsel %vm381_vm2, %v1194_v63, %v1157_v27  ;;  %v1353_v11 = vsel %vm381_vm2, %v1201_v24, %v1352_v49 }
 0x33a   : > { %v1190_v62 = vrot.slane %v1173_v7, 4  ;;  %v1193_v32 = vsel %vm381_vm2, %v1173_v7, %v1192_v38  ;;  %v1199_v48 = vsel %vm381_vm2, %v1198_v19, %v1161_v53  ;;  %v1187_v18 = vsel %vm381_vm2, %v1186_v59, %v1145_v6 }
 0x33b   : > { %v1326_v42 = vrot.slane %v1193_v32, 4  ;;  %v1338_v41 = vrot.slane %v1199_v48, 4  ;;  %v1328_v10 = vrot.slane %v1189_v28, 4  ;;  %v1316_v47 = vrot.slane %v1187_v18, 4 }
 0x33c   : > { %v1191_v58 = vsel %vm381_vm2, %v1190_v62, %v1149_v9  ;;  %v1351_v37 = vsel %vm381_vm2, %v1350_v17, %v1197_v57  ;;  %v1340_v20 = vrot.slane %v1195_v1, 4  ;;  %v1361_v52 = vperm.slane %v1353_v11, %v4385_v12 }
 0x33d   : > { %v1314_v51 = vrot.slane %v1191_v58, 4  ;;  %v1327_v35 = vsel %vm381_vm2, %v1326_v42, %v1189_v28  ;;  %v1339_v39 = vsel %vm381_vm2, %v1338_v41, %v1195_v1  ;;  %v1329_v60 = vsel %vm381_vm2, %v1193_v32, %v1328_v10 }
 0x33e   : > { %v1357_v7 = vperm.slane %v1351_v37, %v4385_v12  ;;  %v1317_v3 = vsel %vm381_vm2, %v1191_v58, %v1316_v47  ;;  %v1333_v55 = vperm.slane %v1327_v35, %v4385_v12  ;;  %v1341_v6 = vsel %vm381_vm2, %v1199_v48, %v1340_v20 }
 0x33f   : > { %3346 = vrot.lane.b32.xlu2 %v6058_v44, %s4310_s10  ;;  %v1315_v23 = vsel %vm381_vm2, %v1314_v51, %v1187_v18  ;;  %v1345_v27 = vperm.slane %v1339_v39, %v4385_v12  ;;  %v1337_v5 = vperm.slane %v1329_v60, %v4385_v12  ;;  %v1325_v19 = vperm.slane %v1317_v3, %v4385_v12 }
 0x340   : > { %v1321_v9 = vperm.slane %v1315_v23, %v4385_v12  ;;  %v1349_v59 = vperm.slane %v1341_v6, %v4385_v12  ;;  %v1398_v63 = vrot.slane %v1361_v52, 4 }
 0x341   : > { %v1388_v43 = vrot.slane %v1345_v27, 4  ;;  %v1374_v32 = vrot.slane %v1337_v5, 4  ;;  %v1376_v58 = vrot.slane %v1325_v19, 4 }
 0x342   : > { %v1364_v30 = vrot.slane %v1321_v9, 4  ;;  %v1400_v57 = vrot.slane %v1349_v59, 4 }
 0x343   : > { %v1389_v18 = vsel %vm381_vm2, %v1357_v7, %v1388_v43  ;;  %v1375_v42 = vsel %vm381_vm2, %v1374_v32, %v1325_v19 }
 0x344   : > { %v6211_v47 = vperm.slane %v1389_v18, %v4388_v15  ;;  %v1401_v37 = vsel %vm381_vm2, %v1361_v52, %v1400_v57 }
 0x345   : > { %v1409_v60 = vperm.slane %v1401_v37, %v4388_v15 }
 0x347   : > { %3352 = vrot.lane.b32.xlu2 %v6058_v44, %s4314_s26 }
 0x34f   : > { %3370 = vrot.lane.b32.xlu2 %v6058_v44, %s4312_s24 }
 0x357   : > { %2204 = vrot.lane.b32.xlu2 %v6067_v16, %s4311_s11 }
 0x35f   : > { %2210 = vrot.lane.b32.xlu2 %v6067_v16, %s4310_s10 }
 0x361   : > { %v6122_v29 = vpop.permute.xlu2 %2202 }
 0x362   : > { %v2258_v25 = vrot.slane %v6122_v29, 4 }
 0x367   : > { %2222 = vrot.lane.b32.xlu2 %v6067_v16, %s4315_s27 }
 0x369   : > { %v6142_v21 = vpop.permute.xlu2 %2208 }
 0x36a   : > { %v2247_v61 = vsel %vm381_vm2, %v6142_v21, %v2246_v54  ;;  %v1386_v54 = vrot.slane %v1357_v7, 4  ;;  %v2244_v24 = vrot.slane %v6142_v21, 4 }
 0x36b   : > { %v2255_v31 = vperm.slane %v2247_v61, %v4385_v12  ;;  %v1362_v61 = vrot.slane %v1333_v55, 4 }
 0x36c   : > { %v1387_v48 = vsel %vm381_vm2, %v1386_v54, %v1345_v27  ;;  %v2245_v17 = vsel %vm381_vm2, %v2244_v24, %v5967_v36  ;;  %v1377_v36 = vsel %vm381_vm2, %v1337_v5, %v1376_v58 }
 0x36d   : > { %v2306_v26 = vrot.slane %v2255_v31, 4  ;;  %v1363_v21 = vsel %vm381_vm2, %v1362_v61, %v1321_v9  ;;  %v2251_v41 = vperm.slane %v2245_v17, %v4385_v12  ;;  %v1385_v20 = vperm.slane %v1377_v36, %v4388_v15 }
 0x36e   : > { %v6205_v49 = vperm.slane %v1363_v21, %v4388_v15  ;;  %v1414_v9 = vrot.slane %v6211_v47, 4  ;;  %v1422_v61 = vrot.slane %v1409_v60, 4 }
 0x36f   : > { %2228 = vrot.lane.b32.xlu2 %v6067_v16, %s4316_s28  ;;  %v2294_v11 = vrot.slane %v2251_v41, 4 }
 0x370   : > { %v1412_v3 = vrot.slane %v6205_v49, 4 }
 0x371   : > { %v2215_v33 = vpop.permute.xlu2 %2214 }
 0x372   : > { %v2259_v46 = vsel %vm381_vm2, %v2215_v33, %v2258_v25  ;;  %v2256_v38 = vrot.slane %v2215_v33, 4  ;;  %v6198_v25 = vperm.slane %v1387_v48, %v4388_v15 }
 0x373   : > { %v2267_v8 = vperm.slane %v2259_v46, %v4385_v12 }
 0x374   : > { %v2257_v28 = vsel %vm381_vm2, %v2256_v38, %v6122_v29  ;;  %v1399_v29 = vsel %vm381_vm2, %v1398_v63, %v1349_v59  ;;  %v1410_v23 = vrot.slane %v6198_v25, 4 }
 0x375   : > { %v2304_v34 = vrot.slane %v2267_v8, 4  ;;  %v6166_v53 = vsel %vm381_vm2, %v2267_v8, %v2306_v26  ;;  %v2263_v1 = vperm.slane %v2257_v28, %v4385_v12  ;;  %v1381_v26 = vperm.slane %v1375_v42, %v4388_v15 }
 0x376   : > { %v1405_v8 = vperm.slane %v1399_v29, %v4388_v15  ;;  %v6230_v54 = vsel %vm381_vm2, %v1410_v23, %v6205_v49 }
 0x377   : > { %v6173_v45 = vsel %vm381_vm2, %v2304_v34, %v2255_v31  ;;  %2234 = vrot.lane.b32.xlu2 %v6067_v16, %s4312_s24  ;;  %v1365_v31 = vsel %vm381_vm2, %v1333_v55, %v1364_v30  ;;  %v2292_v39 = vrot.slane %v2263_v1, 4  ;;  %v1420_v5 = vrot.slane %v1381_v26, 4 }
 0x378   : > { %v6208_v46 = vperm.slane %v1365_v31, %v4388_v15  ;;  %v1418_v27 = vrot.slane %v1405_v8, 4  ;;  %v2295_v52 = vsel %vm381_vm2, %v2263_v1, %v2294_v11  ;;  %v2315_v30 = vperm.slane %v6166_v53, %v4388_v15 }
 0x379   : > { %v2221_v62 = vpop.permute.xlu2 %2220  ;;  %v2227_v34 = vpop.permute.xlu1 %2226  ;;  %v2293_v38 = vsel %vm381_vm2, %v2292_v39, %v2251_v41  ;;  %v2303_v58 = vperm.slane %v2295_v52, %v4388_v15  ;;  %v2311_v53 = vperm.slane %v6173_v45, %v4388_v15  ;;  %v6253_v1 = vsel %vm381_vm2, %v1422_v61, %v1385_v20 }
 0x37a   : > { %v2270_v33 = vrot.slane %v2221_v62, 4  ;;  %v1416_v55 = vrot.slane %v6208_v46, 4  ;;  %v2282_v19 = vrot.slane %v2227_v34, 4  ;;  %v6239_v63 = vsel %vm381_vm2, %v1414_v9, %v6208_v46 }
 0x37b   : > { %v6244_v57 = vsel %vm381_vm2, %v1418_v27, %v1381_v26  ;;  %v2299_v17 = vperm.slane %v2293_v38, %v4388_v15  ;;  %v6256_v36 = vsel %vm381_vm2, %v1405_v8, %v1420_v5  ;;  %v2350_v39 = vrot.slane %v2311_v53, 4 }
 0x37d   : > { %v2342_v8 = vrot.slane %v2299_v17, 4 }
 0x37f   : > { %2240 = vrot.lane.b32.xlu2 %v6067_v16, %s4313_s25 }
 0x381   : > { %v2233_v51 = vpop.permute.xlu2 %2232 }
 0x382   : > { %v2268_v10 = vrot.slane %v2233_v51, 4  ;;  %v2271_v35 = vsel %vm381_vm2, %v2233_v51, %v2270_v33  ;;  %v2354_v51 = vrot.slane %v2315_v30, 4  ;;  %v2346_v33 = vrot.slane %v2303_v58, 4 }
 0x383   : > { %v2279_v6 = vperm.slane %v2271_v35, %v4385_v12 }
 0x384   : > { %v2269_v7 = vsel %vm381_vm2, %v2268_v10, %v2221_v62  ;;  %v1424_v62 = vrot.slane %v1385_v20, 4 }
 0x385   : > { %v2275_v59 = vperm.slane %v2269_v7, %v4385_v12  ;;  %v2330_v48 = vrot.slane %v2279_v6, 4 }
 0x386   : > { %v6272_v52 = vsel %vm381_vm2, %v1409_v60, %v1424_v62 }
 0x387   : > { %3342 = vrot.lane.b32.xlu2 %v6070_v40, %s4311_s11  ;;  %v2318_v31 = vrot.slane %v2275_v59, 4 }
 0x389   : > { %v2239_v24 = vpop.permute.xlu2 %2238 }
 0x38a   : > { %v2280_v43 = vrot.slane %v2239_v24, 4  ;;  %v2283_v32 = vsel %vm381_vm2, %v2239_v24, %v2282_v19 }
 0x38b   : > { %v2291_v28 = vperm.slane %v2283_v32, %v4385_v12 }
 0x38c   : > { %v2281_v21 = vsel %vm381_vm2, %v2280_v43, %v2227_v34 }
 0x38d   : > { %v2287_v18 = vperm.slane %v2281_v21, %v4385_v12  ;;  %v2328_v42 = vrot.slane %v2291_v28, 4  ;;  %v2331_v29 = vsel %vm381_vm2, %v2291_v28, %v2330_v48 }
 0x38e   : > { %v2339_v41 = vperm.slane %v2331_v29, %v4388_v15 }
 0x38f   : > { %v2316_v10 = vrot.slane %v2287_v18, 4  ;;  %v2319_v45 = vsel %vm381_vm2, %v2287_v18, %v2318_v31  ;;  %v2329_v37 = vsel %vm381_vm2, %v2328_v42, %v2279_v6  ;;  %3348 = vrot.lane.b32.xlu2 %v6070_v40, %s4310_s10 }
 0x390   : > { %v2327_v26 = vperm.slane %v2319_v45, %v4388_v15  ;;  %v2335_v35 = vperm.slane %v2329_v37, %v4388_v15  ;;  %v2352_v20 = vrot.slane %v2339_v41, 4  ;;  %v2355_v23 = vsel %vm381_vm2, %v2339_v41, %v2354_v51 }
 0x391   : > { %v2317_v34 = vsel %vm381_vm2, %v2316_v10, %v2275_v59  ;;  %v2504_v11 = vrot.slane %v2355_v23, 4  ;;  %v6267_v7 = vpop.permute.xlu2 %3340 }
 0x392   : > { %v2323_v9 = vperm.slane %v2317_v34, %v4388_v15  ;;  %v2344_v6 = vrot.slane %v2327_v26, 4  ;;  %v2347_v27 = vsel %vm381_vm2, %v2327_v26, %v2346_v33  ;;  %v2348_v5 = vrot.slane %v2335_v35, 4 }
 0x393   : > { %v2351_v19 = vsel %vm381_vm2, %v2335_v35, %v2350_v39  ;;  %v2353_v38 = vsel %vm381_vm2, %v2352_v20, %v2315_v30  ;;  %v2480_v24 = vrot.slane %v2347_v27, 4 }
 0x394   : > { %v2340_v61 = vrot.slane %v2323_v9, 4  ;;  %v2343_v59 = vsel %vm381_vm2, %v2323_v9, %v2342_v8  ;;  %v2345_v43 = vsel %vm381_vm2, %v2344_v6, %v2303_v58  ;;  %v2349_v32 = vsel %vm381_vm2, %v2348_v5, %v2311_v53 }
 0x395   : > { %v2468_v48 = vrot.slane %v2345_v43, 4  ;;  %v2481_v28 = vsel %vm381_vm2, %v2480_v24, %v2343_v59  ;;  %v2482_v21 = vrot.slane %v2343_v59, 4  ;;  %v2492_v31 = vrot.slane %v2353_v38, 4 }
 0x396   : > { %v2341_v60 = vsel %vm381_vm2, %v2340_v61, %v2299_v17  ;;  %v2487_v62 = vperm.slane %v2481_v28, %v4385_v12  ;;  %v2494_v18 = vrot.slane %v2349_v32, 4  ;;  %v2505_v30 = vsel %vm381_vm2, %v2504_v11, %v2351_v19 }
 0x397   : > { %v2469_v42 = vsel %vm381_vm2, %v2468_v48, %v2341_v60  ;;  %v2470_v29 = vrot.slane %v2341_v60, 4  ;;  %v2483_v51 = vsel %vm381_vm2, %v2347_v27, %v2482_v21  ;;  %v2493_v58 = vsel %vm381_vm2, %v2492_v31, %v2349_v32  ;;  %3354 = vrot.lane.b32.xlu2 %v6070_v40, %s4314_s26 }
 0x398   : > { %v2475_v53 = vperm.slane %v2469_v42, %v4385_v12  ;;  %v2491_v41 = vperm.slane %v2483_v51, %v4385_v12  ;;  %v2495_v17 = vsel %vm381_vm2, %v2353_v38, %v2494_v18  ;;  %v2499_v33 = vperm.slane %v2493_v58, %v4385_v12 }
 0x399   : > { %v2471_v10 = vsel %vm381_vm2, %v2345_v43, %v2470_v29  ;;  %v2503_v45 = vperm.slane %v2495_v17, %v4385_v12  ;;  %v2506_v37 = vrot.slane %v2351_v19, 4  ;;  %v2511_v26 = vperm.slane %v2505_v30, %v4385_v12  ;;  %v6295_v35 = vpop.permute.xlu2 %3346 }
 0x39a   : > { %v2479_v20 = vperm.slane %v2471_v10, %v4385_v12  ;;  %v2516_v8 = vrot.slane %v2487_v62, 4  ;;  %v2518_v39 = vrot.slane %v2475_v53, 4  ;;  %v2528_v34 = vrot.slane %v2491_v41, 4 }
 0x39b   : > { %v2507_v11 = vsel %vm381_vm2, %v2355_v23, %v2506_v37  ;;  %v2540_v9 = vrot.slane %v2511_v26, 4  ;;  %v2542_v6 = vrot.slane %v2499_v33, 4  ;;  %v2554_v27 = vrot.slane %v2503_v45, 4  ;;  %v6303_v61 = vpop.permute.xlu1 %3358 }
 0x39c   : > { %v2515_v5 = vperm.slane %v2507_v11, %v4385_v12  ;;  %v2517_v38 = vsel %vm381_vm2, %v2516_v8, %v2475_v53  ;;  %v2519_v19 = vsel %vm381_vm2, %v2487_v62, %v2518_v39  ;;  %v2529_v24 = vsel %vm381_vm2, %v2528_v34, %v2479_v20 }
 0x39d   : > { %v2523_v59 = vperm.slane %v2517_v38, %v4388_v15  ;;  %v2527_v43 = vperm.slane %v2519_v19, %v4388_v15  ;;  %v2530_v32 = vrot.slane %v2479_v20, 4  ;;  %v2535_v23 = vperm.slane %v2529_v24, %v4388_v15 }
 0x39e   : > { %v2541_v48 = vsel %vm381_vm2, %v2540_v9, %v2499_v33  ;;  %v2543_v28 = vsel %vm381_vm2, %v2511_v26, %v2542_v6  ;;  %v2552_v21 = vrot.slane %v2515_v5, 4  ;;  %v2555_v31 = vsel %vm381_vm2, %v2515_v5, %v2554_v27 }
 0x39f   : > { %v2531_v60 = vsel %vm381_vm2, %v2491_v41, %v2530_v32  ;;  %v2547_v62 = vperm.slane %v2541_v48, %v4388_v15  ;;  %v2551_v18 = vperm.slane %v2543_v28, %v4388_v15  ;;  %v2563_v30 = vperm.slane %v2555_v31, %v4388_v15  ;;  %3360 = vrot.lane.b32.xlu2 %v6070_v40, %s4315_s27 }
 0x3a0   : > { %v2539_v42 = vperm.slane %v2531_v60, %v4388_v15  ;;  %v2553_v29 = vsel %vm381_vm2, %v2552_v21, %v2503_v45  ;;  %v2566_v51 = vrot.slane %v2523_v59, 4  ;;  %v2570_v58 = vrot.slane %v2527_v43, 4  ;;  %v3365_v21 = vpop.permute.xlu0 %3364 }
 0x3a1   : > { %v2559_v53 = vperm.slane %v2553_v29, %v4388_v15  ;;  %v2564_v17 = vrot.slane %v2547_v62, 4  ;;  %v2568_v33 = vrot.slane %v2551_v18, 4  ;;  %v2574_v41 = vrot.slane %v2535_v23, 4  ;;  %v3353_v10 = vpop.permute.xlu2 %3352 }
 0x3a2   : > { %v2567_v37 = vsel %vm381_vm2, %v2547_v62, %v2566_v51  ;;  %v2571_v26 = vsel %vm381_vm2, %v2551_v18, %v2570_v58  ;;  %v2576_v20 = vrot.slane %v2563_v30, 4  ;;  %v2578_v8 = vrot.slane %v2539_v42, 4 }
 0x3a3   : > { %v2565_v39 = vsel %vm381_vm2, %v2564_v17, %v2523_v59  ;;  %v2569_v34 = vsel %vm381_vm2, %v2568_v33, %v2527_v43  ;;  %v2572_v11 = vrot.slane %v2559_v53, 4  ;;  %v2575_v45 = vsel %vm381_vm2, %v2559_v53, %v2574_v41  ;;  %v6331_v38 = vpop.permute.xlu1 %3366 }
 0x3a4   : > { %v2577_v9 = vsel %vm381_vm2, %v2576_v20, %v2539_v42  ;;  %v2579_v6 = vsel %vm381_vm2, %v2563_v30, %v2578_v8  ;;  %v6328_v27 = vadd.f32 %v2575_v45, %v6256_v36  ;;  %v3384_v5 = vrot.slane %v6058_v44, 4 }
 0x3a5   : > { %v2573_v19 = vsel %vm381_vm2, %v2572_v11, %v2535_v23  ;;  %v6335_v24 = vadd.f32 %v2577_v9, %v6253_v1  ;;  %v6338_v59 = vadd.f32 %v2579_v6, %v6272_v52  ;;  %v3396_v43 = vrot.slane %v6267_v7, 4 }
 0x3a6   : > { %v6342_v32 = vadd.f32 %v2573_v19, %v6244_v57  ;;  %v3382_v36 = vrot.slane %v6295_v35, 4  ;;  %v3385_v48 = vsel %vm381_vm2, %v6295_v35, %v3384_v5  ;;  %v1413_v23 = vsel %vm381_vm2, %v6198_v25, %v1412_v3 }
 0x3a7   : > { %v3393_v1 = vperm.slane %v3385_v48, %v4385_v12  ;;  %v3394_v28 = vrot.slane %v3353_v10, 4  ;;  %v3397_v52 = vsel %vm381_vm2, %v3353_v10, %v3396_v43  ;;  %3378 = vrot.lane.b32.xlu2 %v6070_v40, %s4313_s25  ;;  %v1417_v57 = vsel %vm381_vm2, %v6211_v47, %v1416_v55 }
 0x3a8   : > { %v3383_v49 = vsel %vm381_vm2, %v3382_v36, %v6058_v44  ;;  %v3405_v35 = vperm.slane %v3397_v52, %v4385_v12  ;;  %v6363_v25 = vadd.f32 %v2565_v39, %v6230_v54  ;;  %v6365_v3 = vadd.f32 %v2567_v37, %v1413_v23 }
 0x3a9   : > { %v3389_v31 = vperm.slane %v3383_v49, %v4385_v12  ;;  %v3444_v60 = vrot.slane %v3393_v1, 4  ;;  %v3395_v46 = vsel %vm381_vm2, %v3394_v28, %v6267_v7  ;;  %v3371_v62 = vpop.permute.xlu2 %3370  ;;  %v6371_v47 = vadd.f32 %v2569_v34, %v6239_v63 }
 0x3aa   : > { %v3401_v55 = vperm.slane %v3395_v46, %v4385_v12  ;;  %v3442_v44 = vrot.slane %v3405_v35, 4  ;;  %v6374_v18 = vadd.f32 %v2571_v26, %v1417_v57  ;;  %v3406_v30 = vrot.slane %v3371_v62, 4 }
 0x3ab   : > { %v3420_v54 = vrot.slane %v3365_v21, 4  ;;  %v3432_v42 = vrot.slane %v3389_v31, 4  ;;  %v3408_v29 = vrot.slane %v6303_v61, 4  ;;  %v3445_v53 = vsel %vm381_vm2, %v3405_v35, %v3444_v60  ;;  %v3377_v7 = vpop.permute.xlu1 %3376 }
 0x3ac   : > { %v3430_v51 = vrot.slane %v3401_v55, 4  ;;  %v3443_v58 = vsel %vm381_vm2, %v3442_v44, %v3393_v1  ;;  %v3418_v63 = vrot.slane %v3377_v7, 4  ;;  %v3407_v41 = vsel %vm381_vm2, %v3406_v30, %v6303_v61 }
 0x3ad   : > { %v3433_v17 = vsel %vm381_vm2, %v3401_v55, %v3432_v42  ;;  %v3421_v33 = vsel %vm381_vm2, %v3377_v7, %v3420_v54  ;;  %v3409_v26 = vsel %vm381_vm2, %v3371_v62, %v3408_v29  ;;  %v3449_v20 = vperm.slane %v3443_v58, %v4388_v15 }
 0x3ae   : > { %v3431_v10 = vsel %vm381_vm2, %v3430_v51, %v3389_v31  ;;  %v3429_v37 = vperm.slane %v3421_v33, %v4385_v12  ;;  %v3453_v8 = vperm.slane %v3445_v53, %v4388_v15  ;;  %v3419_v39 = vsel %vm381_vm2, %v3418_v63, %v3365_v21 }
 0x3af   : > { %v3441_v34 = vperm.slane %v3433_v17, %v4388_v15  ;;  %v3425_v11 = vperm.slane %v3419_v39, %v4385_v12  ;;  %v3413_v9 = vperm.slane %v3407_v41, %v4385_v12  ;;  %v3437_v61 = vperm.slane %v3431_v10, %v4388_v15 }
 0x3b0   : > { %v3466_v45 = vrot.slane %v3429_v37, 4  ;;  %v3417_v6 = vperm.slane %v3409_v26, %v4385_v12  ;;  %v2358_v36 = vrot.slane %v6067_v16, 4  ;;  %v3488_v48 = vrot.slane %v3449_v20, 4 }
 0x3b1   : > { %v3454_v5 = vrot.slane %v3425_v11, 4  ;;  %v3456_v19 = vrot.slane %v3413_v9, 4  ;;  %v6394_v43 = vpop.permute.xlu2 %2204  ;;  %v3492_v23 = vrot.slane %v3453_v8, 4  ;;  %v3484_v52 = vrot.slane %v3441_v34, 4 }
 0x3b2   : > { %v3467_v1 = vsel %vm381_vm2, %v3466_v45, %v3417_v6  ;;  %v3468_v28 = vrot.slane %v3417_v6, 4  ;;  %v3480_v35 = vrot.slane %v3437_v61, 4  ;;  %v2370_v30 = vrot.slane %v6394_v43, 4 }
 0x3b3   : > { %v3455_v57 = vsel %vm381_vm2, %v3454_v5, %v3413_v9  ;;  %v3457_v21 = vsel %vm381_vm2, %v3425_v11, %v3456_v19  ;;  %v3473_v49 = vperm.slane %v3467_v1, %v4388_v15 }
 0x3b4   : > { %v3461_v31 = vperm.slane %v3455_v57, %v4388_v15  ;;  %v3465_v60 = vperm.slane %v3457_v21, %v4388_v15  ;;  %v3469_v46 = vsel %vm381_vm2, %v3429_v37, %v3468_v28 }
 0x3b5   : > { %v3477_v62 = vperm.slane %v3469_v46, %v4388_v15  ;;  %v3486_v55 = vrot.slane %v3473_v49, 4  ;;  %v3489_v44 = vsel %vm381_vm2, %v3473_v49, %v3488_v48 }
 0x3b6   : > { %v3478_v54 = vrot.slane %v3461_v31, 4  ;;  %v3481_v42 = vsel %vm381_vm2, %v3461_v31, %v3480_v35  ;;  %v3482_v29 = vrot.slane %v3465_v60, 4  ;;  %v3485_v51 = vsel %vm381_vm2, %v3465_v60, %v3484_v52 }
 0x3b7   : > { %v3487_v58 = vsel %vm381_vm2, %v3486_v55, %v3449_v20  ;;  %v3490_v53 = vrot.slane %v3477_v62, 4  ;;  %v3493_v7 = vsel %vm381_vm2, %v3477_v62, %v3492_v23  ;;  %v3618_v17 = vrot.slane %v3485_v51, 4 }
 0x3b8   : > { %v3479_v63 = vsel %vm381_vm2, %v3478_v54, %v3437_v61  ;;  %v3483_v33 = vsel %vm381_vm2, %v3482_v29, %v3441_v34  ;;  %v3620_v41 = vrot.slane %v3481_v42, 4  ;;  %v3632_v10 = vrot.slane %v3487_v58, 4 }
 0x3b9   : > { %v3491_v37 = vsel %vm381_vm2, %v3490_v53, %v3453_v8  ;;  %v3606_v26 = vrot.slane %v3483_v33, 4  ;;  %v3608_v39 = vrot.slane %v3479_v63, 4  ;;  %v3619_v11 = vsel %vm381_vm2, %v3618_v17, %v3481_v42  ;;  %v6415_v45 = vpop.permute.xlu2 %2210 }
 0x3ba   : > { %v3621_v20 = vsel %vm381_vm2, %v3485_v51, %v3620_v41  ;;  %v3625_v9 = vperm.slane %v3619_v11, %v4385_v12  ;;  %v3630_v6 = vrot.slane %v3491_v37, 4  ;;  %v3633_v5 = vsel %vm381_vm2, %v3491_v37, %v3632_v10 }
 0x3bb   : > { %v3607_v61 = vsel %vm381_vm2, %v3606_v26, %v3479_v63  ;;  %v3609_v34 = vsel %vm381_vm2, %v3483_v33, %v3608_v39  ;;  %v3629_v19 = vperm.slane %v3621_v20, %v4385_v12  ;;  %v3641_v8 = vperm.slane %v3633_v5, %v4385_v12 }
 0x3bc   : > { %v3613_v48 = vperm.slane %v3607_v61, %v4385_v12  ;;  %v3617_v23 = vperm.slane %v3609_v34, %v4385_v12  ;;  %v3631_v1 = vsel %vm381_vm2, %v3630_v6, %v3487_v58  ;;  %v3642_v28 = vrot.slane %v3493_v7, 4 }
 0x3bd   : > { %v3637_v52 = vperm.slane %v3631_v1, %v4385_v12  ;;  %v3644_v57 = vrot.slane %v3489_v44, 4  ;;  %v3654_v21 = vrot.slane %v3625_v9, 4  ;;  %v3666_v49 = vrot.slane %v3629_v19, 4 }
 0x3be   : > { %v3643_v35 = vsel %vm381_vm2, %v3642_v28, %v3489_v44  ;;  %v3656_v31 = vrot.slane %v3613_v48, 4  ;;  %v3668_v60 = vrot.slane %v3617_v23, 4  ;;  %v3692_v46 = vrot.slane %v3641_v8, 4  ;;  %v2217_v44 = vpop.permute.xlu0 %2216 }
 0x3bf   : > { %v3645_v62 = vsel %vm381_vm2, %v3493_v7, %v3644_v57  ;;  %v3649_v55 = vperm.slane %v3643_v35, %v4385_v12  ;;  %v3655_v54 = vsel %vm381_vm2, %v3654_v21, %v3613_v48  ;;  %v3667_v42 = vsel %vm381_vm2, %v3666_v49, %v3617_v23 }
 0x3c0   : > { %v3653_v29 = vperm.slane %v3645_v62, %v4385_v12  ;;  %v3657_v51 = vsel %vm381_vm2, %v3625_v9, %v3656_v31  ;;  %v3661_v58 = vperm.slane %v3655_v54, %v4388_v15  ;;  %v3669_v53 = vsel %vm381_vm2, %v3629_v19, %v3668_v60 }
 0x3c1   : > { %v3665_v17 = vperm.slane %v3657_v51, %v4388_v15  ;;  %v3673_v63 = vperm.slane %v3667_v42, %v4388_v15  ;;  %v3677_v7 = vperm.slane %v3669_v53, %v4388_v15  ;;  %v3678_v33 = vrot.slane %v3649_v55, 4  ;;  %v6440_v41 = vpop.permute.xlu2 %2222 }
 0x3c2   : > { %v3680_v10 = vrot.slane %v3637_v52, 4  ;;  %v3690_v37 = vrot.slane %v3653_v29, 4  ;;  %v3693_v26 = vsel %vm381_vm2, %v3653_v29, %v3692_v46  ;;  %v3704_v39 = vrot.slane %v3661_v58, 4 }
 0x3c3   : > { %v3679_v11 = vsel %vm381_vm2, %v3678_v33, %v3637_v52  ;;  %v3701_v20 = vperm.slane %v3693_v26, %v4388_v15  ;;  %v3708_v9 = vrot.slane %v3665_v17, 4  ;;  %v3712_v6 = vrot.slane %v3673_v63, 4 }
 0x3c4   : > { %v2368_v5 = vrot.slane %v2217_v44, 4  ;;  %v3681_v61 = vsel %vm381_vm2, %v3649_v55, %v3680_v10  ;;  %v3685_v34 = vperm.slane %v3679_v11, %v4388_v15  ;;  %v3691_v19 = vsel %vm381_vm2, %v3690_v37, %v3641_v8 }
 0x3c5   : > { %v3689_v48 = vperm.slane %v3681_v61, %v4388_v15  ;;  %v3697_v23 = vperm.slane %v3691_v19, %v4388_v15  ;;  %v3714_v1 = vrot.slane %v3701_v20, 4  ;;  %v3716_v28 = vrot.slane %v3677_v7, 4 }
 0x3c6   : > { %v3702_v57 = vrot.slane %v3685_v34, 4  ;;  %v3705_v52 = vsel %vm381_vm2, %v3685_v34, %v3704_v39  ;;  %v2369_v21 = vsel %vm381_vm2, %v2368_v5, %v6394_v43  ;;  %v2371_v49 = vsel %vm381_vm2, %v2217_v44, %v2370_v30 }
 0x3c7   : > { %v3706_v35 = vrot.slane %v3689_v48, 4  ;;  %v3709_v8 = vsel %vm381_vm2, %v3689_v48, %v3708_v9  ;;  %v3710_v31 = vrot.slane %v3697_v23, 4  ;;  %v3713_v60 = vsel %vm381_vm2, %v3697_v23, %v3712_v6 }
 0x3c8   : > { %v3703_v46 = vsel %vm381_vm2, %v3702_v57, %v3661_v58  ;;  %v3715_v62 = vsel %vm381_vm2, %v3714_v1, %v3677_v7  ;;  %v3832_v55 = vadd.f32 %v3705_v52, %v6365_v3  ;;  %v3836_v54 = vadd.f32 %v3709_v8, %v6374_v18  ;;  %v3846_v58 = vld [vmem:[%s6736_s3] sm:$0xff] }
 0x3c9   : > { %v3707_v42 = vsel %vm381_vm2, %v3706_v35, %v3665_v17  ;;  %v3711_v43 = vsel %vm381_vm2, %v3710_v31, %v3673_v63  ;;  %v3717_v30 = vsel %vm381_vm2, %v3701_v20, %v3716_v28  ;;  %v3830_v29 = vadd.f32 %v3703_v46, %v6363_v25  ;;  %v2229_v51 = vpop.permute.xlu2 %2228 }
 0x3ca   : > { %v3834_v53 = vadd.f32 %v3707_v42, %v6371_v47  ;;  %v3838_v3 = vadd.f32 %v3711_v43, %v6342_v32  ;;  %v3840_v18 = vadd.f32 %v3713_v60, %v6328_v27  ;;  %v2379_v44 = vperm.slane %v2371_v49, %v4385_v12 }
 0x3cb   : > { %v3842_v17 = vadd.f32 %v3715_v62, %v6335_v24  ;;  %v3848_v63 = vadd.f32 %v3846_v58, %v3830_v29  ;;  %v3850_v7 = vadd.f32 %v3846_v58, %v3832_v55  ;;  %v2375_v33 = vperm.slane %v2369_v21, %v4385_v12 }
 0x3cc   : > { %v3844_v32 = vadd.f32 %v3717_v30, %v6338_v59  ;;  %v3852_v27 = vadd.f32 %v3846_v58, %v3834_v53  ;;  %v3854_v25 = vadd.f32 %v3846_v58, %v3836_v54  ;;  %v3856_v47 = vadd.f32 %v3846_v58, %v3838_v3 }
 0x3cd   : > { %3864 = vst.msk [vmem:[%s6479_s7] sm:$0xff] %vm885_vm3, %v3848_v63  ;;  %v2356_v24 = vrot.slane %v6415_v45, 4  ;;  %v2359_v10 = vsel %vm381_vm2, %v6415_v45, %v2358_v36  ;;  %v3858_v37 = vadd.f32 %v3846_v58, %v3840_v18  ;;  %v2416_v26 = vrot.slane %v2379_v44, 4 }
 0x3ce   : > { %3866 = vst.msk [vmem:[%s6479_s7 + $0x10] sm:$0xff] %vm885_vm3, %v3850_v7  ;;  %v2367_v59 = vperm.slane %v2359_v10, %v4385_v12  ;;  %v3860_v39 = vadd.f32 %v3846_v58, %v3842_v17  ;;  %v2404_v11 = vrot.slane %v2375_v33, 4  ;;  %v3862_v9 = vadd.f32 %v3846_v58, %v3844_v32 }
 0x3cf   : > { %3868 = vst.msk [vmem:[%s6479_s7 + $0x20] sm:$0xff] %vm885_vm3, %v3852_v27  ;;  %v2357_v20 = vsel %vm381_vm2, %v2356_v24, %v6067_v16  ;;  %v2382_v5 = vrot.slane %v6440_v41, 4  ;;  %v2394_v52 = vrot.slane %v2229_v51, 4  ;;  %v3496_v3 = vrot.slane %v6070_v40, 4 }
 0x3d0   : > { %3870 = vst.msk [vmem:[%s6479_s7 + $0x30] sm:$0xff] %vm885_vm3, %v3854_v25  ;;  %v2363_v36 = vperm.slane %v2357_v20, %v4385_v12  ;;  %v2417_v45 = vsel %vm381_vm2, %v2416_v26, %v2367_v59  ;;  %v2418_v6 = vrot.slane %v2367_v59, 4 }
 0x3d1   : > { %3872 = vst.msk [vmem:[%s6479_s7 + $0x40] sm:$0xff] %vm885_vm3, %v3856_v47  ;;  %v2235_v61 = vpop.permute.xlu2 %2234 }
 0x3d2   : > { %3874 = vst.msk [vmem:[%s6479_s7 + $0x50] sm:$0xff] %vm885_vm3, %v3858_v37  ;;  %v2405_v34 = vsel %vm381_vm2, %v2404_v11, %v2363_v36  ;;  %v2406_v19 = vrot.slane %v2363_v36, 4  ;;  %v2419_v16 = vsel %vm381_vm2, %v2379_v44, %v2418_v6  ;;  %v2380_v48 = vrot.slane %v2235_v61, 4 }
 0x3d3   : > { %3876 = vst.msk [vmem:[%s6479_s7 + $0x60] sm:$0xff] %vm885_vm3, %v3860_v39  ;;  %v2383_v1 = vsel %vm381_vm2, %v2235_v61, %v2382_v5  ;;  %v2427_v35 = vperm.slane %v2419_v16, %v4388_v15  ;;  %v2411_v55 = vperm.slane %v2405_v34, %v4388_v15 }
 0x3d4   : > { %3878 = vst.msk [vmem:[%s6479_s7 + $0x70] sm:$0xff] %vm885_vm3, %v3862_v9  ;;  %v2407_v23 = vsel %vm381_vm2, %v2375_v33, %v2406_v19  ;;  %v2381_v28 = vsel %vm381_vm2, %v2380_v48, %v6440_v41  ;;  %v2391_v57 = vperm.slane %v2383_v1, %v4385_v12  ;;  %v2423_v41 = vperm.slane %v2417_v45, %v4388_v15 }
 0x3d5   : > { %v2387_v21 = vperm.slane %v2381_v28, %v4385_v12  ;;  %v2415_v60 = vperm.slane %v2407_v23, %v4388_v15  ;;  %v2466_v58 = vrot.slane %v2427_v35, 4  ;;  %v2454_v27 = vrot.slane %v2411_v55, 4 }
 0x3d6   : > { %v2442_v46 = vrot.slane %v2391_v57, 4  ;;  %v2462_v25 = vrot.slane %v2423_v41, 4 }
 0x3d7   : > { %v2430_v42 = vrot.slane %v2387_v21, 4  ;;  %v2458_v18 = vrot.slane %v2415_v60, 4 }
 0x3d9   : > { %v2241_v49 = vpop.permute.xlu2 %2240 }
 0x3da   : > { %v2392_v8 = vrot.slane %v2241_v49, 4  ;;  %v2395_v31 = vsel %vm381_vm2, %v2241_v49, %v2394_v52 }
 0x3db   : > { %v2403_v62 = vperm.slane %v2395_v31, %v4385_v12 }
 0x3dc   : > { %v2393_v54 = vsel %vm381_vm2, %v2392_v8, %v2229_v51 }
 0x3dd   : > { %v2399_v43 = vperm.slane %v2393_v54, %v4385_v12  ;;  %v2440_v30 = vrot.slane %v2403_v62, 4  ;;  %v2443_v29 = vsel %vm381_vm2, %v2403_v62, %v2442_v46 }
 0x3de   : > { %v2451_v53 = vperm.slane %v2443_v29, %v4388_v15 }
 0x3df   : > { %v2428_v44 = vrot.slane %v2399_v43, 4  ;;  %v2431_v17 = vsel %vm381_vm2, %v2399_v43, %v2430_v42  ;;  %v2441_v63 = vsel %vm381_vm2, %v2440_v30, %v2391_v57 }
 0x3e0   : > { %v2439_v7 = vperm.slane %v2431_v17, %v4388_v15  ;;  %v2447_v51 = vperm.slane %v2441_v63, %v4388_v15  ;;  %v2464_v33 = vrot.slane %v2451_v53, 4  ;;  %v2467_v32 = vsel %vm381_vm2, %v2451_v53, %v2466_v58 }
 0x3e1   : > { %v2429_v47 = vsel %vm381_vm2, %v2428_v44, %v2387_v21  ;;  %v2616_v24 = vrot.slane %v2467_v32, 4  ;;  %v6534_v10 = vpop.permute.xlu2 %3342 }
 0x3e2   : > { %v2435_v37 = vperm.slane %v2429_v47, %v4388_v15  ;;  %v2456_v26 = vrot.slane %v2439_v7, 4  ;;  %v2459_v59 = vsel %vm381_vm2, %v2439_v7, %v2458_v18  ;;  %v2460_v39 = vrot.slane %v2447_v51, 4 }
 0x3e3   : > { %v2463_v11 = vsel %vm381_vm2, %v2447_v51, %v2462_v25  ;;  %v2465_v20 = vsel %vm381_vm2, %v2464_v33, %v2427_v35  ;;  %v2592_v9 = vrot.slane %v2459_v59, 4  ;;  %v3508_v36 = vrot.slane %v6534_v10, 4 }
 0x3e4   : > { %v2452_v45 = vrot.slane %v2435_v37, 4  ;;  %v2455_v6 = vsel %vm381_vm2, %v2435_v37, %v2454_v27  ;;  %v2457_v5 = vsel %vm381_vm2, %v2456_v26, %v2415_v60  ;;  %v2461_v61 = vsel %vm381_vm2, %v2460_v39, %v2423_v41 }
 0x3e5   : > { %v2580_v34 = vrot.slane %v2457_v5, 4  ;;  %v2593_v19 = vsel %vm381_vm2, %v2592_v9, %v2455_v6  ;;  %v2594_v16 = vrot.slane %v2455_v6, 4  ;;  %v2604_v48 = vrot.slane %v2465_v20, 4 }
 0x3e6   : > { %v2453_v23 = vsel %vm381_vm2, %v2452_v45, %v2411_v55  ;;  %v2599_v1 = vperm.slane %v2593_v19, %v4385_v12  ;;  %v2606_v28 = vrot.slane %v2461_v61, 4  ;;  %v2617_v57 = vsel %vm381_vm2, %v2616_v24, %v2463_v11 }
 0x3e7   : > { %v2581_v52 = vsel %vm381_vm2, %v2580_v34, %v2453_v23  ;;  %v2582_v21 = vrot.slane %v2453_v23, 4  ;;  %v2595_v49 = vsel %vm381_vm2, %v2459_v59, %v2594_v16  ;;  %v2605_v35 = vsel %vm381_vm2, %v2604_v48, %v2461_v61 }
 0x3e8   : > { %v2587_v8 = vperm.slane %v2581_v52, %v4385_v12  ;;  %v2603_v31 = vperm.slane %v2595_v49, %v4385_v12  ;;  %v2607_v60 = vsel %vm381_vm2, %v2465_v20, %v2606_v28  ;;  %v2611_v46 = vperm.slane %v2605_v35, %v4385_v12 }
 0x3e9   : > { %v2583_v62 = vsel %vm381_vm2, %v2457_v5, %v2582_v21  ;;  %v2615_v55 = vperm.slane %v2607_v60, %v4385_v12  ;;  %v2618_v41 = vrot.slane %v2463_v11, 4  ;;  %v2623_v54 = vperm.slane %v2617_v57, %v4385_v12  ;;  %v3349_v42 = vpop.permute.xlu2 %3348 }
 0x3ea   : > { %v2591_v43 = vperm.slane %v2583_v62, %v4385_v12  ;;  %v2628_v30 = vrot.slane %v2599_v1, 4  ;;  %v2630_v29 = vrot.slane %v2587_v8, 4  ;;  %v2640_v58 = vrot.slane %v2603_v31, 4 }
 0x3eb   : > { %v2619_v53 = vsel %vm381_vm2, %v2467_v32, %v2618_v41  ;;  %v2652_v18 = vrot.slane %v2623_v54, 4  ;;  %v2654_v44 = vrot.slane %v2611_v46, 4  ;;  %v2666_v17 = vrot.slane %v2615_v55, 4 }
 0x3ec   : > { %v2627_v63 = vperm.slane %v2619_v53, %v4385_v12  ;;  %v2629_v7 = vsel %vm381_vm2, %v2628_v30, %v2587_v8  ;;  %v2631_v51 = vsel %vm381_vm2, %v2599_v1, %v2630_v29  ;;  %v2641_v33 = vsel %vm381_vm2, %v2640_v58, %v2591_v43 }
 0x3ed   : > { %v2635_v27 = vperm.slane %v2629_v7, %v4388_v15  ;;  %v2639_v25 = vperm.slane %v2631_v51, %v4388_v15  ;;  %v2642_v47 = vrot.slane %v2591_v43, 4  ;;  %v2647_v24 = vperm.slane %v2641_v33, %v4388_v15 }
 0x3ee   : > { %v2653_v32 = vsel %vm381_vm2, %v2652_v18, %v2611_v46  ;;  %v2655_v37 = vsel %vm381_vm2, %v2623_v54, %v2654_v44  ;;  %v2664_v26 = vrot.slane %v2627_v63, 4  ;;  %v2667_v59 = vsel %vm381_vm2, %v2627_v63, %v2666_v17 }
 0x3ef   : > { %v2643_v39 = vsel %vm381_vm2, %v2603_v31, %v2642_v47  ;;  %v2659_v11 = vperm.slane %v2653_v32, %v4388_v15  ;;  %v2663_v20 = vperm.slane %v2655_v37, %v4388_v15  ;;  %v2675_v9 = vperm.slane %v2667_v59, %v4388_v15 }
 0x3f0   : > { %v2651_v45 = vperm.slane %v2643_v39, %v4388_v15  ;;  %v2665_v6 = vsel %vm381_vm2, %v2664_v26, %v2615_v55  ;;  %v2678_v5 = vrot.slane %v2635_v27, 4  ;;  %v2682_v61 = vrot.slane %v2639_v25, 4 }
 0x3f1   : > { %v2671_v34 = vperm.slane %v2665_v6, %v4388_v15  ;;  %v2676_v19 = vrot.slane %v2659_v11, 4  ;;  %v2680_v16 = vrot.slane %v2663_v20, 4  ;;  %v2686_v48 = vrot.slane %v2647_v24, 4  ;;  %v3355_v23 = vpop.permute.xlu2 %3354 }
 0x3f2   : > { %v2679_v1 = vsel %vm381_vm2, %v2659_v11, %v2678_v5  ;;  %v2683_v28 = vsel %vm381_vm2, %v2663_v20, %v2682_v61  ;;  %v2688_v57 = vrot.slane %v2675_v9, 4  ;;  %v2690_v52 = vrot.slane %v2651_v45, 4 }
 0x3f3   : > { %v2677_v21 = vsel %vm381_vm2, %v2676_v19, %v2635_v27  ;;  %v2681_v49 = vsel %vm381_vm2, %v2680_v16, %v2639_v25  ;;  %v2684_v35 = vrot.slane %v2671_v34, 4  ;;  %v2687_v8 = vsel %vm381_vm2, %v2671_v34, %v2686_v48 }
 0x3f4   : > { %v2689_v31 = vsel %vm381_vm2, %v2688_v57, %v2651_v45  ;;  %v2691_v60 = vsel %vm381_vm2, %v2675_v9, %v2690_v52  ;;  %v6585_v46 = vadd.f32 %v2677_v21, %v6036_v50  ;;  %v6588_v62 = vadd.f32 %v2679_v1, %v6030_v4 }
 0x3f5   : > { %v2685_v55 = vsel %vm381_vm2, %v2684_v35, %v2647_v24  ;;  %v6592_v41 = vadd.f32 %v2681_v49, %v6039_v56  ;;  %v6595_v54 = vadd.f32 %v2683_v28, %v6033_v2  ;;  %v6598_v43 = vadd.f32 %v2687_v8, %v6042_v22  ;;  %v3373_v22 = vpop.permute.xlu0 %3372 }
 0x3f6   : > { %v6601_v30 = vadd.f32 %v2685_v55, %v6045_v14  ;;  %v6604_v50 = vadd.f32 %v2689_v31, %v6051_v0  ;;  %v6607_v4 = vadd.f32 %v2691_v60, %v6048_v13  ;;  %v3494_v29 = vrot.slane %v3349_v42, 4 }
 0x3f7   : > { %v3497_v56 = vsel %vm381_vm2, %v3349_v42, %v3496_v3  ;;  %v3506_v58 = vrot.slane %v3355_v23, 4  ;;  %v3509_v2 = vsel %vm381_vm2, %v3355_v23, %v3508_v36  ;;  %v3518_v42 = vrot.slane %v3373_v22, 4 }
 0x3f8   : > { %v3495_v14 = vsel %vm381_vm2, %v3494_v29, %v6070_v40  ;;  %v3505_v0 = vperm.slane %v3497_v56, %v4385_v12  ;;  %v3517_v53 = vperm.slane %v3509_v2, %v4385_v12  ;;  %v3532_v25 = vrot.slane %v6331_v38, 4 }
 0x3f9   : > { %v3507_v13 = vsel %vm381_vm2, %v3506_v58, %v6534_v10  ;;  %v3361_v18 = vpop.permute.xlu2 %3360  ;;  %v3501_v44 = vperm.slane %v3495_v14, %v4385_v12 }
 0x3fa   : > { %v3513_v3 = vperm.slane %v3507_v13, %v4385_v12  ;;  %v3520_v17 = vrot.slane %v3361_v18, 4  ;;  %v3556_v63 = vrot.slane %v3505_v0, 4  ;;  %v3554_v36 = vrot.slane %v3517_v53, 4 }
 0x3fb   : > { %v3519_v7 = vsel %vm381_vm2, %v3518_v42, %v3361_v18  ;;  %v3544_v51 = vrot.slane %v3501_v44, 4 }
 0x3fc   : > { %v3521_v40 = vsel %vm381_vm2, %v3373_v22, %v3520_v17  ;;  %v3542_v33 = vrot.slane %v3513_v3, 4  ;;  %v3557_v27 = vsel %vm381_vm2, %v3517_v53, %v3556_v63  ;;  %v3525_v24 = vperm.slane %v3519_v7, %v4385_v12 }
 0x3fd   : > { %v3529_v10 = vperm.slane %v3521_v40, %v4385_v12  ;;  %v3545_v47 = vsel %vm381_vm2, %v3513_v3, %v3544_v51  ;;  %v3555_v32 = vsel %vm381_vm2, %v3554_v36, %v3505_v0  ;;  %v3565_v59 = vperm.slane %v3557_v27, %v4388_v15 }
 0x3fe   : > { %v3543_v26 = vsel %vm381_vm2, %v3542_v33, %v3501_v44  ;;  %v3553_v20 = vperm.slane %v3545_v47, %v4388_v15  ;;  %v3561_v6 = vperm.slane %v3555_v32, %v4388_v15  ;;  %v3568_v5 = vrot.slane %v3525_v24, 4 }
 0x3ff   : > { %v3580_v9 = vrot.slane %v3529_v10, 4  ;;  %v3549_v34 = vperm.slane %v3543_v26, %v4388_v15  ;;  %v3604_v23 = vrot.slane %v3565_v59, 4 }
 0x400   : > { %v3596_v28 = vrot.slane %v3553_v20, 4  ;;  %v3600_v60 = vrot.slane %v3561_v6, 4 }
 0x401   : > { %v3379_v37 = vpop.permute.xlu2 %3378  ;;  %v3592_v31 = vrot.slane %v3549_v34, 4 }
 0x402   : > { %v3530_v39 = vrot.slane %v3379_v37, 4  ;;  %v3533_v11 = vsel %vm381_vm2, %v3379_v37, %v3532_v25 }
 0x403   : > { %v3541_v45 = vperm.slane %v3533_v11, %v4385_v12 }
 0x404   : > { %v3531_v61 = vsel %vm381_vm2, %v3530_v39, %v6331_v38 }
 0x405   : > { %v3537_v19 = vperm.slane %v3531_v61, %v4385_v12  ;;  %v3578_v16 = vrot.slane %v3541_v45, 4  ;;  %v3581_v48 = vsel %vm381_vm2, %v3541_v45, %v3580_v9 }
 0x406   : > { %v3589_v1 = vperm.slane %v3581_v48, %v4388_v15 }
 0x407   : > { %v3566_v57 = vrot.slane %v3537_v19, 4  ;;  %v3569_v52 = vsel %vm381_vm2, %v3537_v19, %v3568_v5  ;;  %v3579_v21 = vsel %vm381_vm2, %v3578_v16, %v3529_v10 }
 0x408   : > { %v3577_v49 = vperm.slane %v3569_v52, %v4388_v15  ;;  %v3585_v38 = vperm.slane %v3579_v21, %v4388_v15  ;;  %v3602_v35 = vrot.slane %v3589_v1, 4  ;;  %v3605_v8 = vsel %vm381_vm2, %v3589_v1, %v3604_v23 }
 0x409   : > { %v3567_v55 = vsel %vm381_vm2, %v3566_v57, %v3525_v24  ;;  %v3754_v29 = vrot.slane %v3605_v8, 4 }
 0x40a   : > { %v3573_v56 = vperm.slane %v3567_v55, %v4388_v15  ;;  %v3594_v58 = vrot.slane %v3577_v49, 4  ;;  %v3597_v2 = vsel %vm381_vm2, %v3577_v49, %v3596_v28  ;;  %v3598_v22 = vrot.slane %v3585_v38, 4 }
 0x40b   : > { %v3601_v14 = vsel %vm381_vm2, %v3585_v38, %v3600_v60  ;;  %v3603_v0 = vsel %vm381_vm2, %v3602_v35, %v3565_v59  ;;  %v3730_v13 = vrot.slane %v3597_v2, 4 }
 0x40c   : > { %v3590_v53 = vrot.slane %v3573_v56, 4  ;;  %v3593_v18 = vsel %vm381_vm2, %v3573_v56, %v3592_v31  ;;  %v3595_v44 = vsel %vm381_vm2, %v3594_v58, %v3553_v20  ;;  %v3599_v3 = vsel %vm381_vm2, %v3598_v22, %v3561_v6 }
 0x40d   : > { %v3718_v42 = vrot.slane %v3595_v44, 4  ;;  %v3731_v17 = vsel %vm381_vm2, %v3730_v13, %v3593_v18  ;;  %v3732_v63 = vrot.slane %v3593_v18, 4  ;;  %v3742_v36 = vrot.slane %v3603_v0, 4 }
 0x40e   : > { %v3591_v7 = vsel %vm381_vm2, %v3590_v53, %v3549_v34  ;;  %v3737_v40 = vperm.slane %v3731_v17, %v4385_v12  ;;  %v3744_v51 = vrot.slane %v3599_v3, 4  ;;  %v3755_v33 = vsel %vm381_vm2, %v3754_v29, %v3601_v14  ;;  %v3847_v17 = vld [vmem:[%s6736_s3 + $0x8] sm:$0xff] }
 0x40f   : > { %v3719_v27 = vsel %vm381_vm2, %v3718_v42, %v3591_v7  ;;  %v3720_v10 = vrot.slane %v3591_v7, 4  ;;  %v3733_v25 = vsel %vm381_vm2, %v3597_v2, %v3732_v63  ;;  %v3743_v47 = vsel %vm381_vm2, %v3742_v36, %v3599_v3 }
 0x410   : > { %v3725_v24 = vperm.slane %v3719_v27, %v4385_v12  ;;  %v3741_v32 = vperm.slane %v3733_v25, %v4385_v12  ;;  %v3745_v37 = vsel %vm381_vm2, %v3603_v0, %v3744_v51  ;;  %v3749_v26 = vperm.slane %v3743_v47, %v4385_v12 }
 0x411   : > { %v3721_v59 = vsel %vm381_vm2, %v3595_v44, %v3720_v10  ;;  %v3753_v39 = vperm.slane %v3745_v37, %v4385_v12  ;;  %v3756_v11 = vrot.slane %v3601_v14, 4  ;;  %v3761_v20 = vperm.slane %v3755_v33, %v4385_v12 }
 0x412   : > { %v3729_v9 = vperm.slane %v3721_v59, %v4385_v12  ;;  %v3766_v45 = vrot.slane %v3737_v40, 4  ;;  %v3768_v6 = vrot.slane %v3725_v24, 4  ;;  %v3778_v5 = vrot.slane %v3741_v32, 4 }
 0x413   : > { %v3757_v61 = vsel %vm381_vm2, %v3605_v8, %v3756_v11  ;;  %v3790_v34 = vrot.slane %v3761_v20, 4  ;;  %v3792_v19 = vrot.slane %v3749_v26, 4  ;;  %v3804_v16 = vrot.slane %v3753_v39, 4 }
 0x414   : > { %v3765_v48 = vperm.slane %v3757_v61, %v4385_v12  ;;  %v3767_v23 = vsel %vm381_vm2, %v3766_v45, %v3725_v24  ;;  %v3769_v1 = vsel %vm381_vm2, %v3737_v40, %v3768_v6  ;;  %v3779_v28 = vsel %vm381_vm2, %v3778_v5, %v3729_v9 }
 0x415   : > { %v3773_v57 = vperm.slane %v3767_v23, %v4388_v15  ;;  %v3777_v52 = vperm.slane %v3769_v1, %v4388_v15  ;;  %v3780_v21 = vrot.slane %v3729_v9, 4  ;;  %v3785_v49 = vperm.slane %v3779_v28, %v4388_v15 }
 0x416   : > { %v3791_v38 = vsel %vm381_vm2, %v3790_v34, %v3749_v26  ;;  %v3793_v35 = vsel %vm381_vm2, %v3761_v20, %v3792_v19  ;;  %v3802_v8 = vrot.slane %v3765_v48, 4  ;;  %v3805_v12 = vsel %vm381_vm2, %v3765_v48, %v3804_v16 }
 0x417   : > { %v3781_v31 = vsel %vm381_vm2, %v3741_v32, %v3780_v21  ;;  %v3797_v60 = vperm.slane %v3791_v38, %v4388_v15  ;;  %v3801_v55 = vperm.slane %v3793_v35, %v4388_v15  ;;  %v3813_v29 = vperm.slane %v3805_v12, %v4388_v15 }
 0x418   : > { %v3789_v56 = vperm.slane %v3781_v31, %v4388_v15  ;;  %v3803_v58 = vsel %vm381_vm2, %v3802_v8, %v3753_v39  ;;  %v3816_v2 = vrot.slane %v3773_v57, 4  ;;  %v3820_v22 = vrot.slane %v3777_v52, 4 }
 0x419   : > { %v3809_v14 = vperm.slane %v3803_v58, %v4388_v15  ;;  %v3814_v0 = vrot.slane %v3797_v60, 4  ;;  %v3818_v13 = vrot.slane %v3801_v55, 4  ;;  %v3824_v53 = vrot.slane %v3785_v49, 4 }
 0x41a   : > { %v3817_v18 = vsel %vm381_vm2, %v3797_v60, %v3816_v2  ;;  %v3821_v44 = vsel %vm381_vm2, %v3801_v55, %v3820_v22  ;;  %v3826_v3 = vrot.slane %v3813_v29, 4  ;;  %v3828_v42 = vrot.slane %v3789_v56, 4 }
 0x41b   : > { %v3815_v63 = vsel %vm381_vm2, %v3814_v0, %v3773_v57  ;;  %v3819_v36 = vsel %vm381_vm2, %v3818_v13, %v3777_v52  ;;  %v3822_v7 = vrot.slane %v3809_v14, 4  ;;  %v3825_v15 = vsel %vm381_vm2, %v3809_v14, %v3824_v53 }
 0x41c   : > { %v3827_v40 = vsel %vm381_vm2, %v3826_v3, %v3789_v56  ;;  %v3829_v51 = vsel %vm381_vm2, %v3813_v29, %v3828_v42  ;;  %v3831_v33 = vadd.f32 %v3815_v63, %v6585_v46  ;;  %v3833_v27 = vadd.f32 %v3817_v18, %v6588_v62 }
 0x41d   : > { %v3823_v10 = vsel %vm381_vm2, %v3822_v7, %v3785_v49  ;;  %v3835_v25 = vadd.f32 %v3819_v36, %v6592_v41  ;;  %v3837_v47 = vadd.f32 %v3821_v44, %v6595_v54  ;;  %v3841_v24 = vadd.f32 %v3825_v15, %v6598_v43 }
 0x41e   : > { %v3839_v32 = vadd.f32 %v3823_v10, %v6601_v30  ;;  %v3843_v37 = vadd.f32 %v3827_v40, %v6604_v50  ;;  %v3849_v46 = vadd.f32 %v3847_v17, %v3831_v33  ;;  %v3845_v62 = vadd.f32 %v3829_v51, %v6607_v4 }
 0x41f   : > { %v3851_v26 = vadd.f32 %v3847_v17, %v3833_v27  ;;  %v3853_v59 = vadd.f32 %v3847_v17, %v3835_v25  ;;  %v3855_v39 = vadd.f32 %v3847_v17, %v3837_v47  ;;  %v3859_v54 = vadd.f32 %v3847_v17, %v3841_v24 }
 0x420   : > { %v3857_v41 = vadd.f32 %v3847_v17, %v3839_v32  ;;  %3865 = vst.msk [vmem:[%s6479_s7 + $0x8] sm:$0xff] %vm885_vm3, %v3849_v46  ;;  %v3861_v43 = vadd.f32 %v3847_v17, %v3843_v37  ;;  %v3863_v30 = vadd.f32 %v3847_v17, %v3845_v62 }
 0x421   : > { %3867 = vst.msk [vmem:[%s6479_s7 + $0x18] sm:$0xff] %vm885_vm3, %v3851_v26 }
 0x422   : > { %3869 = vst.msk [vmem:[%s6479_s7 + $0x28] sm:$0xff] %vm885_vm3, %v3853_v59 }
 0x423   : > { %3871 = vst.msk [vmem:[%s6479_s7 + $0x38] sm:$0xff] %vm885_vm3, %v3855_v39 }
 0x424   : > { %3873 = vst.msk [vmem:[%s6479_s7 + $0x48] sm:$0xff] %vm885_vm3, %v3857_v41 }
 0x425   : > { %3875 = vst.msk [vmem:[%s6479_s7 + $0x58] sm:$0xff] %vm885_vm3, %v3859_v54 }
 0x426   : > { %3877 = vst.msk [vmem:[%s6479_s7 + $0x68] sm:$0xff] %vm885_vm3, %v3861_v43 }
 0x427   : > { %3879 = vst.msk [vmem:[%s6479_s7 + $0x78] sm:$0xff] %vm885_vm3, %v3863_v30 }
 0x428 PF: > { %s14_s17 = sadd.s32 1, %s4298_s17   ;;  %s6814_s15 = smov %s4294_s16 }
 0x429   : > { %p11_p5 = scmp.ge.s32.totalorder %s14_s17, 4   ;;  %s6815_s16 = smov %s6817_s18 }
 0x42b   :  { %13 = sbr.rel (!%p11_p5) target bundleno = 2 (0x2), region = 68 }

</bundles_post_ra>
